<compile_context>
chip_gen: v5e
topology: v5e:2x2
jax: 0.10.0
libtpu: 0.0.40
codegen_flags: <defaults>
</compile_context>

<pallas_src>
import jax
import jax.numpy as jnp
from jax.experimental import pallas as pl
from jax.experimental.pallas import tpu as pltpu


def _leaky_relu(h, slope=0.1):
    # max(h, slope*h) == LeakyReLU(slope) for 0 < slope < 1; one mul + one max
    # instead of cmp + mul + select.
    return jnp.maximum(h, slope * h)


def critic_kernel(x_ref,
                  w1, b1, w2, b2, w3, b3, w4, b4, w5, b5, w6, b6,
                  o_ref):
    """Fused forward for one batch tile: 5 MXU matmuls + VPU tail, all in VMEM."""
    # Layer 1: f32 matmul (K padded to 128), bias + LeakyReLU in f32, then
    # cast once to bf16 for the downstream MXU layers.
    z = jnp.dot(x_ref[...], w1[...], preferred_element_type=jnp.float32) + b1[...]
    h = _leaky_relu(z).astype(jnp.bfloat16)

    # Layers 2-4: bf16 matmul with f32 accumulation, activation applied in
    # bf16 (halves VALU issues and vreg pressure on bf16-VPU chips).
    for (w, b) in ((w2, b2), (w3, b3), (w4, b4)):
        z = jnp.dot(h, w[...], preferred_element_type=jnp.float32) + b[...]
        h = _leaky_relu(z.astype(jnp.bfloat16))

    # Layer 5: keep the activation in f32 -- it feeds the f32 VPU tail below.
    z = jnp.dot(h, w5[...], preferred_element_type=jnp.float32) + b5[...]
    h5 = _leaky_relu(z)                                        # (tile, hidden) f32

    # Final Linear(hidden, 1): N=1 would waste the MXU and force lane-sparse
    # masked stores, so do it as a VPU multiply + lane reduction and emit the
    # tile lane-dense as shape (1, 1, batch_tile).
    q = jnp.sum(h5 * w6[...], axis=-1)                         # (tile,) f32
    q = q.reshape(1, 1, -1) + b6[...].reshape(1, 1, 1)         # (1, 1, tile)
    o_ref[...] = q.astype(o_ref.dtype)


def critic_forward(x, params, *, batch_tile=None):
    """x: (B, inputDim) float32.  params: list of (W, b), W=(in,out), b=(1,out)."""
    B, in_dim = x.shape
    hidden = params[0][0].shape[1]

    if batch_tile is None:
        # Small batches: 128-row tiles keep the grid >= 2 so both v7x TCs get
        # work; larger batches: 256 rows (full MXU M).  On v5e prefer 128.
        batch_tile = 128 if B <= 256 else 256
    assert batch_tile % 128 == 0, "batch_tile should be a multiple of 128"

    num_tiles = pl.cdiv(B, batch_tile)
    b_pad = num_tiles * batch_tile
    if b_pad != B:                                   # batch tail via zero padding
        x = jnp.pad(x, ((0, b_pad - B), (0, 0)))

    # Pad the feature dim to a multiple of 128 lanes: unmasked input DMA and a
    # full-K first matmul; zero columns/rows don't change the result.
    in_pad = pl.cdiv(in_dim, 128) * 128
    if in_pad != in_dim:
        x = jnp.pad(x, ((0, 0), (0, in_pad - in_dim)))
    x = x.astype(jnp.float32)

    # x tiled along batch; params are grid-invariant whole arrays kept in VMEM.
    vmem_whole = pl.BlockSpec(memory_space=pltpu.MemorySpace.VMEM)
    in_specs = [pl.BlockSpec((batch_tile, in_pad), lambda i: (i, 0))]

    w1, b1 = params[0]
    if in_pad != in_dim:
        w1 = jnp.pad(w1, ((0, in_pad - in_dim), (0, 0)))
    flat_params = [w1.astype(jnp.float32), b1.astype(jnp.float32)]   # layer 1 f32
    in_specs += [vmem_whole, vmem_whole]
    for (w, b) in params[1:-1]:                                      # layers 2-5 bf16
        flat_params += [w.astype(jnp.bfloat16), b.astype(jnp.float32)]
        in_specs += [vmem_whole, vmem_whole]
    w6, b6 = params[-1]
    flat_params += [w6.reshape(1, -1).astype(jnp.float32),           # (1, hidden)
                    b6.reshape(1, 1).astype(jnp.float32)]            # (1, 1)
    in_specs += [vmem_whole, vmem_whole]

    out_spec = pl.BlockSpec((1, 1, batch_tile), lambda i: (i, 0, 0))

    flops = 2 * b_pad * (in_pad * hidden + 4 * hidden * hidden + hidden)
    bytes_accessed = (int(x.size) * 4
                      + sum(int(p.size) * p.dtype.itemsize for p in flat_params)
                      + b_pad * 4)

    out = pl.pallas_call(
        critic_kernel,
        out_shape=jax.ShapeDtypeStruct((num_tiles, 1, batch_tile), jnp.float32),
        grid_spec=pltpu.PrefetchScalarGridSpec(
            num_scalar_prefetch=0,
            grid=(num_tiles,),
            in_specs=in_specs,
            out_specs=out_spec,
        ),
        compiler_params=pltpu.CompilerParams(
            dimension_semantics=("parallel",)),
        cost_estimate=pl.CostEstimate(
            flops=flops, transcendentals=0, bytes_accessed=bytes_accessed),
    )(x, *flat_params)

    return out.reshape(b_pad, 1)[:B]


def init_params(key, input_dim, hidden_dim):
    """Deterministic synthetic init matching the layer shapes of CriticNet."""
    dims = [(input_dim, hidden_dim)] + [(hidden_dim, hidden_dim)] * 4 + [(hidden_dim, 1)]
    params = []
    for (din, dout) in dims:
        key, kw, kb = jax.random.split(key, 3)
        bound = 1.0 / jnp.sqrt(din)     # same scale as PyTorch Linear default
        w = jax.random.uniform(kw, (din, dout), jnp.float32, -bound, bound)
        b = jax.random.uniform(kb, (1, dout), jnp.float32, -bound, bound)
        params.append((w, b))
    return params


def reference_forward(x, params):
    h = x
    for i, (w, b) in enumerate(params):
        h = h @ w + b
        if i < len(params) - 1:
            h = _leaky_relu(h)
    return h


if __name__ == "__main__":
    key = jax.random.PRNGKey(0)
    # hidden_dim=128 fills the 128-lane vreg / MXU width; batch=500 exercises
    # the cdiv + padding path and yields grid=2 (keeps both v7x TCs busy).
    input_dim, hidden_dim, batch = 16, 128, 500

    key, kx = jax.random.split(key)
    x = jax.random.normal(kx, (batch, input_dim), jnp.float32)
    params = init_params(key, input_dim, hidden_dim)

    q = critic_forward(x, params, batch_tile=256)
    q = jax.block_until_ready(q)

    q_ref = reference_forward(x, params)
    assert q.shape == (batch, 1)
    # Layers 2-5 use bf16 matmul inputs / bf16 activations with f32
    # accumulation -> looser tolerance vs. the f32 reference.
    assert jnp.allclose(q, q_ref, atol=2e-2, rtol=2e-2), "mismatch vs reference"

    # TODO(synk): save()/load()/freeze() are file-I/O / autograd-state methods
    # with no kernel equivalent; only forward() is implemented.
    print("KERNEL_OK")
</pallas_src>

<mosaic_0001>
module attributes {stable_mosaic.version = 11 : i64} {
  func.func @critic_kernel(%arg0: i32, %arg1: memref<256x128xf32, #tpu.memory_space<vmem>>, %arg2: memref<128x128xf32, #tpu.memory_space<vmem>>, %arg3: memref<1x128xf32, #tpu.memory_space<vmem>>, %arg4: memref<128x128xbf16, #tpu.memory_space<vmem>>, %arg5: memref<1x128xf32, #tpu.memory_space<vmem>>, %arg6: memref<128x128xbf16, #tpu.memory_space<vmem>>, %arg7: memref<1x128xf32, #tpu.memory_space<vmem>>, %arg8: memref<128x128xbf16, #tpu.memory_space<vmem>>, %arg9: memref<1x128xf32, #tpu.memory_space<vmem>>, %arg10: memref<128x128xbf16, #tpu.memory_space<vmem>>, %arg11: memref<1x128xf32, #tpu.memory_space<vmem>>, %arg12: memref<1x128xf32, #tpu.memory_space<vmem>>, %arg13: memref<1x1xf32, #tpu.memory_space<vmem>>, %arg14: memref<1x1x256xf32, #tpu.memory_space<vmem>>) attributes {dimension_semantics = [#tpu.dimension_semantics<parallel>], iteration_bounds = array<i64: 2>, scalar_prefetch = 0 : i64, scratch_operands = 0 : i64, tpu.core_type = #tpu.core_type<tc>, window_params = [{transform_indices = @transform_0, window_bounds = array<i64: 256, 128>}, {pipeline_mode = #tpu.pipeline_mode<synchronous>, transform_indices = @transform_1, window_bounds = array<i64: 128, 128>}, {pipeline_mode = #tpu.pipeline_mode<synchronous>, transform_indices = @transform_2, window_bounds = array<i64: 1, 128>}, {pipeline_mode = #tpu.pipeline_mode<synchronous>, transform_indices = @transform_3, window_bounds = array<i64: 128, 128>}, {pipeline_mode = #tpu.pipeline_mode<synchronous>, transform_indices = @transform_4, window_bounds = array<i64: 1, 128>}, {pipeline_mode = #tpu.pipeline_mode<synchronous>, transform_indices = @transform_5, window_bounds = array<i64: 128, 128>}, {pipeline_mode = #tpu.pipeline_mode<synchronous>, transform_indices = @transform_6, window_bounds = array<i64: 1, 128>}, {pipeline_mode = #tpu.pipeline_mode<synchronous>, transform_indices = @transform_7, window_bounds = array<i64: 128, 128>}, {pipeline_mode = #tpu.pipeline_mode<synchronous>, transform_indices = @transform_8, window_bounds = array<i64: 1, 128>}, {pipeline_mode = #tpu.pipeline_mode<synchronous>, transform_indices = @transform_9, window_bounds = array<i64: 128, 128>}, {pipeline_mode = #tpu.pipeline_mode<synchronous>, transform_indices = @transform_10, window_bounds = array<i64: 1, 128>}, {pipeline_mode = #tpu.pipeline_mode<synchronous>, transform_indices = @transform_11, window_bounds = array<i64: 1, 128>}, {pipeline_mode = #tpu.pipeline_mode<synchronous>, transform_indices = @transform_12, window_bounds = array<i64: 1, 1>}, {transform_indices = @transform_13, window_bounds = array<i64: 1, 1, 256>}]} {
    %c0 = arith.constant 0 : index
    %c0_0 = arith.constant 0 : index
    %0 = vector.load %arg1[%c0, %c0_0] : memref<256x128xf32, #tpu.memory_space<vmem>>, vector<256x128xf32>
    %c0_1 = arith.constant 0 : index
    %c0_2 = arith.constant 0 : index
    %1 = vector.load %arg2[%c0_1, %c0_2] : memref<128x128xf32, #tpu.memory_space<vmem>>, vector<128x128xf32>
    %cst = arith.constant dense<0.000000e+00> : vector<256x128xf32>
    %2 = tpu.matmul %0, %1, %cst {dimension_numbers = #tpu.dot_dimension_numbers<[1], [0], [0], [1], [0, 0, 1, 1], [], []>} : vector<256x128xf32>, vector<128x128xf32>, vector<256x128xf32> -> vector<256x128xf32>
    %c0_3 = arith.constant 0 : index
    %c0_4 = arith.constant 0 : index
    %3 = vector.load %arg3[%c0_3, %c0_4] : memref<1x128xf32, #tpu.memory_space<vmem>>, vector<1x128xf32>
    %4 = vector.broadcast %3 : vector<1x128xf32> to vector<256x128xf32>
    %5 = arith.addf %2, %4 : vector<256x128xf32>
    %cst_5 = arith.constant 1.000000e-01 : f32
    %6 = vector.broadcast %cst_5 : f32 to vector<256x128xf32>
    %7 = arith.mulf %6, %5 : vector<256x128xf32>
    %8 = arith.maximumf %5, %7 : vector<256x128xf32>
    %9 = arith.truncf %8 : vector<256x128xf32> to vector<256x128xbf16>
    %c0_6 = arith.constant 0 : index
    %c0_7 = arith.constant 0 : index
    %10 = vector.load %arg4[%c0_6, %c0_7] : memref<128x128xbf16, #tpu.memory_space<vmem>>, vector<128x128xbf16>
    %cst_8 = arith.constant dense<0.000000e+00> : vector<256x128xf32>
    %11 = tpu.matmul %9, %10, %cst_8 {dimension_numbers = #tpu.dot_dimension_numbers<[1], [0], [0], [1], [0, 0, 1, 1], [], []>} : vector<256x128xbf16>, vector<128x128xbf16>, vector<256x128xf32> -> vector<256x128xf32>
    %c0_9 = arith.constant 0 : index
    %c0_10 = arith.constant 0 : index
    %12 = vector.load %arg5[%c0_9, %c0_10] : memref<1x128xf32, #tpu.memory_space<vmem>>, vector<1x128xf32>
    %13 = vector.broadcast %12 : vector<1x128xf32> to vector<256x128xf32>
    %14 = arith.addf %11, %13 : vector<256x128xf32>
    %15 = arith.truncf %14 : vector<256x128xf32> to vector<256x128xbf16>
    %cst_11 = arith.constant 1.000980e-01 : bf16
    %16 = vector.broadcast %cst_11 : bf16 to vector<256x128xbf16>
    %17 = arith.mulf %16, %15 : vector<256x128xbf16>
    %18 = arith.maximumf %15, %17 : vector<256x128xbf16>
    %c0_12 = arith.constant 0 : index
    %c0_13 = arith.constant 0 : index
    %19 = vector.load %arg6[%c0_12, %c0_13] : memref<128x128xbf16, #tpu.memory_space<vmem>>, vector<128x128xbf16>
    %cst_14 = arith.constant dense<0.000000e+00> : vector<256x128xf32>
    %20 = tpu.matmul %18, %19, %cst_14 {dimension_numbers = #tpu.dot_dimension_numbers<[1], [0], [0], [1], [0, 0, 1, 1], [], []>} : vector<256x128xbf16>, vector<128x128xbf16>, vector<256x128xf32> -> vector<256x128xf32>
    %c0_15 = arith.constant 0 : index
    %c0_16 = arith.constant 0 : index
    %21 = vector.load %arg7[%c0_15, %c0_16] : memref<1x128xf32, #tpu.memory_space<vmem>>, vector<1x128xf32>
    %22 = vector.broadcast %21 : vector<1x128xf32> to vector<256x128xf32>
    %23 = arith.addf %20, %22 : vector<256x128xf32>
    %24 = arith.truncf %23 : vector<256x128xf32> to vector<256x128xbf16>
    %cst_17 = arith.constant 1.000980e-01 : bf16
    %25 = vector.broadcast %cst_17 : bf16 to vector<256x128xbf16>
    %26 = arith.mulf %25, %24 : vector<256x128xbf16>
    %27 = arith.maximumf %24, %26 : vector<256x128xbf16>
    %c0_18 = arith.constant 0 : index
    %c0_19 = arith.constant 0 : index
    %28 = vector.load %arg8[%c0_18, %c0_19] : memref<128x128xbf16, #tpu.memory_space<vmem>>, vector<128x128xbf16>
    %cst_20 = arith.constant dense<0.000000e+00> : vector<256x128xf32>
    %29 = tpu.matmul %27, %28, %cst_20 {dimension_numbers = #tpu.dot_dimension_numbers<[1], [0], [0], [1], [0, 0, 1, 1], [], []>} : vector<256x128xbf16>, vector<128x128xbf16>, vector<256x128xf32> -> vector<256x128xf32>
    %c0_21 = arith.constant 0 : index
    %c0_22 = arith.constant 0 : index
    %30 = vector.load %arg9[%c0_21, %c0_22] : memref<1x128xf32, #tpu.memory_space<vmem>>, vector<1x128xf32>
    %31 = vector.broadcast %30 : vector<1x128xf32> to vector<256x128xf32>
    %32 = arith.addf %29, %31 : vector<256x128xf32>
    %33 = arith.truncf %32 : vector<256x128xf32> to vector<256x128xbf16>
    %cst_23 = arith.constant 1.000980e-01 : bf16
    %34 = vector.broadcast %cst_23 : bf16 to vector<256x128xbf16>
    %35 = arith.mulf %34, %33 : vector<256x128xbf16>
    %36 = arith.maximumf %33, %35 : vector<256x128xbf16>
    %c0_24 = arith.constant 0 : index
    %c0_25 = arith.constant 0 : index
    %37 = vector.load %arg10[%c0_24, %c0_25] : memref<128x128xbf16, #tpu.memory_space<vmem>>, vector<128x128xbf16>
    %cst_26 = arith.constant dense<0.000000e+00> : vector<256x128xf32>
    %38 = tpu.matmul %36, %37, %cst_26 {dimension_numbers = #tpu.dot_dimension_numbers<[1], [0], [0], [1], [0, 0, 1, 1], [], []>} : vector<256x128xbf16>, vector<128x128xbf16>, vector<256x128xf32> -> vector<256x128xf32>
    %c0_27 = arith.constant 0 : index
    %c0_28 = arith.constant 0 : index
    %39 = vector.load %arg11[%c0_27, %c0_28] : memref<1x128xf32, #tpu.memory_space<vmem>>, vector<1x128xf32>
    %40 = vector.broadcast %39 : vector<1x128xf32> to vector<256x128xf32>
    %41 = arith.addf %38, %40 : vector<256x128xf32>
    %cst_29 = arith.constant 1.000000e-01 : f32
    %42 = vector.broadcast %cst_29 : f32 to vector<256x128xf32>
    %43 = arith.mulf %42, %41 : vector<256x128xf32>
    %44 = arith.maximumf %41, %43 : vector<256x128xf32>
    %c0_30 = arith.constant 0 : index
    %c0_31 = arith.constant 0 : index
    %45 = vector.load %arg12[%c0_30, %c0_31] : memref<1x128xf32, #tpu.memory_space<vmem>>, vector<1x128xf32>
    %46 = vector.broadcast %45 : vector<1x128xf32> to vector<256x128xf32>
    %47 = arith.mulf %44, %46 : vector<256x128xf32>
    %cst_32 = arith.constant dense<0.000000e+00> : vector<256xf32>
    %48 = vector.multi_reduction <add>, %47, %cst_32 [1] : vector<256x128xf32> to vector<256xf32>
    %49 = vector.shape_cast %48 : vector<256xf32> to vector<1x1x256xf32>
    %c0_33 = arith.constant 0 : index
    %c0_34 = arith.constant 0 : index
    %50 = vector.load %arg13[%c0_33, %c0_34] : memref<1x1xf32, #tpu.memory_space<vmem>>, vector<1x1xf32>
    %51 = vector.shape_cast %50 : vector<1x1xf32> to vector<1x1x1xf32>
    %52 = vector.broadcast %51 : vector<1x1x1xf32> to vector<1x1x256xf32>
    %53 = arith.addf %49, %52 : vector<1x1x256xf32>
    %c0_35 = arith.constant 0 : index
    %c0_36 = arith.constant 0 : index
    %c0_37 = arith.constant 0 : index
    %54 = vector.load %arg14[%c0_35, %c0_36, %c0_37] : memref<1x1x256xf32, #tpu.memory_space<vmem>>, vector<1x1x256xf32>
    tpu.vector_store %arg14[%c0_35, %c0_36, %c0_37], %53 {strides = array<i32>} : memref<1x1x256xf32, #tpu.memory_space<vmem>>, vector<1x1x256xf32>,
    return
  }
  func.func @transform_0(%arg0: i32) -> (i32, i32) {
    %c0_i32 = arith.constant 0 : i32
    %c0_i32_0 = arith.constant 0 : i32
    return %arg0, %c0_i32 : i32, i32
  }
  func.func @transform_1(%arg0: i32) -> (i32, i32) {
    %c0_i32 = arith.constant 0 : i32
    %c0_i32_0 = arith.constant 0 : i32
    %c0_i32_1 = arith.constant 0 : i32
    return %c0_i32, %c0_i32_0 : i32, i32
  }
  func.func @transform_2(%arg0: i32) -> (i32, i32) {
    %c0_i32 = arith.constant 0 : i32
    %c0_i32_0 = arith.constant 0 : i32
    %c0_i32_1 = arith.constant 0 : i32
    return %c0_i32, %c0_i32_0 : i32, i32
  }
  func.func @transform_3(%arg0: i32) -> (i32, i32) {
    %c0_i32 = arith.constant 0 : i32
    %c0_i32_0 = arith.constant 0 : i32
    %c0_i32_1 = arith.constant 0 : i32
    return %c0_i32, %c0_i32_0 : i32, i32
  }
  func.func @transform_4(%arg0: i32) -> (i32, i32) {
    %c0_i32 = arith.constant 0 : i32
    %c0_i32_0 = arith.constant 0 : i32
    %c0_i32_1 = arith.constant 0 : i32
    return %c0_i32, %c0_i32_0 : i32, i32
  }
  func.func @transform_5(%arg0: i32) -> (i32, i32) {
    %c0_i32 = arith.constant 0 : i32
    %c0_i32_0 = arith.constant 0 : i32
    %c0_i32_1 = arith.constant 0 : i32
    return %c0_i32, %c0_i32_0 : i32, i32
  }
  func.func @transform_6(%arg0: i32) -> (i32, i32) {
    %c0_i32 = arith.constant 0 : i32
    %c0_i32_0 = arith.constant 0 : i32
    %c0_i32_1 = arith.constant 0 : i32
    return %c0_i32, %c0_i32_0 : i32, i32
  }
  func.func @transform_7(%arg0: i32) -> (i32, i32) {
    %c0_i32 = arith.constant 0 : i32
    %c0_i32_0 = arith.constant 0 : i32
    %c0_i32_1 = arith.constant 0 : i32
    return %c0_i32, %c0_i32_0 : i32, i32
  }
  func.func @transform_8(%arg0: i32) -> (i32, i32) {
    %c0_i32 = arith.constant 0 : i32
    %c0_i32_0 = arith.constant 0 : i32
    %c0_i32_1 = arith.constant 0 : i32
    return %c0_i32, %c0_i32_0 : i32, i32
  }
  func.func @transform_9(%arg0: i32) -> (i32, i32) {
    %c0_i32 = arith.constant 0 : i32
    %c0_i32_0 = arith.constant 0 : i32
    %c0_i32_1 = arith.constant 0 : i32
    return %c0_i32, %c0_i32_0 : i32, i32
  }
  func.func @transform_10(%arg0: i32) -> (i32, i32) {
    %c0_i32 = arith.constant 0 : i32
    %c0_i32_0 = arith.constant 0 : i32
    %c0_i32_1 = arith.constant 0 : i32
    return %c0_i32, %c0_i32_0 : i32, i32
  }
  func.func @transform_11(%arg0: i32) -> (i32, i32) {
    %c0_i32 = arith.constant 0 : i32
    %c0_i32_0 = arith.constant 0 : i32
    %c0_i32_1 = arith.constant 0 : i32
    return %c0_i32, %c0_i32_0 : i32, i32
  }
  func.func @transform_12(%arg0: i32) -> (i32, i32) {
    %c0_i32 = arith.constant 0 : i32
    %c0_i32_0 = arith.constant 0 : i32
    %c0_i32_1 = arith.constant 0 : i32
    return %c0_i32, %c0_i32_0 : i32, i32
  }
  func.func @transform_13(%arg0: i32) -> (i32, i32, i32) {
    %c0_i32 = arith.constant 0 : i32
    %c0_i32_0 = arith.constant 0 : i32
    %c0_i32_1 = arith.constant 0 : i32
    return %arg0, %c0_i32, %c0_i32_0 : i32, i32, i32
  }
}

</mosaic_0001>

<bundles_post_ra>
// kernel: tpu_custom_call.1
= control target key start
LH: loop header
LB: loop body
LE: loop exit
PB: predicated region body
PF: predicated region fallthrough
CT: control target
= control target key end

     0   :  { %s4500_s0 = inlined_call_operand.hbm [shape: f32[512,128], index: 0, kind: input, shape index: {}]   ;;  %s4501_s1 = inlined_call_operand.hbm [shape: f32[128,128], index: 1, kind: input, shape index: {}]   ;;  %s4502_s2 = inlined_call_operand.vmem [shape: f32[1,128], index: 2, kind: input, shape index: {}]   ;;  %s4503_s3 = inlined_call_operand.hbm [shape: bf16[128,128], index: 3, kind: input, shape index: {}]   ;;  %s4504_s4 = inlined_call_operand.vmem [shape: f32[1,128], index: 4, kind: input, shape index: {}]   ;;  %s4505_s5 = inlined_call_operand.hbm [shape: bf16[128,128], index: 5, kind: input, shape index: {}]   ;;  %s4506_s6 = inlined_call_operand.vmem [shape: f32[1,128], index: 6, kind: input, shape index: {}]   ;;  %s4507_s7 = inlined_call_operand.hbm [shape: bf16[128,128], index: 7, kind: input, shape index: {}]   ;;  %s4508_s8 = inlined_call_operand.vmem [shape: f32[1,128], index: 8, kind: input, shape index: {}]   ;;  %s4509_s9 = inlined_call_operand.hbm [shape: bf16[128,128], index: 9, kind: input, shape index: {}]   ;;  %s4510_s10 = inlined_call_operand.vmem [shape: f32[1,128], index: 10, kind: input, shape index: {}]   ;;  %s4511_s11 = inlined_call_operand.vmem [shape: f32[1,128], index: 11, kind: input, shape index: {}]   ;;  %s4512_s12 = inlined_call_operand.<no memory space> [shape: f32[1,1], index: 12, kind: input, shape index: {}]   ;;  %s4513_s13 = inlined_call_operand.hbm [shape: f32[2,1,256], index: 13, kind: output, shape index: {}]  }
   0x1   :  { %4518 = sst [smem:[#allocation20_spill]] %s4501_s1  ;;  %v18_v0 = vstv %s4512_s12 }
   0x2   :  { %4519 = sst [smem:[#allocation21_spill]] %s4503_s3  ;;  %19 = vst [vmem:[#allocation2] sm:$0x1] %v18_v0 }
   0x3   :  { %4520 = sst [smem:[#allocation22_spill]] %s4505_s5 }
   0x4   :  { %4521 = sst [smem:[#allocation23_spill]] %s4507_s7 }
   0x5   :  { %4522 = sst [smem:[#allocation24_spill]] %s4511_s11 }
   0x6   :  { %4523 = sst [smem:[#allocation25_spill]] %s4513_s13 }
   0x7   :  { %20 = vsyncpa [#allocation4], 0 }
   0x8   :  { %22 = vsyncpa [#allocation4 + $0x1], 0 }
   0x9   :  { %23 = vsyncpa [#allocation7], 0 }
   0xa   :  { %24 = vsyncpa [#allocation10], 0 }
   0xb   :  { %25 = vsyncpa [#allocation13], 0 }
   0xc   :  { %26 = vsyncpa [#allocation5], 0 }
   0xd   :  { %28 = vsyncpa [#allocation5 + $0x1], 0  ;;  %s3854_s27 = smov 0   ;;  %s3856_s28 = smov 0  }
   0xe   :  { %s3858_s29 = smov 0   ;;  %s3860_s30 = smov 0  }
   0xf LB: > { %s4524_s1 = sld [smem:[#allocation20_spill]]  ;;  %s3878_s16 = sadd.s32 4294967295, %s3769_s30   ;;  %s3769_s30 = sphi %s3860_s30, %s4542_s30   ;;  %s3765_s29 = sphi %s3858_s29, %s4541_s29   ;;  %s3761_s28 = sphi %s3856_s28, %s4540_s28   ;;  %s3757_s27 = sphi %s3854_s27, %s4539_s27  }
  0x10   : > { %p3164_p0 = scmp.ge.s32.totalorder %s3769_s30, 1  ;;  %p55_p1 = scmp.eq.s32.totalorder %s3878_s16, 0 }
  0x11   : > { %p343_p2 = scmp.lt.s32.totalorder %s3769_s30, 3  ;;  %s3771_s18 = smov [#allocation6]  }
  0x12   : > { %s356_s19 = sshll.u32 %s3771_s18, 4  ;;  %s4527_s5 = sld [smem:[#allocation22_spill]]  ;;  %s357_s19 = int_to_ptr.vmem [resolvable:$true] %s356_s19 }
  0x13   : > { %p3883_p3 = pnand %p3164_p0, %p343_p2  ;;  %s4516_s24 = smov 128  }
  0x14   : > { %s4517_s25 = smov 8   ;;  %s3774_s26 = smov [#allocation9]  }
  0x15   : > { %s354_s15 = sshll.u32 %s4524_s1, 4  ;;  %p3419_p4 = pneg %p3883_p3  ;;  %s355_s15 = int_to_ptr.hbm [resolvable:$true] %s354_s15 }
  0x16   : > { %s390_s12 = sshll.u32 %s3774_s26, 4  ;;  %s4528_s3 = sld [smem:[#allocation21_spill]]  ;;  %s391_s12 = int_to_ptr.vmem [resolvable:$true] %s390_s12 }
  0x17   : > { %p3892_p6 = pnand %p3419_p4, %p55_p1  ;;  %s3775_s21 = smov 64  }
  0x18   : > { %s388_s23 = sshll.u32 %s4527_s5, 4  ;;  %s3776_s22 = smov 4   ;;  %s389_s23 = int_to_ptr.hbm [resolvable:$true] %s388_s23 }
  0x19   : > { %3422 = dma.hbm_to_vmem [thread:$0]  (!%p3892_p6), %s355_s15, 2048, %s357_s19, [#allocation7], %s4516_s24, %s4516_s24, %s4517_s25  }
  0x1a   : > { %3428 = dma.hbm_to_vmem [thread:$0]  (!%p3892_p6), %s389_s23, 1024, %s391_s12, [#allocation10], %s3775_s21, %s3775_s21, %s3776_s22  }
  0x1b   : > { %s4529_s7 = sld [smem:[#allocation23_spill]]  ;;  %s3777_s15 = smov [#allocation8]  }
  0x1c   : > { %s371_s1 = sshll.u32 %s4528_s3, 4  ;;  %s373_s19 = sshll.u32 %s3777_s15, 4  ;;  %s372_s1 = int_to_ptr.hbm [resolvable:$true] %s371_s1  ;;  %s374_s19 = int_to_ptr.vmem [resolvable:$true] %s373_s19 }
  0x1d   : > { %3425 = dma.hbm_to_vmem [thread:$0]  (!%p3892_p6), %s372_s1, 1024, %s374_s19, [#allocation7], %s3775_s21, %s3775_s21, %s3776_s22  }
  0x1e   : > { %s3778_s26 = smov [#allocation11]   ;;  %s422_s5 = sshll.u32 %s4509_s9, 4  ;;  %s423_s5 = int_to_ptr.hbm [resolvable:$true] %s422_s5 }
  0x1f   : > { %s407_s23 = sshll.u32 %s3778_s26, 4  ;;  %s3779_s13 = smov [#allocation12]   ;;  %s408_s23 = int_to_ptr.vmem [resolvable:$true] %s407_s23 }
  0x20   : > { %s424_s18 = sshll.u32 %s3779_s13, 4  ;;  %s3163_s1 = sadd.s32 4294967294, %s3769_s30   ;;  %s425_s18 = int_to_ptr.vmem [resolvable:$true] %s424_s18 }
  0x21   : > { %s405_s11 = sshll.u32 %s4529_s7, 4  ;;  %s3923_s15 = sadd.s32 1, %s3769_s30   ;;  %s406_s11 = int_to_ptr.hbm [resolvable:$true] %s405_s11 }
  0x22   : > { %3431 = dma.hbm_to_vmem [thread:$0]  (!%p3892_p6), %s406_s11, 1024, %s408_s23, [#allocation10], %s3775_s21, %s3775_s21, %s3776_s22  }
  0x23   : > { %3434 = dma.hbm_to_vmem [thread:$0]  (!%p3892_p6), %s423_s5, 1024, %s425_s18, [#allocation13], %s3775_s21, %s3775_s21, %s3776_s22  }
  0x24   : > { %s41_s19 = sadd.s32 1, %s3765_s29  ;;  %s38_s26 = ssub.s32 %s3769_s30, %s3923_s15 }
  0x25   : > { %p48_p7 = scmp.ne.s32.totalorder %s3765_s29, %s3761_s28  ;;  %p39_p8 = scmp.eq.s32.totalorder %s38_s26, 0 }
  0x26   : > { %p49_p9 = scmp.eq.s32.totalorder %s3769_s30, 0  ;;  %p54_p10 = scmp.ne.s32.totalorder %s3761_s28, %s3757_s27 }
  0x27   : > { %p330_p11 = scmp.eq.s32.totalorder %s3878_s16, 1  ;;  %p336_p0 = scmp.eq.s32.totalorder %s3163_s1, 1 }
  0x28   : > { %s3935_s11 = scalar_select %p39_p8, %s3765_s29, %s41_s19  }
  0x29   : > { %p3939_p12 = por %p55_p1, %p54_p10  ;;  %p3943_p13 = por %p330_p11, %p48_p7 }
  0x2a   : > { %p50_p2 = por %p49_p9, %p48_p7  ;;  %s447_s22 = sand.u32 1, %s3765_s29  }
  0x2b   : > { %p3948_p4 = por %p336_p0, %p54_p10  ;;  %p3448_p6 = scmp.lt.s32.totalorder %s3769_s30, 2 }
  0x2c   : > { %s3171_s12 = sshll.u32 %s447_s22, 8  ;;  %s3314_s14 = sshll.u32 %s3769_s30, 8 }
  0x2d   : > { %s456_s18 = scalar_lea.hbm %s4500_s0, %s3314_s14  ;;  %s451_s26 = scalar_lea.vmem [#allocation3], %s3171_s12 }
  0x2e   : > { %s457_s19 = sshll.u32 %s456_s18, 4  ;;  %s459_s24 = sshll.u32 %s451_s26, 4  ;;  %s458_s19 = int_to_ptr.hbm [resolvable:$true] %s457_s19  ;;  %s460_s24 = int_to_ptr.vmem [resolvable:$true] %s459_s24 }
  0x2f   : > { %p3957_p8 = pnand %p3448_p6, %p50_p2  ;;  %s448_s25 = scalar_lea.sflag [#allocation4], %s447_s22 }
  0x30   : > { %s3661_s3 = sshra.s32 %s458_s19, 4  ;;  %s3668_s12 = scalar_lea.hbm %s4500_s0, 512  ;;  %s3662_s3 = int_to_ptr.hbm [resolvable:$true] %s3661_s3 }
  0x31   : > { %s3663_s7 = scalar_lea.hbm %s3662_s3, 256  ;;  %p3665_p9 = pneg %p3957_p8 }
  0x32   : > { %p3664_p7 = scmp.ne.s32.totalorder %s3662_s3, %s3663_s7  ;;  %p3669_p0 = scmp.lt.s32.totalorder %s3662_s3, %s4500_s0 }
  0x33   : > { %p3670_p2 = scmp.lt.s32.totalorder %s3668_s12, %s3663_s7 }
  0x34   : > { %p3666_p10 = pnand %p3665_p9, %p3664_p7 }
  0x35   : > { %p3671_p6 = por %p3670_p2, %p3669_p0 }
  0x36   : > { %p3667_p11 = pneg %p3666_p10 }
  0x38   : > { %p3672_p5 = pnand %p3671_p6, %p3667_p11 }
  0x3a   : > { %3675 = shalt.err (!%p3672_p5)
}
  0x3b   : > { %s4534_s22 = smov 8   ;;  %s4535_s26 = smov 128  }
  0x3c   : > { %3438 = dma.hbm_to_vmem [thread:$0]  (!%p3957_p8), %s458_s19, 4096, %s460_s24, %s448_s25, %s4535_s26, %s4535_s26, %s4534_s22  }
  0x3d   : > { %471 = sbr.rel (%p3883_p3) target bundleno = 1555 (0x613), region = 72  ;;  %s3977_s14 = sand.u32 (!%p3883_p3), 1, %s3761_s28  }
  0x3e   : > { %s3175_s3 = sshll.u32 (!%p3883_p3), %s3977_s14, 8  ;;  %s474_s7 = scalar_lea.sflag (!%p3883_p3), [#allocation4], %s3977_s14 }
  0x3f   : > { %s3981_s5 = scalar_lea.vmem (!%p3883_p3), [#allocation3], %s3175_s3 }
  0x42   : > { %3736 = dma.done.wait (%p3939_p12), %s474_s7, 4096  }
  0x43   : > { %3738 = vsyncadd (%p3939_p12), %s474_s7, 4294963200 }
  0x44   : > { %3740 = dma.done.wait (%p55_p1), [#allocation7], 3072  }
  0x45   : > { %3742 = vsyncadd (%p55_p1), [#allocation7], 4294964224 }
  0x46   : > { %3744 = dma.done.wait (%p55_p1), [#allocation10], 2048  }
  0x47   : > { %3746 = vsyncadd (%p55_p1), [#allocation10], 4294965248 }
  0x48   : > { %3748 = dma.done.wait (%p55_p1), [#allocation13], 1024  }
  0x49   : > { %3750 = vsyncadd (%p55_p1), [#allocation13], 4294966272  ;;  %v594_v1 = vld [vmem:[#allocation6 + $0x78] sm:$0xff]  ;;  %v593_v2 = vld [vmem:[#allocation6 + $0x70] sm:$0xff]  ;;  %s4536_s17 = sld [smem:[#allocation24_spill]]  ;;  %vm2931_vm0 = vcmask 130112  }
  0x4a   : > { %599 = vmatpush.msra.mxu0 %v594_v1  ;;  %3347 = vmatpush.msra.mxu1 %v594_v1  ;;  %v592_v3 = vld [vmem:[#allocation6 + $0x68] sm:$0xff]  ;;  %v591_v4 = vld [vmem:[#allocation6 + $0x60] sm:$0xff]  ;;  %v590_v5 = vld [vmem:[#allocation6 + $0x58] sm:$0xff]  ;;  %vm2935_vm1 = vcmask 195712   ;;  %vm2939_vm2 = vcmask 261312   ;;  %vm2943_vm3 = vcmask 326912  }
  0x4b   : > { %3348 = vmatpush.msra.mxu2 %v594_v1  ;;  %3349 = vmatpush.msra.mxu3 %v594_v1  ;;  %v589_v6 = vld [vmem:[#allocation6 + $0x50] sm:$0xff]  ;;  %v588_v7 = vld [vmem:[#allocation6 + $0x48] sm:$0xff]  ;;  %v587_v8 = vld [vmem:[#allocation6 + $0x40] sm:$0xff]  ;;  %vm2947_vm4 = vcmask 392512   ;;  %vm2951_vm5 = vcmask 458112   ;;  %vm2955_vm6 = vcmask 523712  }
  0x4c   : > { %600 = vmatpush.msra.mxu0 %v593_v2  ;;  %3350 = vmatpush.msra.mxu1 %v593_v2  ;;  %v586_v9 = vld [vmem:[#allocation6 + $0x38] sm:$0xff]  ;;  %v585_v10 = vld [vmem:[#allocation6 + $0x30] sm:$0xff]  ;;  %v584_v11 = vld [vmem:[#allocation6 + $0x28] sm:$0xff]  ;;  %vm2959_vm7 = vcmask 589312   ;;  %vm2963_vm8 = vcmask 654912   ;;  %vm2967_vm9 = vcmask 720512  }
  0x4d   : > { %3351 = vmatpush.msra.mxu2 %v593_v2  ;;  %3352 = vmatpush.msra.mxu3 %v593_v2  ;;  %v583_v12 = vld [vmem:[#allocation6 + $0x20] sm:$0xff]  ;;  %v582_v13 = vld [vmem:[#allocation6 + $0x18] sm:$0xff]  ;;  %v581_v14 = vld [vmem:[#allocation6 + $0x10] sm:$0xff]  ;;  %vm2971_vm10 = vcmask 786112   ;;  %vm2975_vm11 = vcmask 851712   ;;  %vm2979_vm12 = vcmask 917312  }
  0x4e   : > { %601 = vmatpush.msra.mxu0 %v592_v3  ;;  %3353 = vmatpush.msra.mxu1 %v592_v3  ;;  %v580_v15 = vld [vmem:[#allocation6 + $0x8] sm:$0xff]  ;;  %v579_v16 = vld [vmem:[#allocation6] sm:$0xff]  ;;  %v549_v19 = vld [vmem:[%s3981_s5 + $0x10] sm:$0xff]  ;;  %s3181_s22 = sshll.u32 %s3977_s14, 1  ;;  %s3311_s26 = sshll.u32 %s3878_s16, 1  ;;  %vm2983_vm13 = vcmask 982912  }
  0x4f   : > { %3354 = vmatpush.msra.mxu2 %v592_v3  ;;  %3355 = vmatpush.msra.mxu3 %v592_v3  ;;  %v547_v17 = vld [vmem:[%s3981_s5] sm:$0xff]  ;;  %v548_v18 = vld [vmem:[%s3981_s5 + $0x8] sm:$0xff]  ;;  %v550_v21 = vld [vmem:[%s3981_s5 + $0x18] sm:$0xff]  ;;  %vm2987_vm14 = vcmask 1048512   ;;  %s545_s16 = scalar_lea.vmem [#allocation14], %s3181_s22  ;;  %vm3021_vm15 = vcmask 1040384  }
  0x50   : > { %602 = vmatpush.msra.mxu0 %v591_v4  ;;  %3356 = vmatpush.msra.mxu1 %v591_v4  ;;  %v555_v20 = vld [vmem:[%s3981_s5 + $0x40] sm:$0xff]  ;;  %v556_v22 = vld [vmem:[%s3981_s5 + $0x48] sm:$0xff]  ;;  %v3322_v23 = vld [vmem:[#allocation8 + $0x38] sm:$0xff]  ;;  %s3042_s25 = sshll.u32 %s545_s16, 4  ;;  %s3030_s19 = scalar_lea.sflag [#allocation5], %s3977_s14  ;;  %s3043_s25 = int_to_ptr.vmem [resolvable:$true] %s3042_s25 }
  0x51   : > { %3357 = vmatpush.msra.mxu2 %v591_v4  ;;  %3358 = vmatpush.msra.mxu3 %v591_v4  ;;  %v3321_v24 = vld [vmem:[#allocation8 + $0x30] sm:$0xff]  ;;  %v551_v25 = vld [vmem:[%s3981_s5 + $0x20] sm:$0xff]  ;;  %v3320_v27 = vld [vmem:[#allocation8 + $0x28] sm:$0xff] }
  0x52   : > { %603 = vmatpush.msra.mxu0 %v590_v5  ;;  %3359 = vmatpush.msra.mxu1 %v590_v5  ;;  %v557_v26 = vld [vmem:[%s3981_s5 + $0x50] sm:$0xff]  ;;  %v3319_v28 = vld [vmem:[#allocation8 + $0x20] sm:$0xff]  ;;  %v552_v29 = vld [vmem:[%s3981_s5 + $0x28] sm:$0xff] }
  0x53   : > { %3360 = vmatpush.msra.mxu2 %v590_v5  ;;  %3361 = vmatpush.msra.mxu3 %v590_v5  ;;  %v558_v30 = vld [vmem:[%s3981_s5 + $0x58] sm:$0xff]  ;;  %v563_v32 = vld [vmem:[%s3981_s5 + $0x80] sm:$0xff]  ;;  %v3317_v33 = vld [vmem:[#allocation8 + $0x10] sm:$0xff] }
  0x54   : > { %604 = vmatpush.msra.mxu0 %v589_v6  ;;  %3362 = vmatpush.msra.mxu1 %v589_v6  ;;  %v3318_v31 = vld [vmem:[#allocation8 + $0x18] sm:$0xff]  ;;  %v553_v34 = vld [vmem:[%s3981_s5 + $0x30] sm:$0xff]  ;;  %v559_v35 = vld [vmem:[%s3981_s5 + $0x60] sm:$0xff] }
  0x55   : > { %3363 = vmatpush.msra.mxu2 %v589_v6  ;;  %3364 = vmatpush.msra.mxu3 %v589_v6  ;;  %v554_v36 = vld [vmem:[%s3981_s5 + $0x38] sm:$0xff]  ;;  %v560_v37 = vld [vmem:[%s3981_s5 + $0x68] sm:$0xff]  ;;  %v561_v38 = vld [vmem:[%s3981_s5 + $0x70] sm:$0xff] }
  0x56   : > { %605 = vmatpush.msra.mxu0 %v588_v7  ;;  %3365 = vmatpush.msra.mxu1 %v588_v7  ;;  %v562_v39 = vld [vmem:[%s3981_s5 + $0x78] sm:$0xff]  ;;  %v564_v40 = vld [vmem:[%s3981_s5 + $0x88] sm:$0xff]  ;;  %v3315_v42 = vld [vmem:[#allocation8] sm:$0xff] }
  0x57   : > { %3366 = vmatpush.msra.mxu2 %v588_v7  ;;  %3367 = vmatpush.msra.mxu3 %v588_v7  ;;  %v3316_v41 = vld [vmem:[#allocation8 + $0x8] sm:$0xff]  ;;  %v565_v43 = vld [vmem:[%s3981_s5 + $0x90] sm:$0xff]  ;;  %v566_v44 = vld [vmem:[%s3981_s5 + $0x98] sm:$0xff] }
  0x58   : > { %606 = vmatpush.msra.mxu0 %v587_v8  ;;  %3368 = vmatpush.msra.mxu1 %v587_v8  ;;  %v4022_v46 = vld [vmem:[%s4502_s2] ss:$0 sm:$0xff]  ;;  %v567_v48 = vld [vmem:[%s3981_s5 + $0xa0] sm:$0xff]  ;;  %v568_v53 = vld [vmem:[%s3981_s5 + $0xa8] sm:$0xff] }
  0x59   : > { %3369 = vmatpush.msra.mxu2 %v587_v8  ;;  %3370 = vmatpush.msra.mxu3 %v587_v8  ;;  %v569_v59 = vld [vmem:[%s3981_s5 + $0xb0] sm:$0xff]  ;;  %v570_v2 = vld [vmem:[%s3981_s5 + $0xb8] sm:$0xff] }
  0x5a   : > { %607 = vmatpush.msra.mxu0 %v586_v9  ;;  %3371 = vmatpush.msra.mxu1 %v586_v9 }
  0x5b   : > { %3372 = vmatpush.msra.mxu2 %v586_v9  ;;  %3373 = vmatpush.msra.mxu3 %v586_v9 }
  0x5c   : > { %608 = vmatpush.msra.mxu0 %v585_v10  ;;  %3374 = vmatpush.msra.mxu1 %v585_v10 }
  0x5d   : > { %3375 = vmatpush.msra.mxu2 %v585_v10  ;;  %3376 = vmatpush.msra.mxu3 %v585_v10 }
  0x5e   : > { %609 = vmatpush.msra.mxu0 %v584_v11  ;;  %3377 = vmatpush.msra.mxu1 %v584_v11 }
  0x5f   : > { %3378 = vmatpush.msra.mxu2 %v584_v11  ;;  %3379 = vmatpush.msra.mxu3 %v584_v11 }
  0x60   : > { %610 = vmatpush.msra.mxu0 %v583_v12  ;;  %3380 = vmatpush.msra.mxu1 %v583_v12 }
  0x61   : > { %3381 = vmatpush.msra.mxu2 %v583_v12  ;;  %3382 = vmatpush.msra.mxu3 %v583_v12 }
  0x62   : > { %611 = vmatpush.msra.mxu0 %v582_v13  ;;  %3383 = vmatpush.msra.mxu1 %v582_v13 }
  0x63   : > { %3384 = vmatpush.msra.mxu2 %v582_v13  ;;  %3385 = vmatpush.msra.mxu3 %v582_v13 }
  0x64   : > { %612 = vmatpush.msra.mxu0 %v581_v14  ;;  %3386 = vmatpush.msra.mxu1 %v581_v14 }
  0x65   : > { %3387 = vmatpush.msra.mxu2 %v581_v14  ;;  %3388 = vmatpush.msra.mxu3 %v581_v14 }
  0x66   : > { %613 = vmatpush.msra.mxu0 %v580_v15  ;;  %3389 = vmatpush.msra.mxu1 %v580_v15 }
  0x67   : > { %3390 = vmatpush.msra.mxu2 %v580_v15  ;;  %3391 = vmatpush.msra.mxu3 %v580_v15 }
  0x68   : > { %614 = vmatpush.msra.mxu0 %v579_v16  ;;  %3392 = vmatpush.msra.mxu1 %v579_v16 }
  0x69   : > { %615 = vmatmul.f32.vlgmr.msra.gmra.mxu0 %v547_v17  ;;  %3393 = vmatpush.msra.mxu2 %v579_v16 }
  0x6a   : > { %3394 = vmatpush.msra.mxu3 %v579_v16  ;;  %639 = vmatmul.f32.vlgmr.msra.gmra.mxu1 %v555_v20 }
  0x6b   : > { %860 = vmatpush.bf16.msrb.mxu1 %v3322_v23  ;;  %663 = vmatmul.f32.vlgmr.msra.gmra.mxu2 %v563_v32 }
  0x6f   : > { %861 = vmatpush.bf16.msrb.mxu1 %v3321_v24 }
  0x71   : > { %618 = vmatmul.f32.gmra.mxu0 %v548_v18 }
  0x72   : > { %642 = vmatmul.f32.gmra.mxu1 %v556_v22 }
  0x73   : > { %862 = vmatpush.bf16.msrb.mxu1 %v3320_v27  ;;  %666 = vmatmul.f32.gmra.mxu2 %v564_v40  ;;  %v3327_v40 = vld [vmem:[#allocation9 + $0x20] sm:$0xff] }
  0x77   : > { %863 = vmatpush.bf16.msrb.mxu1 %v3319_v28  ;;  %v3329_v28 = vld [vmem:[#allocation9 + $0x30] sm:$0xff] }
  0x79   : > { %621 = vmatmul.f32.gmra.mxu0 %v549_v19 }
  0x7a   : > { %645 = vmatmul.f32.gmra.mxu1 %v557_v26 }
  0x7b   : > { %864 = vmatpush.bf16.msrb.mxu1 %v3318_v31  ;;  %669 = vmatmul.f32.gmra.mxu2 %v565_v43  ;;  %v572_v43 = vld [vmem:[%s3981_s5 + $0xc8] sm:$0xff] }
  0x7f   : > { %865 = vmatpush.bf16.msrb.mxu1 %v3317_v33 }
  0x81   : > { %624 = vmatmul.f32.gmra.mxu0 %v550_v21 }
  0x82   : > { %648 = vmatmul.f32.gmra.mxu1 %v558_v30 }
  0x83   : > { %866 = vmatpush.bf16.msrb.mxu1 %v3316_v41  ;;  %672 = vmatmul.f32.gmra.mxu2 %v566_v44 }
  0x87   : > { %867 = vmatpush.bf16.msrb.mxu1 %v3315_v42 }
  0x89   : > { %627 = vmatmul.f32.gmra.mxu0 %v551_v25  ;;  %v3330_v25 = vld [vmem:[#allocation9 + $0x38] sm:$0xff] }
  0x8a   : > { %651 = vmatmul.f32.gmra.mxu1 %v559_v35  ;;  %1225 = vmatpush.bf16.msrb.mxu2 %v3330_v25  ;;  %v571_v35 = vld [vmem:[%s3981_s5 + $0xc0] sm:$0xff] }
  0x8b   : > { %675 = vmatmul.f32.gmra.mxu2 %v567_v48  ;;  %687 = vmatmul.f32.vlgmr.msra.gmra.mxu3 %v571_v35 }
  0x8e   : > { %1226 = vmatpush.bf16.msrb.mxu2 %v3329_v28 }
  0x91   : > { %630 = vmatmul.f32.gmra.mxu0 %v552_v29 }
  0x92   : > { %654 = vmatmul.f32.gmra.mxu1 %v560_v37 }
  0x93   : > { %678 = vmatmul.f32.gmra.mxu2 %v568_v53  ;;  %690 = vmatmul.f32.gmra.mxu3 %v572_v43 }
  0x99   : > { %633 = vmatmul.f32.gmra.mxu0 %v553_v34 }
  0x9a   : > { %657 = vmatmul.f32.gmra.mxu1 %v561_v38 }
  0x9b   : > { %681 = vmatmul.f32.gmra.mxu2 %v569_v59 }
  0xa1   : > { %636 = vmatmul.f32.gmra.mxu0 %v554_v36  ;;  %v3328_v36 = vld [vmem:[#allocation9 + $0x28] sm:$0xff] }
  0xa2   : > { %660 = vmatmul.f32.gmra.mxu1 %v562_v39  ;;  %1227 = vmatpush.bf16.msrb.mxu2 %v3328_v36 }
  0xa3   : > { %684 = vmatmul.f32.gmra.mxu2 %v570_v2  ;;  %v3324_v2 = vld [vmem:[#allocation9 + $0x8] sm:$0xff] }
  0xa6   : > { %1228 = vmatpush.bf16.msrb.mxu2 %v3327_v40 }
  0xe6   : > { %v616_v45 = vpop.f32.mrf.mxu0 }
  0xe7   : > { %v617_v47 = vadd.f32 %v4022_v46, %v616_v45  ;;  %v640_v9 = vpop.f32.mrf.mxu1 }
  0xe8   : > { %v641_v26 = vadd.f32 %v4022_v46, %v640_v9 }
  0xe9   : > { %v712_v50 = vmul.f32 0.1, %v617_v47 }
  0xea   : > { %v720_v29 = vmul.f32 0.1, %v641_v26 }
  0xeb   : > { %v744_v54 = vmax.f32 %v617_v47, %v712_v50 }
  0xec   : > { %v752_v32 = vmax.f32 %v641_v26, %v720_v29  ;;  %v574_v26 = vld [vmem:[%s3981_s5 + $0xd8] sm:$0xff] }
  0xee   : > { %v619_v49 = vpop.f32.mrf.mxu0 }
  0xef   : > { %v620_v51 = vadd.f32 %v4022_v46, %v619_v49  ;;  %v643_v15 = vpop.f32.mrf.mxu1  ;;  %v3326_v49 = vld [vmem:[#allocation9 + $0x18] sm:$0xff] }
  0xf0   : > { %v644_v27 = vadd.f32 %v4022_v46, %v643_v15  ;;  %1229 = vmatpush.bf16.msrb.mxu2 %v3326_v49  ;;  %v4051_v15 = vld [vmem:[%s4504_s4] ss:$0 sm:$0xff] }
  0xf1   : > { %v713_v52 = vmul.f32 0.1, %v620_v51 }
  0xf2   : > { %v721_v30 = vmul.f32 0.1, %v644_v27 }
  0xf3   : > { %v745_v55 = vmax.f32 %v620_v51, %v713_v52  ;;  %v3325_v52 = vld [vmem:[#allocation9 + $0x10] sm:$0xff] }
  0xf4   : > { %v753_v33 = vmax.f32 %v644_v27, %v721_v30  ;;  %1230 = vmatpush.bf16.msrb.mxu2 %v3325_v52 }
  0xf5   : > { %v776_v56 = vpack.c.bf16 %v745_v55, %v744_v54 }
  0xf6   : > { %v622_v57 = vpop.f32.mrf.mxu0  ;;  %v780_v34 = vpack.c.bf16 %v753_v33, %v752_v32 }
  0xf7   : > { %868 = vmatmul.bf16.vlgmr.msrb.gmra.mxu1 %v776_v56  ;;  %v623_v58 = vadd.f32 %v4022_v46, %v622_v57  ;;  %v646_v23 = vpop.f32.mrf.mxu1 }
  0xf8   : > { %v647_v38 = vadd.f32 %v4022_v46, %v646_v23  ;;  %1231 = vmatpush.bf16.msrb.mxu2 %v3324_v2 }
  0xf9   : > { %v714_v61 = vmul.f32 0.1, %v623_v58 }
  0xfa   : > { %v722_v41 = vmul.f32 0.1, %v647_v38 }
  0xfb   : > { %v746_v0 = vmax.f32 %v623_v58, %v714_v61  ;;  %v664_v58 = vpop.f32.mrf.mxu2 }
  0xfc   : > { %v754_v44 = vmax.f32 %v647_v38, %v722_v41  ;;  %v575_v38 = vld [vmem:[%s3981_s5 + $0xe0] sm:$0xff] }
  0xfe   : > { %v625_v60 = vpop.f32.mrf.mxu0 }
  0xff   : > { %v626_v62 = vadd.f32 %v4022_v46, %v625_v60  ;;  %v649_v31 = vpop.f32.mrf.mxu1 }
 0x100   : > { %v650_v39 = vadd.f32 %v4022_v46, %v649_v31 }
 0x101   : > { %v715_v63 = vmul.f32 0.1, %v626_v62 }
 0x102   : > { %v723_v42 = vmul.f32 0.1, %v650_v39 }
 0x103   : > { %v747_v1 = vmax.f32 %v626_v62, %v715_v63  ;;  %v667_v63 = vpop.f32.mrf.mxu2 }
 0x104   : > { %v755_v45 = vmax.f32 %v650_v39, %v723_v42  ;;  %v668_v9 = vadd.f32 %v4022_v46, %v667_v63 }
 0x105   : > { %v777_v3 = vpack.c.bf16 %v747_v1, %v746_v0 }
 0x106   : > { %v628_v4 = vpop.f32.mrf.mxu0  ;;  %v781_v48 = vpack.c.bf16 %v755_v45, %v754_v44 }
 0x107   : > { %873 = vmatmul.bf16.gmra.mxu1 %v777_v3  ;;  %v629_v5 = vadd.f32 %v4022_v46, %v628_v4  ;;  %v652_v37 = vpop.f32.mrf.mxu1 }
 0x108   : > { %v653_v50 = vadd.f32 %v4022_v46, %v652_v37 }
 0x109   : > { %v716_v7 = vmul.f32 0.1, %v629_v5 }
 0x10a   : > { %v724_v54 = vmul.f32 0.1, %v653_v50 }
 0x10b   : > { %v748_v11 = vmax.f32 %v629_v5, %v716_v7  ;;  %v3323_v5 = vld [vmem:[#allocation9] sm:$0xff]  ;;  %v670_v7 = vpop.f32.mrf.mxu2 }
 0x10c   : > { %v756_v56 = vmax.f32 %v653_v50, %v724_v54  ;;  %1232 = vmatpush.bf16.msrb.mxu2 %v3323_v5 }
 0x10e   : > { %v631_v6 = vpop.f32.mrf.mxu0 }
 0x10f   : > { %v632_v8 = vadd.f32 %v4022_v46, %v631_v6  ;;  %v655_v47 = vpop.f32.mrf.mxu1 }
 0x110   : > { %v656_v51 = vadd.f32 %v4022_v46, %v655_v47 }
 0x111   : > { %v717_v10 = vmul.f32 0.1, %v632_v8 }
 0x112   : > { %v725_v55 = vmul.f32 0.1, %v656_v51 }
 0x113   : > { %v749_v12 = vmax.f32 %v632_v8, %v717_v10  ;;  %v665_v8 = vadd.f32 %v4022_v46, %v664_v58 }
 0x114   : > { %v757_v57 = vmax.f32 %v656_v51, %v725_v55  ;;  %v576_v51 = vld [vmem:[%s3981_s5 + $0xe8] sm:$0xff] }
 0x115   : > { %v778_v13 = vpack.c.bf16 %v749_v12, %v748_v11  ;;  %v728_v10 = vmul.f32 0.1, %v665_v8  ;;  %v729_v11 = vmul.f32 0.1, %v668_v9 }
 0x116   : > { %v634_v14 = vpop.f32.mrf.mxu0  ;;  %v782_v59 = vpack.c.bf16 %v757_v57, %v756_v56 }
 0x117   : > { %878 = vmatmul.bf16.gmra.mxu1 %v778_v13  ;;  %v635_v16 = vadd.f32 %v4022_v46, %v634_v14  ;;  %v658_v53 = vpop.f32.mrf.mxu1  ;;  %v760_v12 = vmax.f32 %v665_v8, %v728_v10  ;;  %v761_v13 = vmax.f32 %v668_v9, %v729_v11  ;;  %v673_v14 = vpop.f32.mrf.mxu2 }
 0x118   : > { %v659_v61 = vadd.f32 %v4022_v46, %v658_v53 }
 0x119   : > { %v718_v18 = vmul.f32 0.1, %v635_v16 }
 0x11a   : > { %v726_v0 = vmul.f32 0.1, %v659_v61 }
 0x11b   : > { %v750_v21 = vmax.f32 %v635_v16, %v718_v18  ;;  %v784_v16 = vpack.c.bf16 %v761_v13, %v760_v12 }
 0x11c   : > { %v758_v3 = vmax.f32 %v659_v61, %v726_v0 }
 0x11e   : > { %v637_v17 = vpop.f32.mrf.mxu0 }
 0x11f   : > { %v638_v19 = vadd.f32 %v4022_v46, %v637_v17  ;;  %v661_v60 = vpop.f32.mrf.mxu1  ;;  %v573_v17 = vld [vmem:[%s3981_s5 + $0xd0] sm:$0xff] }
 0x120   : > { %v662_v62 = vadd.f32 %v4022_v46, %v661_v60  ;;  %693 = vmatmul.f32.gmra.mxu3 %v573_v17 }
 0x121   : > { %v719_v20 = vmul.f32 0.1, %v638_v19 }
 0x122   : > { %v727_v1 = vmul.f32 0.1, %v662_v62 }
 0x123   : > { %v751_v22 = vmax.f32 %v638_v19, %v719_v20  ;;  %v671_v20 = vadd.f32 %v4022_v46, %v670_v7 }
 0x124   : > { %v759_v4 = vmax.f32 %v662_v62, %v727_v1 }
 0x125   : > { %v779_v24 = vpack.c.bf16 %v751_v22, %v750_v21  ;;  %v674_v21 = vadd.f32 %v4022_v46, %v673_v14  ;;  %v676_v22 = vpop.f32.mrf.mxu2 }
 0x126   : > { %v783_v6 = vpack.c.bf16 %v759_v4, %v758_v3  ;;  %v677_v44 = vadd.f32 %v4022_v46, %v676_v22 }
 0x127   : > { %883 = vmatmul.bf16.gmra.mxu1 %v779_v24  ;;  %v730_v24 = vmul.f32 0.1, %v671_v20  ;;  %v731_v25 = vmul.f32 0.1, %v674_v21 }
 0x128   : > { %696 = vmatmul.f32.gmra.mxu3 %v574_v26  ;;  %v732_v49 = vmul.f32 0.1, %v677_v44 }
 0x129   : > { %v762_v30 = vmax.f32 %v671_v20, %v730_v24  ;;  %v763_v32 = vmax.f32 %v674_v21, %v731_v25 }
 0x12a   : > { %v764_v56 = vmax.f32 %v677_v44, %v732_v49 }
 0x12b   : > { %v785_v37 = vpack.c.bf16 %v763_v32, %v762_v30 }
 0x12d   : > { %v679_v35 = vpop.f32.mrf.mxu2 }
 0x12e   : > { %v680_v45 = vadd.f32 %v4022_v46, %v679_v35 }
 0x130   : > { %699 = vmatmul.f32.gmra.mxu3 %v575_v38  ;;  %v733_v50 = vmul.f32 0.1, %v680_v45 }
 0x132   : > { %v765_v57 = vmax.f32 %v680_v45, %v733_v50 }
 0x134   : > { %v786_v61 = vpack.c.bf16 %v765_v57, %v764_v56 }
 0x137   : > { %888 = vmatmul.bf16.gmra.mxu1 %v780_v34 }
 0x138   : > { %702 = vmatmul.f32.gmra.mxu3 %v576_v51  ;;  %v3338_v51 = vld [vmem:[#allocation11 + $0x38] sm:$0xff] }
 0x139   : > { %1590 = vmatpush.bf16.msrb.mxu3 %v3338_v51  ;;  %v3331_v51 = vld [vmem:[#allocation11] sm:$0xff] }
 0x147   : > { %893 = vmatmul.bf16.gmra.mxu1 %v781_v48  ;;  %v682_v48 = vpop.f32.mrf.mxu2 }
 0x148   : > { %v683_v4 = vadd.f32 %v4022_v46, %v682_v48 }
 0x14a   : > { %v734_v7 = vmul.f32 0.1, %v683_v4 }
 0x14c   : > { %v766_v13 = vmax.f32 %v683_v4, %v734_v7 }
 0x14f   : > { %v685_v63 = vpop.f32.mrf.mxu2 }
 0x150   : > { %v686_v5 = vadd.f32 %v4022_v46, %v685_v63 }
 0x152   : > { %v735_v8 = vmul.f32 0.1, %v686_v5 }
 0x154   : > { %v767_v14 = vmax.f32 %v686_v5, %v735_v8 }
 0x157   : > { %898 = vmatmul.bf16.gmra.mxu1 %v782_v59 }
 0x167   : > { %903 = vmatmul.bf16.gmra.mxu1 %v783_v6 }
 0x174   : > { %v869_v18 = vpop.f32.mrf.mxu1 }
 0x175   : > { %v870_v19 = vadd.f32 %v4051_v15, %v869_v18 }
 0x177   : > { %908 = vmatmul.bf16.gmra.mxu1 %v784_v16  ;;  %v949_v23 = vpack.c.bf16 %v870_v19, %v870_v19  ;;  %v787_v19 = vpack.c.bf16 %v767_v14, %v766_v13 }
 0x179   : > { %v981_v28 = vunpack.c.l.bf16 %v949_v23 }
 0x17b   : > { %v1013_v33 = vmul.f32 0.100097656, %v981_v28 }
 0x17c   : > { %v871_v27 = vpop.f32.mrf.mxu1 }
 0x17d   : > { %v872_v29 = vadd.f32 %v4051_v15, %v871_v27  ;;  %v1109_v40 = vmax.f32 %v981_v28, %v1013_v33 }
 0x17f   : > { %v950_v31 = vpack.c.bf16 %v872_v29, %v872_v29 }
 0x181   : > { %v982_v34 = vunpack.c.l.bf16 %v950_v31 }
 0x183   : > { %v1014_v36 = vmul.f32 0.100097656, %v982_v34 }
 0x184   : > { %v874_v39 = vpop.f32.mrf.mxu1 }
 0x185   : > { %v1110_v41 = vmax.f32 %v982_v34, %v1014_v36  ;;  %v875_v42 = vadd.f32 %v4051_v15, %v874_v39  ;;  %v688_v39 = vpop.f32.mrf.mxu3 }
 0x186   : > { %v689_v45 = vadd.f32 %v4022_v46, %v688_v39 }
 0x187   : > { %913 = vmatmul.bf16.gmra.mxu1 %v785_v37  ;;  %v1141_v43 = vpack.c.bf16 %v1110_v41, %v1109_v40  ;;  %v951_v47 = vpack.c.bf16 %v875_v42, %v875_v42 }
 0x188   : > { %v736_v50 = vmul.f32 0.1, %v689_v45 }
 0x189   : > { %1233 = vmatmul.bf16.vlgmr.msrb.gmra.mxu2 %v1141_v43  ;;  %v983_v53 = vunpack.c.l.bf16 %v951_v47  ;;  %v577_v43 = vld [vmem:[%s3981_s5 + $0xf0] sm:$0xff] }
 0x18a   : > { %705 = vmatmul.f32.gmra.mxu3 %v577_v43 }
 0x18b   : > { %v1015_v58 = vmul.f32 0.100097656, %v983_v53 }
 0x18c   : > { %v876_v52 = vpop.f32.mrf.mxu1 }
 0x18d   : > { %v877_v54 = vadd.f32 %v4051_v15, %v876_v52  ;;  %v1111_v1 = vmax.f32 %v983_v53, %v1015_v58  ;;  %v691_v52 = vpop.f32.mrf.mxu3 }
 0x18f   : > { %v952_v55 = vpack.c.bf16 %v877_v54, %v877_v54  ;;  %v692_v54 = vadd.f32 %v4022_v46, %v691_v52 }
 0x191   : > { %v984_v59 = vunpack.c.l.bf16 %v952_v55  ;;  %v737_v58 = vmul.f32 0.1, %v692_v54 }
 0x193   : > { %v1016_v60 = vmul.f32 0.100097656, %v984_v59 }
 0x194   : > { %v879_v62 = vpop.f32.mrf.mxu1 }
 0x195   : > { %v880_v0 = vadd.f32 %v4051_v15, %v879_v62  ;;  %v1112_v2 = vmax.f32 %v984_v59, %v1016_v60  ;;  %v578_v59 = vld [vmem:[%s3981_s5 + $0xf8] sm:$0xff]  ;;  %v769_v62 = vmax.f32 %v692_v54, %v737_v58  ;;  %s4537_s5 = sld [smem:[#allocation25_spill]] }
 0x196   : > { %708 = vmatmul.f32.gmra.mxu3 %v578_v59 }
 0x197   : > { %v1142_v3 = vpack.c.bf16 %v1112_v2, %v1111_v1  ;;  %918 = vmatmul.bf16.gmra.mxu1 %v786_v61  ;;  %v953_v6 = vpack.c.bf16 %v880_v0, %v880_v0  ;;  %v768_v61 = vmax.f32 %v689_v45, %v736_v50  ;;  %v3337_v0 = vld [vmem:[#allocation11 + $0x30] sm:$0xff] }
 0x198   : > { %1591 = vmatpush.bf16.msrb.mxu3 %v3337_v0 }
 0x199   : > { %1238 = vmatmul.bf16.gmra.mxu2 %v1142_v3  ;;  %v985_v10 = vunpack.c.l.bf16 %v953_v6  ;;  %v788_v1 = vpack.c.bf16 %v769_v62, %v768_v61 }
 0x19b   : > { %v1017_v16 = vmul.f32 0.100097656, %v985_v10  ;;  %s3040_s24 = scalar_lea.hbm %s4537_s5, %s3311_s26  ;;  %s3711_s22 = scalar_lea.hbm %s4537_s5, 4 }
 0x19c   : > { %v881_v9 = vpop.f32.mrf.mxu1  ;;  %s3044_s20 = sshll.u32 %s3040_s24, 4  ;;  %s3045_s20 = int_to_ptr.hbm [resolvable:$true] %s3044_s20 }
 0x19d   : > { %v882_v11 = vadd.f32 %v4051_v15, %v881_v9  ;;  %v1113_v22 = vmax.f32 %v985_v10, %v1017_v16  ;;  %v3336_v9 = vld [vmem:[#allocation11 + $0x28] sm:$0xff]  ;;  %s3705_s1 = sshra.s32 %s3045_s20, 4  ;;  %s3706_s1 = int_to_ptr.hbm [resolvable:$true] %s3705_s1 }
 0x19e   : > { %1592 = vmatpush.bf16.msrb.mxu3 %v3336_v9  ;;  %s3707_s12 = scalar_lea.hbm %s3706_s1, 2  ;;  %p3712_p12 = scmp.lt.s32.totalorder %s3706_s1, %s4537_s5 }
 0x19f   : > { %v954_v12 = vpack.c.bf16 %v882_v11, %v882_v11  ;;  %p3708_p1 = scmp.ne.s32.totalorder %s3706_s1, %s3707_s12  ;;  %p3713_p8 = scmp.lt.s32.totalorder %s3711_s22, %s3707_s12 }
 0x1a1   : > { %v986_v17 = vunpack.c.l.bf16 %v954_v12  ;;  %p3709_p3 = pnand %p3708_p1, %p3943_p13  ;;  %p3714_p7 = por %p3713_p8, %p3712_p12 }
 0x1a3   : > { %v1018_v18 = vmul.f32 0.100097656, %v986_v17  ;;  %p3710_p5 = pneg %p3709_p3 }
 0x1a4   : > { %v884_v20 = vpop.f32.mrf.mxu1 }
 0x1a5   : > { %v885_v21 = vadd.f32 %v4051_v15, %v884_v20  ;;  %v1114_v23 = vmax.f32 %v986_v17, %v1018_v18  ;;  %v3335_v20 = vld [vmem:[#allocation11 + $0x20] sm:$0xff]  ;;  %p3715_p9 = pnand %p3714_p7, %p3710_p5 }
 0x1a6   : > { %1593 = vmatpush.bf16.msrb.mxu3 %v3335_v20 }
 0x1a7   : > { %v1143_v24 = vpack.c.bf16 %v1114_v23, %v1113_v22  ;;  %923 = vmatmul.bf16.gmra.mxu1 %v787_v19  ;;  %v955_v25 = vpack.c.bf16 %v885_v21, %v885_v21 }
 0x1a9   : > { %1243 = vmatmul.bf16.gmra.mxu2 %v1143_v24  ;;  %v987_v27 = vunpack.c.l.bf16 %v955_v25 }
 0x1ab   : > { %v1019_v30 = vmul.f32 0.100097656, %v987_v27 }
 0x1ac   : > { %v886_v26 = vpop.f32.mrf.mxu1 }
 0x1ad   : > { %v887_v28 = vadd.f32 %v4051_v15, %v886_v26  ;;  %v1115_v35 = vmax.f32 %v987_v27, %v1019_v30 }
 0x1af   : > { %v956_v29 = vpack.c.bf16 %v887_v28, %v887_v28 }
 0x1b1   : > { %v988_v31 = vunpack.c.l.bf16 %v956_v29  ;;  %v3334_v29 = vld [vmem:[#allocation11 + $0x18] sm:$0xff] }
 0x1b2   : > { %1594 = vmatpush.bf16.msrb.mxu3 %v3334_v29 }
 0x1b3   : > { %v1020_v32 = vmul.f32 0.100097656, %v988_v31 }
 0x1b4   : > { %v889_v33 = vpop.f32.mrf.mxu1 }
 0x1b5   : > { %v890_v34 = vadd.f32 %v4051_v15, %v889_v33  ;;  %v1116_v36 = vmax.f32 %v988_v31, %v1020_v32 }
 0x1b7   : > { %v1144_v37 = vpack.c.bf16 %v1116_v36, %v1115_v35  ;;  %v957_v38 = vpack.c.bf16 %v890_v34, %v890_v34  ;;  %928 = vmatmul.bf16.gmra.mxu1 %v788_v1  ;;  %v3333_v35 = vld [vmem:[#allocation11 + $0x10] sm:$0xff] }
 0x1b8   : > { %1595 = vmatpush.bf16.msrb.mxu3 %v3333_v35 }
 0x1b9   : > { %1248 = vmatmul.bf16.gmra.mxu2 %v1144_v37  ;;  %v989_v41 = vunpack.c.l.bf16 %v957_v38 }
 0x1bb   : > { %v1021_v47 = vmul.f32 0.100097656, %v989_v41 }
 0x1bc   : > { %v891_v40 = vpop.f32.mrf.mxu1 }
 0x1bd   : > { %v892_v42 = vadd.f32 %v4051_v15, %v891_v40  ;;  %v1117_v56 = vmax.f32 %v989_v41, %v1021_v47 }
 0x1bf   : > { %v958_v44 = vpack.c.bf16 %v892_v42, %v892_v42 }
 0x1c1   : > { %v990_v48 = vunpack.c.l.bf16 %v958_v44  ;;  %v3332_v44 = vld [vmem:[#allocation11 + $0x8] sm:$0xff] }
 0x1c2   : > { %1596 = vmatpush.bf16.msrb.mxu3 %v3332_v44 }
 0x1c3   : > { %v1022_v49 = vmul.f32 0.100097656, %v990_v48 }
 0x1c4   : > { %v894_v53 = vpop.f32.mrf.mxu1 }
 0x1c5   : > { %v895_v55 = vadd.f32 %v4051_v15, %v894_v53  ;;  %v1118_v57 = vmax.f32 %v990_v48, %v1022_v49  ;;  %v694_v48 = vpop.f32.mrf.mxu3 }
 0x1c6   : > { %v695_v53 = vadd.f32 %v4022_v46, %v694_v48  ;;  %1597 = vmatpush.bf16.msrb.mxu3 %v3331_v51 }
 0x1c7   : > { %v1145_v60 = vpack.c.bf16 %v1118_v57, %v1117_v56  ;;  %v959_v63 = vpack.c.bf16 %v895_v55, %v895_v55 }
 0x1c8   : > { %v738_v56 = vmul.f32 0.1, %v695_v53 }
 0x1c9   : > { %1253 = vmatmul.bf16.gmra.mxu2 %v1145_v60  ;;  %v991_v3 = vunpack.c.l.bf16 %v959_v63 }
 0x1ca   : > { %v770_v60 = vmax.f32 %v695_v53, %v738_v56 }
 0x1cb   : > { %v1023_v6 = vmul.f32 0.100097656, %v991_v3 }
 0x1cc   : > { %v896_v2 = vpop.f32.mrf.mxu1 }
 0x1cd   : > { %v897_v4 = vadd.f32 %v4051_v15, %v896_v2  ;;  %v1119_v12 = vmax.f32 %v991_v3, %v1023_v6  ;;  %v697_v57 = vpop.f32.mrf.mxu3 }
 0x1ce   : > { %v698_v58 = vadd.f32 %v4022_v46, %v697_v57 }
 0x1cf   : > { %v960_v5 = vpack.c.bf16 %v897_v4, %v897_v4 }
 0x1d0   : > { %v739_v61 = vmul.f32 0.1, %v698_v58 }
 0x1d1   : > { %v992_v7 = vunpack.c.l.bf16 %v960_v5 }
 0x1d2   : > { %v771_v1 = vmax.f32 %v698_v58, %v739_v61 }
 0x1d3   : > { %v1024_v8 = vmul.f32 0.100097656, %v992_v7 }
 0x1d4   : > { %v899_v10 = vpop.f32.mrf.mxu1  ;;  %v789_v4 = vpack.c.bf16 %v771_v1, %v770_v60 }
 0x1d5   : > { %v900_v11 = vadd.f32 %v4051_v15, %v899_v10  ;;  %v1120_v13 = vmax.f32 %v992_v7, %v1024_v8  ;;  %v700_v7 = vpop.f32.mrf.mxu3  ;;  %v4091_v8 = vld [vmem:[%s4506_s6] ss:$0 sm:$0xff] }
 0x1d6   : > { %933 = vmatmul.bf16.gmra.mxu1 %v789_v4  ;;  %v701_v10 = vadd.f32 %v4022_v46, %v700_v7 }
 0x1d7   : > { %v1146_v14 = vpack.c.bf16 %v1120_v13, %v1119_v12  ;;  %v961_v16 = vpack.c.bf16 %v900_v11, %v900_v11 }
 0x1d9   : > { %1258 = vmatmul.bf16.gmra.mxu2 %v1146_v14  ;;  %v993_v18 = vunpack.c.l.bf16 %v961_v16  ;;  %v740_v16 = vmul.f32 0.1, %v701_v10 }
 0x1db   : > { %v1025_v22 = vmul.f32 0.100097656, %v993_v18 }
 0x1dc   : > { %v901_v17 = vpop.f32.mrf.mxu1 }
 0x1dd   : > { %v902_v19 = vadd.f32 %v4051_v15, %v901_v17  ;;  %v1121_v27 = vmax.f32 %v993_v18, %v1025_v22 }
 0x1df   : > { %v962_v21 = vpack.c.bf16 %v902_v19, %v902_v19  ;;  %v703_v19 = vpop.f32.mrf.mxu3 }
 0x1e0   : > { %v704_v20 = vadd.f32 %v4022_v46, %v703_v19 }
 0x1e1   : > { %v994_v23 = vunpack.c.l.bf16 %v962_v21 }
 0x1e3   : > { %v1026_v24 = vmul.f32 0.100097656, %v994_v23 }
 0x1e4   : > { %v904_v25 = vpop.f32.mrf.mxu1 }
 0x1e5   : > { %v905_v26 = vadd.f32 %v4051_v15, %v904_v25  ;;  %v1122_v28 = vmax.f32 %v994_v23, %v1026_v24  ;;  %v772_v23 = vmax.f32 %v701_v10, %v740_v16  ;;  %v741_v24 = vmul.f32 0.1, %v704_v20 }
 0x1e7   : > { %v1147_v30 = vpack.c.bf16 %v1122_v28, %v1121_v27  ;;  %v963_v31 = vpack.c.bf16 %v905_v26, %v905_v26  ;;  %v773_v29 = vmax.f32 %v704_v20, %v741_v24 }
 0x1e9   : > { %1263 = vmatmul.bf16.gmra.mxu2 %v1147_v30  ;;  %v995_v33 = vunpack.c.l.bf16 %v963_v31 }
 0x1eb   : > { %v1027_v37 = vmul.f32 0.100097656, %v995_v33 }
 0x1ec   : > { %v906_v32 = vpop.f32.mrf.mxu1 }
 0x1ed   : > { %v907_v34 = vadd.f32 %v4051_v15, %v906_v32  ;;  %v1123_v42 = vmax.f32 %v995_v33, %v1027_v37 }
 0x1ef   : > { %v964_v36 = vpack.c.bf16 %v907_v34, %v907_v34  ;;  %v790_v34 = vpack.c.bf16 %v773_v29, %v772_v23 }
 0x1f1   : > { %v996_v38 = vunpack.c.l.bf16 %v964_v36  ;;  %938 = vmatmul.bf16.gmra.mxu1 %v790_v34 }
 0x1f3   : > { %v1028_v39 = vmul.f32 0.100097656, %v996_v38 }
 0x1f4   : > { %v909_v40 = vpop.f32.mrf.mxu1 }
 0x1f5   : > { %v910_v41 = vadd.f32 %v4051_v15, %v909_v40  ;;  %v1124_v43 = vmax.f32 %v996_v38, %v1028_v39 }
 0x1f7   : > { %v965_v45 = vpack.c.bf16 %v910_v41, %v910_v41  ;;  %v1148_v47 = vpack.c.bf16 %v1124_v43, %v1123_v42 }
 0x1f9   : > { %1268 = vmatmul.bf16.gmra.mxu2 %v1148_v47  ;;  %v997_v49 = vunpack.c.l.bf16 %v965_v45 }
 0x1fb   : > { %v1029_v54 = vmul.f32 0.100097656, %v997_v49 }
 0x1fc   : > { %v911_v50 = vpop.f32.mrf.mxu1 }
 0x1fd   : > { %v912_v52 = vadd.f32 %v4051_v15, %v911_v50  ;;  %v1125_v62 = vmax.f32 %v997_v49, %v1029_v54 }
 0x1ff   : > { %v966_v55 = vpack.c.bf16 %v912_v52, %v912_v52 }
 0x201   : > { %v998_v59 = vunpack.c.l.bf16 %v966_v55 }
 0x203   : > { %v1030_v63 = vmul.f32 0.100097656, %v998_v59 }
 0x204   : > { %v914_v0 = vpop.f32.mrf.mxu1 }
 0x205   : > { %v1126_v2 = vmax.f32 %v998_v59, %v1030_v63  ;;  %v915_v3 = vadd.f32 %v4051_v15, %v914_v0 }
 0x207   : > { %v967_v5 = vpack.c.bf16 %v915_v3, %v915_v3  ;;  %v1149_v6 = vpack.c.bf16 %v1126_v2, %v1125_v62 }
 0x209   : > { %1273 = vmatmul.bf16.gmra.mxu2 %v1149_v6  ;;  %v999_v9 = vunpack.c.l.bf16 %v967_v5 }
 0x20b   : > { %v1031_v17 = vmul.f32 0.100097656, %v999_v9 }
 0x20c   : > { %v916_v11 = vpop.f32.mrf.mxu1  ;;  %v1234_v12 = vpop.f32.mrf.mxu2 }
 0x20d   : > { %v917_v13 = vadd.f32 %v4051_v15, %v916_v11  ;;  %v1235_v14 = vadd.f32 %v4091_v8, %v1234_v12  ;;  %v1127_v25 = vmax.f32 %v999_v9, %v1031_v17 }
 0x20f   : > { %v968_v18 = vpack.c.bf16 %v917_v13, %v917_v13  ;;  %v1314_v22 = vpack.c.bf16 %v1235_v14, %v1235_v14 }
 0x211   : > { %v1000_v21 = vunpack.c.l.bf16 %v968_v18  ;;  %v1346_v31 = vunpack.c.l.bf16 %v1314_v22 }
 0x213   : > { %v1032_v26 = vmul.f32 0.100097656, %v1000_v21  ;;  %v1378_v38 = vmul.f32 0.100097656, %v1346_v31 }
 0x214   : > { %v1236_v27 = vpop.f32.mrf.mxu2  ;;  %v919_v28 = vpop.f32.mrf.mxu1 }
 0x215   : > { %v1128_v30 = vmax.f32 %v1000_v21, %v1032_v26  ;;  %v1237_v32 = vadd.f32 %v4091_v8, %v1236_v27  ;;  %v920_v33 = vadd.f32 %v4051_v15, %v919_v28  ;;  %v1474_v44 = vmax.f32 %v1346_v31, %v1378_v38 }
 0x217   : > { %v1315_v35 = vpack.c.bf16 %v1237_v32, %v1237_v32  ;;  %v1150_v36 = vpack.c.bf16 %v1128_v30, %v1127_v25  ;;  %v969_v37 = vpack.c.bf16 %v920_v33, %v920_v33 }
 0x219   : > { %v1347_v39 = vunpack.c.l.bf16 %v1315_v35  ;;  %1278 = vmatmul.bf16.gmra.mxu2 %v1150_v36  ;;  %v1001_v41 = vunpack.c.l.bf16 %v969_v37  ;;  %v706_v35 = vpop.f32.mrf.mxu3 }
 0x21a   : > { %v707_v38 = vadd.f32 %v4022_v46, %v706_v35 }
 0x21b   : > { %v1379_v40 = vmul.f32 0.100097656, %v1347_v39  ;;  %v1033_v49 = vmul.f32 0.100097656, %v1001_v41 }
 0x21c   : > { %v1239_v42 = vpop.f32.mrf.mxu2  ;;  %v921_v43 = vpop.f32.mrf.mxu1 }
 0x21d   : > { %v1475_v45 = vmax.f32 %v1347_v39, %v1379_v40  ;;  %v1240_v47 = vadd.f32 %v4091_v8, %v1239_v42  ;;  %v922_v48 = vadd.f32 %v4051_v15, %v921_v43  ;;  %v1129_v54 = vmax.f32 %v1001_v41, %v1033_v49 }
 0x21e   : > { %v742_v42 = vmul.f32 0.1, %v707_v38 }
 0x21f   : > { %v1506_v50 = vpack.c.bf16 %v1475_v45, %v1474_v44  ;;  %v970_v51 = vpack.c.bf16 %v922_v48, %v922_v48  ;;  %v1316_v52 = vpack.c.bf16 %v1240_v47, %v1240_v47 }
 0x221   : > { %1598 = vmatmul.bf16.vlgmr.msrb.gmra.mxu3 %v1506_v50  ;;  %v1002_v53 = vunpack.c.l.bf16 %v970_v51  ;;  %v1348_v58 = vunpack.c.l.bf16 %v1316_v52  ;;  %v709_v44 = vpop.f32.mrf.mxu3  ;;  %v774_v52 = vmax.f32 %v707_v38, %v742_v42 }
 0x222   : > { %v710_v48 = vadd.f32 %v4022_v46, %v709_v44 }
 0x223   : > { %v1034_v55 = vmul.f32 0.100097656, %v1002_v53  ;;  %v1380_v1 = vmul.f32 0.100097656, %v1348_v58 }
 0x224   : > { %v1241_v56 = vpop.f32.mrf.mxu2  ;;  %v924_v57 = vpop.f32.mrf.mxu1 }
 0x225   : > { %v1242_v59 = vadd.f32 %v4091_v8, %v1241_v56  ;;  %v1130_v60 = vmax.f32 %v1002_v53, %v1034_v55  ;;  %v925_v61 = vadd.f32 %v4051_v15, %v924_v57  ;;  %v1476_v9 = vmax.f32 %v1348_v58, %v1380_v1 }
 0x226   : > { %v743_v55 = vmul.f32 0.1, %v710_v48 }
 0x227   : > { %v1317_v62 = vpack.c.bf16 %v1242_v59, %v1242_v59  ;;  %v971_v63 = vpack.c.bf16 %v925_v61, %v925_v61  ;;  %v1151_v0 = vpack.c.bf16 %v1130_v60, %v1129_v54 }
 0x228   : > { %v775_v58 = vmax.f32 %v710_v48, %v743_v55 }
 0x229   : > { %v1349_v2 = vunpack.c.l.bf16 %v1317_v62  ;;  %1283 = vmatmul.bf16.gmra.mxu2 %v1151_v0  ;;  %v1003_v4 = vunpack.c.l.bf16 %v971_v63 }
 0x22a   : > { %v791_v61 = vpack.c.bf16 %v775_v58, %v774_v52 }
 0x22b   : > { %v1381_v3 = vmul.f32 0.100097656, %v1349_v2  ;;  %v1035_v12 = vmul.f32 0.100097656, %v1003_v4 }
 0x22c   : > { %v1244_v5 = vpop.f32.mrf.mxu2  ;;  %v926_v6 = vpop.f32.mrf.mxu1  ;;  %943 = vmatmul.bf16.gmra.mxu1 %v791_v61 }
 0x22d   : > { %v1245_v7 = vadd.f32 %v4091_v8, %v1244_v5  ;;  %v1477_v10 = vmax.f32 %v1349_v2, %v1381_v3  ;;  %v927_v11 = vadd.f32 %v4051_v15, %v926_v6  ;;  %v1131_v18 = vmax.f32 %v1003_v4, %v1035_v12 }
 0x22f   : > { %v1507_v13 = vpack.c.bf16 %v1477_v10, %v1476_v9  ;;  %v972_v14 = vpack.c.bf16 %v927_v11, %v927_v11  ;;  %v1318_v16 = vpack.c.bf16 %v1245_v7, %v1245_v7 }
 0x231   : > { %1603 = vmatmul.bf16.gmra.mxu3 %v1507_v13  ;;  %v1004_v17 = vunpack.c.l.bf16 %v972_v14  ;;  %v1350_v21 = vunpack.c.l.bf16 %v1318_v16  ;;  %v3346_v13 = vld [vmem:[#allocation12 + $0x38] sm:$0xff] }
 0x232   : > { %1955 = vmatpush.bf16.msrb.mxu0 %v3346_v13 }
 0x233   : > { %v1036_v19 = vmul.f32 0.100097656, %v1004_v17  ;;  %v1382_v26 = vmul.f32 0.100097656, %v1350_v21 }
 0x234   : > { %v1246_v20 = vpop.f32.mrf.mxu2  ;;  %v929_v45 = vpop.f32.mrf.mxu1 }
 0x235   : > { %v1247_v22 = vadd.f32 %v4091_v8, %v1246_v20  ;;  %v1132_v23 = vmax.f32 %v1004_v17, %v1036_v19  ;;  %v1478_v31 = vmax.f32 %v1350_v21, %v1382_v26  ;;  %v930_v49 = vadd.f32 %v4051_v15, %v929_v45 }
 0x237   : > { %v1319_v24 = vpack.c.bf16 %v1247_v22, %v1247_v22  ;;  %v1152_v25 = vpack.c.bf16 %v1132_v23, %v1131_v18  ;;  %v973_v56 = vpack.c.bf16 %v930_v49, %v930_v49  ;;  %v3345_v22 = vld [vmem:[#allocation12 + $0x30] sm:$0xff] }
 0x238   : > { %1956 = vmatpush.bf16.msrb.mxu0 %v3345_v22 }
 0x239   : > { %v1351_v27 = vunpack.c.l.bf16 %v1319_v24  ;;  %1288 = vmatmul.bf16.gmra.mxu2 %v1152_v25  ;;  %v1005_v60 = vunpack.c.l.bf16 %v973_v56  ;;  %v3341_v56 = vld [vmem:[#allocation12 + $0x10] sm:$0xff] }
 0x23b   : > { %v1383_v28 = vmul.f32 0.100097656, %v1351_v27  ;;  %v1037_v2 = vmul.f32 0.100097656, %v1005_v60 }
 0x23c   : > { %v1249_v29 = vpop.f32.mrf.mxu2  ;;  %v931_v62 = vpop.f32.mrf.mxu1 }
 0x23d   : > { %v1250_v30 = vadd.f32 %v4091_v8, %v1249_v29  ;;  %v1479_v32 = vmax.f32 %v1351_v27, %v1383_v28  ;;  %v932_v63 = vadd.f32 %v4051_v15, %v931_v62  ;;  %v1133_v9 = vmax.f32 %v1005_v60, %v1037_v2  ;;  %v3340_v2 = vld [vmem:[#allocation12 + $0x8] sm:$0xff] }
 0x23f   : > { %v1508_v33 = vpack.c.bf16 %v1479_v32, %v1478_v31  ;;  %v1320_v34 = vpack.c.bf16 %v1250_v30, %v1250_v30  ;;  %v974_v3 = vpack.c.bf16 %v932_v63, %v932_v63  ;;  %v3344_v30 = vld [vmem:[#allocation12 + $0x28] sm:$0xff] }
 0x240   : > { %1957 = vmatpush.bf16.msrb.mxu0 %v3344_v30 }
 0x241   : > { %1608 = vmatmul.bf16.gmra.mxu3 %v1508_v33  ;;  %v1352_v36 = vunpack.c.l.bf16 %v1320_v34  ;;  %v1006_v5 = vunpack.c.l.bf16 %v974_v3 }
 0x243   : > { %v1384_v41 = vmul.f32 0.100097656, %v1352_v36  ;;  %v1038_v10 = vmul.f32 0.100097656, %v1006_v5 }
 0x244   : > { %v1251_v37 = vpop.f32.mrf.mxu2 }
 0x245   : > { %v1252_v39 = vadd.f32 %v4091_v8, %v1251_v37  ;;  %v1480_v51 = vmax.f32 %v1352_v36, %v1384_v41  ;;  %v1134_v12 = vmax.f32 %v1006_v5, %v1038_v10 }
 0x247   : > { %v1321_v40 = vpack.c.bf16 %v1252_v39, %v1252_v39  ;;  %v1153_v19 = vpack.c.bf16 %v1134_v12, %v1133_v9 }
 0x249   : > { %v1353_v43 = vunpack.c.l.bf16 %v1321_v40  ;;  %1293 = vmatmul.bf16.gmra.mxu2 %v1153_v19  ;;  %v3343_v40 = vld [vmem:[#allocation12 + $0x20] sm:$0xff] }
 0x24a   : > { %1958 = vmatpush.bf16.msrb.mxu0 %v3343_v40 }
 0x24b   : > { %v1385_v47 = vmul.f32 0.100097656, %v1353_v43 }
 0x24c   : > { %v1254_v50 = vpop.f32.mrf.mxu2 }
 0x24d   : > { %v1255_v53 = vadd.f32 %v4091_v8, %v1254_v50  ;;  %v1481_v54 = vmax.f32 %v1353_v43, %v1385_v47  ;;  %v3342_v50 = vld [vmem:[#allocation12 + $0x18] sm:$0xff] }
 0x24e   : > { %1959 = vmatpush.bf16.msrb.mxu0 %v3342_v50 }
 0x24f   : > { %v1509_v57 = vpack.c.bf16 %v1481_v54, %v1480_v51  ;;  %v1322_v59 = vpack.c.bf16 %v1255_v53, %v1255_v53 }
 0x251   : > { %1613 = vmatmul.bf16.gmra.mxu3 %v1509_v57  ;;  %v1354_v0 = vunpack.c.l.bf16 %v1322_v59 }
 0x252   : > { %1960 = vmatpush.bf16.msrb.mxu0 %v3341_v56 }
 0x253   : > { %v1386_v6 = vmul.f32 0.100097656, %v1354_v0  ;;  %v934_v57 = vpop.f32.mrf.mxu1 }
 0x254   : > { %v1256_v46 = vpop.f32.mrf.mxu2 }
 0x255   : > { %v1257_v1 = vadd.f32 %v4091_v8, %v1256_v46  ;;  %v1482_v17 = vmax.f32 %v1354_v0, %v1386_v6 }
 0x256   : > { %1961 = vmatpush.bf16.msrb.mxu0 %v3340_v2 }
 0x257   : > { %v1323_v4 = vpack.c.bf16 %v1257_v1, %v1257_v1  ;;  %v935_v1 = vadd.f32 %v4051_v15, %v934_v57 }
 0x259   : > { %v1355_v7 = vunpack.c.l.bf16 %v1323_v4 }
 0x25b   : > { %v1387_v11 = vmul.f32 0.100097656, %v1355_v7  ;;  %v936_v3 = vpop.f32.mrf.mxu1 }
 0x25c   : > { %v1259_v14 = vpop.f32.mrf.mxu2  ;;  %v937_v4 = vadd.f32 %v4051_v15, %v936_v3 }
 0x25d   : > { %v1260_v16 = vadd.f32 %v4091_v8, %v1259_v14  ;;  %v1483_v18 = vmax.f32 %v1355_v7, %v1387_v11  ;;  %v975_v7 = vpack.c.bf16 %v935_v1, %v935_v1 }
 0x25e   : > { %v976_v9 = vpack.c.bf16 %v937_v4, %v937_v4 }
 0x25f   : > { %v1510_v20 = vpack.c.bf16 %v1483_v18, %v1482_v17  ;;  %v1324_v21 = vpack.c.bf16 %v1260_v16, %v1260_v16  ;;  %v1007_v10 = vunpack.c.l.bf16 %v975_v7  ;;  %v3339_v17 = vld [vmem:[#allocation12] sm:$0xff] }
 0x260   : > { %v1008_v11 = vunpack.c.l.bf16 %v976_v9  ;;  %1962 = vmatpush.bf16.msrb.mxu0 %v3339_v17 }
 0x261   : > { %1618 = vmatmul.bf16.gmra.mxu3 %v1510_v20  ;;  %v1356_v24 = vunpack.c.l.bf16 %v1324_v21  ;;  %v1039_v13 = vmul.f32 0.100097656, %v1007_v10 }
 0x262   : > { %v1040_v16 = vmul.f32 0.100097656, %v1008_v11 }
 0x263   : > { %v1388_v27 = vmul.f32 0.100097656, %v1356_v24  ;;  %v1135_v19 = vmax.f32 %v1007_v10, %v1039_v13 }
 0x264   : > { %v1261_v23 = vpop.f32.mrf.mxu2  ;;  %v1136_v21 = vmax.f32 %v1008_v11, %v1040_v16 }
 0x265   : > { %v1262_v25 = vadd.f32 %v4091_v8, %v1261_v23  ;;  %v1484_v33 = vmax.f32 %v1356_v24, %v1388_v27 }
 0x266   : > { %v1154_v24 = vpack.c.bf16 %v1136_v21, %v1135_v19 }
 0x267   : > { %v1325_v26 = vpack.c.bf16 %v1262_v25, %v1262_v25 }
 0x268   : > { %1298 = vmatmul.bf16.gmra.mxu2 %v1154_v24 }
 0x269   : > { %v1357_v28 = vunpack.c.l.bf16 %v1325_v26 }
 0x26b   : > { %v1389_v29 = vmul.f32 0.100097656, %v1357_v28 }
 0x26c   : > { %v1264_v31 = vpop.f32.mrf.mxu2 }
 0x26d   : > { %v1265_v32 = vadd.f32 %v4091_v8, %v1264_v31  ;;  %v1485_v34 = vmax.f32 %v1357_v28, %v1389_v29 }
 0x26e   : > { %v939_v20 = vpop.f32.mrf.mxu1 }
 0x26f   : > { %v1511_v35 = vpack.c.bf16 %v1485_v34, %v1484_v33  ;;  %v1326_v36 = vpack.c.bf16 %v1265_v32, %v1265_v32  ;;  %v940_v28 = vadd.f32 %v4051_v15, %v939_v20 }
 0x271   : > { %1623 = vmatmul.bf16.gmra.mxu3 %v1511_v35  ;;  %v1358_v38 = vunpack.c.l.bf16 %v1326_v36  ;;  %v977_v32 = vpack.c.bf16 %v940_v28, %v940_v28 }
 0x273   : > { %v1390_v42 = vmul.f32 0.100097656, %v1358_v38 }
 0x274   : > { %v1266_v37 = vpop.f32.mrf.mxu2 }
 0x275   : > { %v1267_v39 = vadd.f32 %v4091_v8, %v1266_v37  ;;  %v1486_v48 = vmax.f32 %v1358_v38, %v1390_v42  ;;  %v1009_v37 = vunpack.c.l.bf16 %v977_v32 }
 0x276   : > { %v941_v33 = vpop.f32.mrf.mxu1 }
 0x277   : > { %v1327_v41 = vpack.c.bf16 %v1267_v39, %v1267_v39  ;;  %v942_v34 = vadd.f32 %v4051_v15, %v941_v33  ;;  %v4130_v39 = vld [vmem:[%s4508_s8] ss:$0 sm:$0xff]  ;;  %v1041_v40 = vmul.f32 0.100097656, %v1009_v37 }
 0x279   : > { %v1359_v43 = vunpack.c.l.bf16 %v1327_v41  ;;  %v978_v38 = vpack.c.bf16 %v942_v34, %v942_v34 }
 0x27b   : > { %v1391_v44 = vmul.f32 0.100097656, %v1359_v43  ;;  %v1010_v41 = vunpack.c.l.bf16 %v978_v38 }
 0x27c   : > { %v1269_v45 = vpop.f32.mrf.mxu2 }
 0x27d   : > { %v1270_v47 = vadd.f32 %v4091_v8, %v1269_v45  ;;  %v1487_v49 = vmax.f32 %v1359_v43, %v1391_v44  ;;  %v1137_v45 = vmax.f32 %v1009_v37, %v1041_v40 }
 0x27f   : > { %v1512_v51 = vpack.c.bf16 %v1487_v49, %v1486_v48  ;;  %v1328_v52 = vpack.c.bf16 %v1270_v47, %v1270_v47  ;;  %v1042_v47 = vmul.f32 0.100097656, %v1010_v41 }
 0x281   : > { %1628 = vmatmul.bf16.gmra.mxu3 %v1512_v51  ;;  %v1360_v54 = vunpack.c.l.bf16 %v1328_v52  ;;  %v1138_v49 = vmax.f32 %v1010_v41, %v1042_v47 }
 0x283   : > { %v1392_v59 = vmul.f32 0.100097656, %v1360_v54  ;;  %v1155_v52 = vpack.c.bf16 %v1138_v49, %v1137_v45 }
 0x284   : > { %v1271_v53 = vpop.f32.mrf.mxu2 }
 0x285   : > { %v1272_v55 = vadd.f32 %v4091_v8, %v1271_v53  ;;  %v1488_v46 = vmax.f32 %v1360_v54, %v1392_v59  ;;  %1303 = vmatmul.bf16.gmra.mxu2 %v1155_v52 }
 0x287   : > { %v1329_v58 = vpack.c.bf16 %v1272_v55, %v1272_v55 }
 0x289   : > { %v1361_v60 = vunpack.c.l.bf16 %v1329_v58 }
 0x28b   : > { %v1393_v61 = vmul.f32 0.100097656, %v1361_v60 }
 0x28c   : > { %v1274_v62 = vpop.f32.mrf.mxu2 }
 0x28d   : > { %v1275_v63 = vadd.f32 %v4091_v8, %v1274_v62  ;;  %v1489_v0 = vmax.f32 %v1361_v60, %v1393_v61 }
 0x28f   : > { %v1330_v5 = vpack.c.bf16 %v1275_v63, %v1275_v63  ;;  %v1513_v6 = vpack.c.bf16 %v1489_v0, %v1488_v46 }
 0x291   : > { %1633 = vmatmul.bf16.gmra.mxu3 %v1513_v6  ;;  %v1362_v12 = vunpack.c.l.bf16 %v1330_v5 }
 0x293   : > { %v1394_v22 = vmul.f32 0.100097656, %v1362_v12 }
 0x294   : > { %v1276_v14 = vpop.f32.mrf.mxu2 }
 0x295   : > { %v1277_v18 = vadd.f32 %v4091_v8, %v1276_v14  ;;  %v1490_v26 = vmax.f32 %v1362_v12, %v1394_v22 }
 0x297   : > { %v1331_v23 = vpack.c.bf16 %v1277_v18, %v1277_v18 }
 0x299   : > { %v1363_v25 = vunpack.c.l.bf16 %v1331_v23 }
 0x29b   : > { %v1395_v27 = vmul.f32 0.100097656, %v1363_v25 }
 0x29c   : > { %v1279_v29 = vpop.f32.mrf.mxu2 }
 0x29d   : > { %v1491_v30 = vmax.f32 %v1363_v25, %v1395_v27  ;;  %v1280_v31 = vadd.f32 %v4091_v8, %v1279_v29 }
 0x29f   : > { %v1332_v35 = vpack.c.bf16 %v1280_v31, %v1280_v31  ;;  %v1514_v36 = vpack.c.bf16 %v1491_v30, %v1490_v26 }
 0x2a1   : > { %1638 = vmatmul.bf16.gmra.mxu3 %v1514_v36  ;;  %v1364_v42 = vunpack.c.l.bf16 %v1332_v35 }
 0x2a3   : > { %v1396_v50 = vmul.f32 0.100097656, %v1364_v42 }
 0x2a4   : > { %v1281_v43 = vpop.f32.mrf.mxu2  ;;  %v1599_v44 = vpop.f32.mrf.mxu3 }
 0x2a5   : > { %v1282_v48 = vadd.f32 %v4091_v8, %v1281_v43  ;;  %v1600_v15 = vadd.f32 %v4130_v39, %v1599_v44  ;;  %v1492_v55 = vmax.f32 %v1364_v42, %v1396_v50 }
 0x2a7   : > { %v1333_v51 = vpack.c.bf16 %v1282_v48, %v1282_v48  ;;  %v1679_v54 = vpack.c.bf16 %v1600_v15, %v1600_v15 }
 0x2a9   : > { %v1365_v53 = vunpack.c.l.bf16 %v1333_v51  ;;  %v1711_v60 = vunpack.c.l.bf16 %v1679_v54 }
 0x2ab   : > { %v1397_v56 = vmul.f32 0.100097656, %v1365_v53  ;;  %v1743_v1 = vmul.f32 0.100097656, %v1711_v60 }
 0x2ac   : > { %v1601_v57 = vpop.f32.mrf.mxu3  ;;  %v1284_v58 = vpop.f32.mrf.mxu2 }
 0x2ad   : > { %v1493_v59 = vmax.f32 %v1365_v53, %v1397_v56  ;;  %v1602_v61 = vadd.f32 %v4130_v39, %v1601_v57  ;;  %v1285_v62 = vadd.f32 %v4091_v8, %v1284_v58  ;;  %v1839_v7 = vmax.f32 %v1711_v60, %v1743_v1  ;;  %v944_v53 = vpop.f32.mrf.mxu1  ;;  %v3506_v57 = vld [vmem:[%s4504_s4] ss:$0 sm:$0xff] }
 0x2ae   : > { %v945_v58 = vadd.f32 %v3506_v57, %v944_v53 }
 0x2af   : > { %v1680_v63 = vpack.c.bf16 %v1602_v61, %v1602_v61  ;;  %v1515_v46 = vpack.c.bf16 %v1493_v59, %v1492_v55  ;;  %v1334_v0 = vpack.c.bf16 %v1285_v62, %v1285_v62 }
 0x2b1   : > { %v1712_v2 = vunpack.c.l.bf16 %v1680_v63  ;;  %1643 = vmatmul.bf16.gmra.mxu3 %v1515_v46  ;;  %v1366_v4 = vunpack.c.l.bf16 %v1334_v0  ;;  %v979_v63 = vpack.c.bf16 %v945_v58, %v945_v58 }
 0x2b3   : > { %v1744_v3 = vmul.f32 0.100097656, %v1712_v2  ;;  %v1398_v12 = vmul.f32 0.100097656, %v1366_v4  ;;  %v1011_v0 = vunpack.c.l.bf16 %v979_v63 }
 0x2b4   : > { %v1604_v5 = vpop.f32.mrf.mxu3  ;;  %v1286_v6 = vpop.f32.mrf.mxu2 }
 0x2b5   : > { %v1840_v9 = vmax.f32 %v1712_v2, %v1744_v3  ;;  %v1605_v10 = vadd.f32 %v4130_v39, %v1604_v5  ;;  %v1287_v11 = vadd.f32 %v4091_v8, %v1286_v6  ;;  %v1494_v18 = vmax.f32 %v1366_v4, %v1398_v12  ;;  %v946_v1 = vpop.f32.mrf.mxu1 }
 0x2b6   : > { %v947_v3 = vadd.f32 %v3506_v57, %v946_v1  ;;  %v1043_v4 = vmul.f32 0.100097656, %v1011_v0 }
 0x2b7   : > { %v1871_v13 = vpack.c.bf16 %v1840_v9, %v1839_v7  ;;  %v1335_v14 = vpack.c.bf16 %v1287_v11, %v1287_v11  ;;  %v1681_v16 = vpack.c.bf16 %v1605_v10, %v1605_v10 }
 0x2b8   : > { %v980_v5 = vpack.c.bf16 %v947_v3, %v947_v3  ;;  %v1139_v12 = vmax.f32 %v1011_v0, %v1043_v4 }
 0x2b9   : > { %1963 = vmatmul.bf16.vlgmr.msrb.gmra.mxu0 %v1871_v13  ;;  %v1367_v17 = vunpack.c.l.bf16 %v1335_v14  ;;  %v1713_v22 = vunpack.c.l.bf16 %v1681_v16 }
 0x2ba   : > { %v1012_v10 = vunpack.c.l.bf16 %v980_v5 }
 0x2bb   : > { %v1399_v19 = vmul.f32 0.100097656, %v1367_v17  ;;  %v1745_v29 = vmul.f32 0.100097656, %v1713_v22 }
 0x2bc   : > { %v1606_v20 = vpop.f32.mrf.mxu3  ;;  %v1289_v21 = vpop.f32.mrf.mxu2  ;;  %v1044_v13 = vmul.f32 0.100097656, %v1012_v10 }
 0x2bd   : > { %v1607_v23 = vadd.f32 %v4130_v39, %v1606_v20  ;;  %v1495_v24 = vmax.f32 %v1367_v17, %v1399_v19  ;;  %v1290_v25 = vadd.f32 %v4091_v8, %v1289_v21  ;;  %v1841_v36 = vmax.f32 %v1713_v22, %v1745_v29 }
 0x2be   : > { %v1140_v17 = vmax.f32 %v1012_v10, %v1044_v13 }
 0x2bf   : > { %v1682_v26 = vpack.c.bf16 %v1607_v23, %v1607_v23  ;;  %v1336_v27 = vpack.c.bf16 %v1290_v25, %v1290_v25  ;;  %v1516_v28 = vpack.c.bf16 %v1495_v24, %v1494_v18 }
 0x2c0   : > { %v1156_v21 = vpack.c.bf16 %v1140_v17, %v1139_v12 }
 0x2c1   : > { %v1714_v30 = vunpack.c.l.bf16 %v1682_v26  ;;  %1648 = vmatmul.bf16.gmra.mxu3 %v1516_v28  ;;  %v1368_v32 = vunpack.c.l.bf16 %v1336_v27 }
 0x2c2   : > { %1308 = vmatmul.bf16.gmra.mxu2 %v1156_v21 }
 0x2c3   : > { %v1746_v31 = vmul.f32 0.100097656, %v1714_v30  ;;  %v1400_v40 = vmul.f32 0.100097656, %v1368_v32 }
 0x2c4   : > { %v1609_v33 = vpop.f32.mrf.mxu3  ;;  %v1291_v34 = vpop.f32.mrf.mxu2 }
 0x2c5   : > { %v1610_v35 = vadd.f32 %v4130_v39, %v1609_v33  ;;  %v1842_v37 = vmax.f32 %v1714_v30, %v1746_v31  ;;  %v1292_v38 = vadd.f32 %v4091_v8, %v1291_v34  ;;  %v1496_v45 = vmax.f32 %v1368_v32, %v1400_v40 }
 0x2c7   : > { %v1872_v41 = vpack.c.bf16 %v1842_v37, %v1841_v36  ;;  %v1337_v42 = vpack.c.bf16 %v1292_v38, %v1292_v38  ;;  %v1683_v43 = vpack.c.bf16 %v1610_v35, %v1610_v35 }
 0x2c9   : > { %1968 = vmatmul.bf16.gmra.mxu0 %v1872_v41  ;;  %v1369_v44 = vunpack.c.l.bf16 %v1337_v42  ;;  %v1715_v15 = vunpack.c.l.bf16 %v1683_v43 }
 0x2cb   : > { %v1401_v47 = vmul.f32 0.100097656, %v1369_v44  ;;  %v1747_v54 = vmul.f32 0.100097656, %v1715_v15 }
 0x2cc   : > { %v1611_v48 = vpop.f32.mrf.mxu3  ;;  %v1294_v18 = vpop.f32.mrf.mxu2 }
 0x2cd   : > { %v1612_v49 = vadd.f32 %v4130_v39, %v1611_v48  ;;  %v1497_v50 = vmax.f32 %v1369_v44, %v1401_v47  ;;  %v1843_v61 = vmax.f32 %v1715_v15, %v1747_v54  ;;  %v1295_v20 = vadd.f32 %v4091_v8, %v1294_v18 }
 0x2ce   : > { %v3780_v15 = vmov 0  }
 0x2cf   : > { %v1684_v51 = vpack.c.bf16 %v1612_v49, %v1612_v49  ;;  %v1517_v52 = vpack.c.bf16 %v1497_v50, %v1496_v45  ;;  %v1338_v26 = vpack.c.bf16 %v1295_v20, %v1295_v20  ;;  %3497 = vset.pattern.permute.xlu0 %v3780_v15  ;;  %v2208_v49 = vld [vmem:[#allocation2] sm:$0x1]  ;;  %3498 = vset.pattern.permute.xlu2 %v3780_v15 }
 0x2d0   : > { %2211 = vperm.xlu0 %3497, %v2208_v49   ;;  %3499 = vset.pattern.permute.xlu1 %v3780_v15 }
 0x2d1   : > { %v1716_v55 = vunpack.c.l.bf16 %v1684_v51  ;;  %1653 = vmatmul.bf16.gmra.mxu3 %v1517_v52  ;;  %v1370_v29 = vunpack.c.l.bf16 %v1338_v26 }
 0x2d3   : > { %v1748_v56 = vmul.f32 0.100097656, %v1716_v55  ;;  %v1402_v35 = vmul.f32 0.100097656, %v1370_v29 }
 0x2d4   : > { %v1614_v59 = vpop.f32.mrf.mxu3  ;;  %v1296_v30 = vpop.f32.mrf.mxu2 }
 0x2d5   : > { %v1615_v60 = vadd.f32 %v4130_v39, %v1614_v59  ;;  %v1844_v62 = vmax.f32 %v1716_v55, %v1748_v56  ;;  %v1297_v31 = vadd.f32 %v4091_v8, %v1296_v30  ;;  %v1498_v42 = vmax.f32 %v1370_v29, %v1402_v35 }
 0x2d7   : > { %v1873_v46 = vpack.c.bf16 %v1844_v62, %v1843_v61  ;;  %v1685_v2 = vpack.c.bf16 %v1615_v60, %v1615_v60  ;;  %v1339_v36 = vpack.c.bf16 %v1297_v31, %v1297_v31 }
 0x2d9   : > { %1973 = vmatmul.bf16.gmra.mxu0 %v1873_v46  ;;  %v1717_v7 = vunpack.c.l.bf16 %v1685_v2  ;;  %v1371_v38 = vunpack.c.l.bf16 %v1339_v36 }
 0x2db   : > { %v1749_v14 = vmul.f32 0.100097656, %v1717_v7  ;;  %v1403_v43 = vmul.f32 0.100097656, %v1371_v38 }
 0x2dc   : > { %v1616_v6 = vpop.f32.mrf.mxu3 }
 0x2dd   : > { %v1617_v9 = vadd.f32 %v4130_v39, %v1616_v6  ;;  %v1845_v24 = vmax.f32 %v1717_v7, %v1749_v14  ;;  %v1499_v45 = vmax.f32 %v1371_v38, %v1403_v43 }
 0x2df   : > { %v1686_v11 = vpack.c.bf16 %v1617_v9, %v1617_v9  ;;  %v1518_v52 = vpack.c.bf16 %v1499_v45, %v1498_v42 }
 0x2e1   : > { %v1718_v16 = vunpack.c.l.bf16 %v1686_v11  ;;  %1658 = vmatmul.bf16.gmra.mxu3 %v1518_v52 }
 0x2e3   : > { %v1750_v19 = vmul.f32 0.100097656, %v1718_v16 }
 0x2e4   : > { %v1619_v22 = vpop.f32.mrf.mxu3 }
 0x2e5   : > { %v1620_v23 = vadd.f32 %v4130_v39, %v1619_v22  ;;  %v1846_v25 = vmax.f32 %v1718_v16, %v1750_v19 }
 0x2e7   : > { %v1874_v27 = vpack.c.bf16 %v1846_v25, %v1845_v24  ;;  %v1687_v28 = vpack.c.bf16 %v1620_v23, %v1620_v23 }
 0x2e9   : > { %1978 = vmatmul.bf16.gmra.mxu0 %v1874_v27  ;;  %v1719_v32 = vunpack.c.l.bf16 %v1687_v28 }
 0x2eb   : > { %v1751_v40 = vmul.f32 0.100097656, %v1719_v32  ;;  %v1299_v21 = vpop.f32.mrf.mxu2 }
 0x2ec   : > { %v1621_v33 = vpop.f32.mrf.mxu3  ;;  %v1300_v30 = vadd.f32 %v4091_v8, %v1299_v21 }
 0x2ed   : > { %v1622_v34 = vadd.f32 %v4130_v39, %v1621_v33  ;;  %v1847_v48 = vmax.f32 %v1719_v32, %v1751_v40 }
 0x2ef   : > { %v1688_v37 = vpack.c.bf16 %v1622_v34, %v1622_v34  ;;  %v1340_v34 = vpack.c.bf16 %v1300_v30, %v1300_v30 }
 0x2f1   : > { %v1720_v41 = vunpack.c.l.bf16 %v1688_v37  ;;  %v1372_v37 = vunpack.c.l.bf16 %v1340_v34 }
 0x2f3   : > { %v1752_v44 = vmul.f32 0.100097656, %v1720_v41  ;;  %v1301_v31 = vpop.f32.mrf.mxu2  ;;  %v1404_v40 = vmul.f32 0.100097656, %v1372_v37 }
 0x2f4   : > { %v1624_v47 = vpop.f32.mrf.mxu3  ;;  %v1302_v32 = vadd.f32 %v4091_v8, %v1301_v31 }
 0x2f5   : > { %v1625_v50 = vadd.f32 %v4130_v39, %v1624_v47  ;;  %v1848_v51 = vmax.f32 %v1720_v41, %v1752_v44  ;;  %v1500_v45 = vmax.f32 %v1372_v37, %v1404_v40 }
 0x2f6   : > { %v1341_v35 = vpack.c.bf16 %v1302_v32, %v1302_v32 }
 0x2f7   : > { %v1875_v53 = vpack.c.bf16 %v1848_v51, %v1847_v48  ;;  %v1689_v54 = vpack.c.bf16 %v1625_v50, %v1625_v50 }
 0x2f8   : > { %v1373_v38 = vunpack.c.l.bf16 %v1341_v35 }
 0x2f9   : > { %1983 = vmatmul.bf16.gmra.mxu0 %v1875_v53  ;;  %v1721_v56 = vunpack.c.l.bf16 %v1689_v54 }
 0x2fa   : > { %v1405_v42 = vmul.f32 0.100097656, %v1373_v38 }
 0x2fb   : > { %v1753_v59 = vmul.f32 0.100097656, %v1721_v56 }
 0x2fc   : > { %v1626_v55 = vpop.f32.mrf.mxu3  ;;  %v1501_v48 = vmax.f32 %v1373_v38, %v1405_v42 }
 0x2fd   : > { %v1627_v57 = vadd.f32 %v4130_v39, %v1626_v55  ;;  %v1849_v46 = vmax.f32 %v1721_v56, %v1753_v59  ;;  %v4166_v55 = vld [vmem:[%s4510_s10] ss:$0 sm:$0xff] }
 0x2fe   : > { %v1519_v51 = vpack.c.bf16 %v1501_v48, %v1500_v45 }
 0x2ff   : > { %v1690_v58 = vpack.c.bf16 %v1627_v57, %v1627_v57 }
 0x300   : > { %1663 = vmatmul.bf16.gmra.mxu3 %v1519_v51 }
 0x301   : > { %v1722_v60 = vunpack.c.l.bf16 %v1690_v58 }
 0x303   : > { %v1754_v61 = vmul.f32 0.100097656, %v1722_v60 }
 0x304   : > { %v1629_v62 = vpop.f32.mrf.mxu3 }
 0x305   : > { %v1630_v63 = vadd.f32 %v4130_v39, %v1629_v62  ;;  %v1850_v0 = vmax.f32 %v1722_v60, %v1754_v61 }
 0x307   : > { %v1876_v1 = vpack.c.bf16 %v1850_v0, %v1849_v46  ;;  %v1691_v2 = vpack.c.bf16 %v1630_v63, %v1630_v63 }
 0x308   : > { %v1304_v47 = vpop.f32.mrf.mxu2 }
 0x309   : > { %1988 = vmatmul.bf16.gmra.mxu0 %v1876_v1  ;;  %v1723_v4 = vunpack.c.l.bf16 %v1691_v2  ;;  %v1305_v15 = vadd.f32 %v4091_v8, %v1304_v47 }
 0x30b   : > { %v1755_v7 = vmul.f32 0.100097656, %v1723_v4  ;;  %v1342_v50 = vpack.c.bf16 %v1305_v15, %v1305_v15 }
 0x30c   : > { %v1631_v3 = vpop.f32.mrf.mxu3 }
 0x30d   : > { %v1632_v5 = vadd.f32 %v4130_v39, %v1631_v3  ;;  %v1851_v13 = vmax.f32 %v1723_v4, %v1755_v7  ;;  %v1374_v57 = vunpack.c.l.bf16 %v1342_v50 }
 0x30f   : > { %v1692_v6 = vpack.c.bf16 %v1632_v5, %v1632_v5  ;;  %v1406_v1 = vmul.f32 0.100097656, %v1374_v57  ;;  %v4174_v5 = vld [vmem:[%s4536_s17] ss:$0 sm:$0xff] }
 0x310   : > { %v1306_v61 = vpop.f32.mrf.mxu2 }
 0x311   : > { %v1724_v9 = vunpack.c.l.bf16 %v1692_v6  ;;  %v1307_v63 = vadd.f32 %v4091_v8, %v1306_v61 }
 0x313   : > { %v1756_v10 = vmul.f32 0.100097656, %v1724_v9  ;;  %v1343_v2 = vpack.c.bf16 %v1307_v63, %v1307_v63 }
 0x314   : > { %v1634_v11 = vpop.f32.mrf.mxu3 }
 0x315   : > { %v1635_v12 = vadd.f32 %v4130_v39, %v1634_v11  ;;  %v1852_v14 = vmax.f32 %v1724_v9, %v1756_v10  ;;  %v1375_v6 = vunpack.c.l.bf16 %v1343_v2  ;;  %v1502_v10 = vmax.f32 %v1374_v57, %v1406_v1 }
 0x317   : > { %v1877_v16 = vpack.c.bf16 %v1852_v14, %v1851_v13  ;;  %v1693_v17 = vpack.c.bf16 %v1635_v12, %v1635_v12  ;;  %v1407_v11 = vmul.f32 0.100097656, %v1375_v6 }
 0x319   : > { %1993 = vmatmul.bf16.gmra.mxu0 %v1877_v16  ;;  %v1725_v19 = vunpack.c.l.bf16 %v1693_v17  ;;  %v1503_v16 = vmax.f32 %v1375_v6, %v1407_v11 }
 0x31b   : > { %v1757_v23 = vmul.f32 0.100097656, %v1725_v19 }
 0x31c   : > { %v1636_v18 = vpop.f32.mrf.mxu3 }
 0x31d   : > { %v1637_v20 = vadd.f32 %v4130_v39, %v1636_v18  ;;  %v1853_v28 = vmax.f32 %v1725_v19, %v1757_v23  ;;  %v1520_v19 = vpack.c.bf16 %v1503_v16, %v1502_v10 }
 0x31f   : > { %v1694_v22 = vpack.c.bf16 %v1637_v20, %v1637_v20  ;;  %1668 = vmatmul.bf16.gmra.mxu3 %v1520_v19  ;;  %v3507_v19 = vld [vmem:[%s4506_s6] ss:$0 sm:$0xff] }
 0x321   : > { %v1726_v24 = vunpack.c.l.bf16 %v1694_v22 }
 0x323   : > { %v1758_v25 = vmul.f32 0.100097656, %v1726_v24 }
 0x324   : > { %v1639_v26 = vpop.f32.mrf.mxu3 }
 0x325   : > { %v1640_v27 = vadd.f32 %v4130_v39, %v1639_v26  ;;  %v1854_v29 = vmax.f32 %v1726_v24, %v1758_v25 }
 0x327   : > { %v1878_v33 = vpack.c.bf16 %v1854_v29, %v1853_v28  ;;  %v1695_v36 = vpack.c.bf16 %v1640_v27, %v1640_v27 }
 0x329   : > { %1998 = vmatmul.bf16.gmra.mxu0 %v1878_v33  ;;  %v1727_v43 = vunpack.c.l.bf16 %v1695_v36 }
 0x32b   : > { %v1759_v52 = vmul.f32 0.100097656, %v1727_v43 }
 0x32c   : > { %v1641_v41 = vpop.f32.mrf.mxu3 }
 0x32d   : > { %v1642_v44 = vadd.f32 %v4130_v39, %v1641_v41  ;;  %v1855_v58 = vmax.f32 %v1727_v43, %v1759_v52 }
 0x32f   : > { %v1696_v49 = vpack.c.bf16 %v1642_v44, %v1642_v44 }
 0x331   : > { %v1728_v53 = vunpack.c.l.bf16 %v1696_v49 }
 0x333   : > { %v1760_v54 = vmul.f32 0.100097656, %v1728_v53 }
 0x334   : > { %v1644_v56 = vpop.f32.mrf.mxu3 }
 0x335   : > { %v1856_v59 = vmax.f32 %v1728_v53, %v1760_v54  ;;  %v1645_v60 = vadd.f32 %v4130_v39, %v1644_v56 }
 0x336   : > { %v1964_v62 = vpop.f32.mrf.mxu0 }
 0x337   : > { %v1965_v46 = vadd.f32 %v4166_v55, %v1964_v62  ;;  %v1879_v0 = vpack.c.bf16 %v1856_v59, %v1855_v58  ;;  %v1697_v3 = vpack.c.bf16 %v1645_v60, %v1645_v60 }
 0x339   : > { %v2044_v4 = vmul.f32 0.1, %v1965_v46  ;;  %2003 = vmatmul.bf16.gmra.mxu0 %v1879_v0  ;;  %v1729_v12 = vunpack.c.l.bf16 %v1697_v3 }
 0x33b   : > { %v2076_v7 = vmax.f32 %v1965_v46, %v2044_v4  ;;  %v1761_v20 = vmul.f32 0.100097656, %v1729_v12 }
 0x33c   : > { %v1646_v9 = vpop.f32.mrf.mxu3 }
 0x33d   : > { %v1647_v8 = vadd.f32 %v4130_v39, %v1646_v9  ;;  %v2112_v13 = vmul.f32 %v4174_v5, %v2076_v7  ;;  %v1857_v26 = vmax.f32 %v1729_v12, %v1761_v20 }
 0x33e   : > { %v1966_v14 = vpop.f32.mrf.mxu0 }
 0x33f   : > { %v1698_v17 = vpack.c.bf16 %v1647_v8, %v1647_v8  ;;  %v1967_v18 = vadd.f32 %v4166_v55, %v1966_v14  ;;  %2144 = vadd.xlane.f32.xlu0 %v2112_v13 }
 0x341   : > { %v1730_v21 = vunpack.c.l.bf16 %v1698_v17  ;;  %v2045_v22 = vmul.f32 0.1, %v1967_v18 }
 0x343   : > { %v1762_v23 = vmul.f32 0.100097656, %v1730_v21  ;;  %v2077_v24 = vmax.f32 %v1967_v18, %v2045_v22 }
 0x344   : > { %v1649_v25 = vpop.f32.mrf.mxu3 }
 0x345   : > { %v1858_v27 = vmax.f32 %v1730_v21, %v1762_v23  ;;  %v2113_v28 = vmul.f32 %v4174_v5, %v2077_v24  ;;  %v1650_v29 = vadd.f32 %v4130_v39, %v1649_v25  ;;  %v1309_v16 = vpop.f32.mrf.mxu2 }
 0x346   : > { %v1969_v30 = vpop.f32.mrf.mxu0  ;;  %v1310_v20 = vadd.f32 %v3507_v19, %v1309_v16 }
 0x347   : > { %v1970_v31 = vadd.f32 %v4166_v55, %v1969_v30  ;;  %2146 = vadd.xlane.f32.xlu1 %v2113_v28  ;;  %v1880_v32 = vpack.c.bf16 %v1858_v27, %v1857_v26  ;;  %v1699_v33 = vpack.c.bf16 %v1650_v29, %v1650_v29 }
 0x348   : > { %v1344_v22 = vpack.c.bf16 %v1310_v20, %v1310_v20 }
 0x349   : > { %v2046_v34 = vmul.f32 0.1, %v1970_v31  ;;  %2008 = vmatmul.bf16.gmra.mxu0 %v1880_v32  ;;  %v1731_v36 = vunpack.c.l.bf16 %v1699_v33 }
 0x34a   : > { %v1376_v25 = vunpack.c.l.bf16 %v1344_v22 }
 0x34b   : > { %v2078_v35 = vmax.f32 %v1970_v31, %v2046_v34  ;;  %v1763_v42 = vmul.f32 0.100097656, %v1731_v36 }
 0x34c   : > { %v1651_v37 = vpop.f32.mrf.mxu3  ;;  %v1408_v30 = vmul.f32 0.100097656, %v1376_v25 }
 0x34d   : > { %v2114_v38 = vmul.f32 %v4174_v5, %v2078_v35  ;;  %v1652_v40 = vadd.f32 %v4130_v39, %v1651_v37  ;;  %v1859_v48 = vmax.f32 %v1731_v36, %v1763_v42  ;;  %v1311_v26 = vpop.f32.mrf.mxu2 }
 0x34e   : > { %v1971_v41 = vpop.f32.mrf.mxu0  ;;  %v1312_v28 = vadd.f32 %v3507_v19, %v1311_v26  ;;  %v1504_v36 = vmax.f32 %v1376_v25, %v1408_v30 }
 0x34f   : > { %v1972_v43 = vadd.f32 %v4166_v55, %v1971_v41  ;;  %2148 = vadd.xlane.f32.xlu1 %v2114_v38  ;;  %v1700_v44 = vpack.c.bf16 %v1652_v40, %v1652_v40 }
 0x350   : > { %v1345_v31 = vpack.c.bf16 %v1312_v28, %v1312_v28 }
 0x351   : > { %v2047_v45 = vmul.f32 0.1, %v1972_v43  ;;  %v1732_v47 = vunpack.c.l.bf16 %v1700_v44 }
 0x352   : > { %v1377_v33 = vunpack.c.l.bf16 %v1345_v31 }
 0x353   : > { %v1764_v15 = vmul.f32 0.100097656, %v1732_v47  ;;  %v2079_v49 = vmax.f32 %v1972_v43, %v2047_v45 }
 0x354   : > { %v1654_v50 = vpop.f32.mrf.mxu3  ;;  %v1409_v37 = vmul.f32 0.100097656, %v1377_v33 }
 0x355   : > { %v1860_v51 = vmax.f32 %v1732_v47, %v1764_v15  ;;  %v2115_v52 = vmul.f32 %v4174_v5, %v2079_v49  ;;  %v1655_v53 = vadd.f32 %v4130_v39, %v1654_v50 }
 0x356   : > { %v1974_v54 = vpop.f32.mrf.mxu0  ;;  %v1505_v40 = vmax.f32 %v1377_v33, %v1409_v37 }
 0x357   : > { %v1975_v56 = vadd.f32 %v4166_v55, %v1974_v54  ;;  %2150 = vadd.xlane.f32.xlu2 %v2115_v52  ;;  %v1701_v57 = vpack.c.bf16 %v1655_v53, %v1655_v53  ;;  %v1881_v58 = vpack.c.bf16 %v1860_v51, %v1859_v48 }
 0x358   : > { %v1521_v44 = vpack.c.bf16 %v1505_v40, %v1504_v36 }
 0x359   : > { %v2048_v59 = vmul.f32 0.1, %v1975_v56  ;;  %2013 = vmatmul.bf16.gmra.mxu0 %v1881_v58  ;;  %v1733_v61 = vunpack.c.l.bf16 %v1701_v57 }
 0x35a   : > { %1673 = vmatmul.bf16.gmra.mxu3 %v1521_v44 }
 0x35b   : > { %v2080_v60 = vmax.f32 %v1975_v56, %v2048_v59  ;;  %v1765_v2 = vmul.f32 0.100097656, %v1733_v61 }
 0x35c   : > { %v1656_v62 = vpop.f32.mrf.mxu3 }
 0x35d   : > { %v2116_v63 = vmul.f32 %v4174_v5, %v2080_v60  ;;  %v1657_v46 = vadd.f32 %v4130_v39, %v1656_v62  ;;  %v1861_v7 = vmax.f32 %v1733_v61, %v1765_v2 }
 0x35e   : > { %v1976_v0 = vpop.f32.mrf.mxu0 }
 0x35f   : > { %v1977_v1 = vadd.f32 %v4166_v55, %v1976_v0  ;;  %2152 = vadd.xlane.f32.xlu2 %v2116_v63  ;;  %v1702_v3 = vpack.c.bf16 %v1657_v46, %v1657_v46 }
 0x361   : > { %v2049_v4 = vmul.f32 0.1, %v1977_v1  ;;  %v1734_v6 = vunpack.c.l.bf16 %v1702_v3 }
 0x363   : > { %v1766_v9 = vmul.f32 0.100097656, %v1734_v6  ;;  %v2081_v10 = vmax.f32 %v1977_v1, %v2049_v4 }
 0x364   : > { %v1659_v41 = vpop.f32.mrf.mxu3 }
 0x365   : > { %v1862_v11 = vmax.f32 %v1734_v6, %v1766_v9  ;;  %v2117_v12 = vmul.f32 %v4174_v5, %v2081_v10  ;;  %v1660_v43 = vadd.f32 %v4130_v39, %v1659_v41 }
 0x366   : > { %v1979_v8 = vpop.f32.mrf.mxu0 }
 0x367   : > { %v1980_v13 = vadd.f32 %v4166_v55, %v1979_v8  ;;  %2154 = vadd.xlane.f32.xlu1 %v2117_v12  ;;  %v1882_v14 = vpack.c.bf16 %v1862_v11, %v1861_v7  ;;  %v1703_v47 = vpack.c.bf16 %v1660_v43, %v1660_v43 }
 0x369   : > { %v2050_v17 = vmul.f32 0.1, %v1980_v13  ;;  %2018 = vmatmul.bf16.gmra.mxu0 %v1882_v14  ;;  %v1735_v50 = vunpack.c.l.bf16 %v1703_v47 }
 0x36b   : > { %v2082_v18 = vmax.f32 %v1980_v13, %v2050_v17  ;;  %v1767_v56 = vmul.f32 0.100097656, %v1735_v50 }
 0x36c   : > { %v1661_v51 = vpop.f32.mrf.mxu3 }
 0x36d   : > { %v2118_v21 = vmul.f32 %v4174_v5, %v2082_v18  ;;  %v1662_v53 = vadd.f32 %v4130_v39, %v1661_v51  ;;  %v1863_v62 = vmax.f32 %v1735_v50, %v1767_v56 }
 0x36e   : > { %v1981_v23 = vpop.f32.mrf.mxu0 }
 0x36f   : > { %v1982_v24 = vadd.f32 %v4166_v55, %v1981_v23  ;;  %2156 = vadd.xlane.f32.xlu2 %v2118_v21  ;;  %v1704_v57 = vpack.c.bf16 %v1662_v53, %v1662_v53  ;;  %v2212_v23 = vpop.permute.xlu0 %2211 }
 0x370   : > { %v4216_v28 = vperm.slane %v2212_v23, 0 }
 0x371   : > { %v2051_v27 = vmul.f32 0.1, %v1982_v24  ;;  %v1736_v60 = vunpack.c.l.bf16 %v1704_v57 }
 0x373   : > { %v2083_v29 = vmax.f32 %v1982_v24, %v2051_v27  ;;  %v1768_v63 = vmul.f32 0.100097656, %v1736_v60 }
 0x375   : > { %v2119_v32 = vmul.f32 %v4174_v5, %v2083_v29  ;;  %v1864_v0 = vmax.f32 %v1736_v60, %v1768_v63 }
 0x376   : > { %v1984_v34 = vpop.f32.mrf.mxu0 }
 0x377   : > { %v1985_v35 = vadd.f32 %v4166_v55, %v1984_v34  ;;  %2158 = vadd.xlane.f32.xlu1 %v2119_v32  ;;  %v1883_v2 = vpack.c.bf16 %v1864_v0, %v1863_v62 }
 0x379   : > { %v2052_v38 = vmul.f32 0.1, %v1985_v35  ;;  %2023 = vmatmul.bf16.gmra.mxu0 %v1883_v2 }
 0x37b   : > { %v2084_v42 = vmax.f32 %v1985_v35, %v2052_v38 }
 0x37d   : > { %v2120_v45 = vmul.f32 %v4174_v5, %v2084_v42 }
 0x37e   : > { %v1986_v48 = vpop.f32.mrf.mxu0 }
 0x37f   : > { %v1987_v15 = vadd.f32 %v4166_v55, %v1986_v48  ;;  %2160 = vadd.xlane.f32.xlu2 %v2120_v45 }
 0x381   : > { %v2053_v49 = vmul.f32 0.1, %v1987_v15 }
 0x383   : > { %v2085_v52 = vmax.f32 %v1987_v15, %v2053_v49 }
 0x385   : > { %v2121_v54 = vmul.f32 %v4174_v5, %v2085_v52 }
 0x386   : > { %v1989_v58 = vpop.f32.mrf.mxu0 }
 0x387   : > { %v1990_v59 = vadd.f32 %v4166_v55, %v1989_v58  ;;  %2162 = vadd.xlane.f32.xlu1 %v2121_v54 }
 0x389   : > { %v2054_v61 = vmul.f32 0.1, %v1990_v59 }
 0x38b   : > { %v2086_v46 = vmax.f32 %v1990_v59, %v2054_v61 }
 0x38d   : > { %v2122_v1 = vmul.f32 %v4174_v5, %v2086_v46 }
 0x38e   : > { %v1991_v3 = vpop.f32.mrf.mxu0 }
 0x38f   : > { %v1992_v4 = vadd.f32 %v4166_v55, %v1991_v3  ;;  %2164 = vadd.xlane.f32.xlu2 %v2122_v1 }
 0x391   : > { %v2055_v6 = vmul.f32 0.1, %v1992_v4 }
 0x393   : > { %v2087_v7 = vmax.f32 %v1992_v4, %v2055_v6 }
 0x395   : > { %v2123_v9 = vmul.f32 %v4174_v5, %v2087_v7 }
 0x396   : > { %v1994_v10 = vpop.f32.mrf.mxu0 }
 0x397   : > { %v1995_v11 = vadd.f32 %v4166_v55, %v1994_v10  ;;  %2166 = vadd.xlane.f32.xlu1 %v2123_v9  ;;  %v1664_v10 = vpop.f32.mrf.mxu3 }
 0x399   : > { %v2056_v12 = vmul.f32 0.1, %v1995_v11 }
 0x39b   : > { %v2088_v8 = vmax.f32 %v1995_v11, %v2056_v12 }
 0x39d   : > { %v2124_v13 = vmul.f32 %v4174_v5, %v2088_v8 }
 0x39e   : > { %v1996_v14 = vpop.f32.mrf.mxu0 }
 0x39f   : > { %v1997_v16 = vadd.f32 %v4166_v55, %v1996_v14  ;;  %2168 = vadd.xlane.f32.xlu2 %v2124_v13 }
 0x3a1   : > { %v2057_v17 = vmul.f32 0.1, %v1997_v16 }
 0x3a3   : > { %v2089_v18 = vmax.f32 %v1997_v16, %v2057_v17 }
 0x3a5   : > { %v2125_v19 = vmul.f32 %v4174_v5, %v2089_v18 }
 0x3a6   : > { %v1999_v20 = vpop.f32.mrf.mxu0 }
 0x3a7   : > { %v2000_v21 = vadd.f32 %v4166_v55, %v1999_v20  ;;  %2170 = vadd.xlane.f32.xlu1 %v2125_v19  ;;  %v1665_v20 = vadd.f32 %v4130_v39, %v1664_v10 }
 0x3a9   : > { %v2058_v22 = vmul.f32 0.1, %v2000_v21 }
 0x3ab   : > { %v2090_v24 = vmax.f32 %v2000_v21, %v2058_v22 }
 0x3ad   : > { %v2126_v25 = vmul.f32 %v4174_v5, %v2090_v24  ;;  %v1666_v24 = vpop.f32.mrf.mxu3 }
 0x3ae   : > { %v2001_v26 = vpop.f32.mrf.mxu0 }
 0x3af   : > { %v2002_v27 = vadd.f32 %v4166_v55, %v2001_v26  ;;  %2172 = vadd.xlane.f32.xlu2 %v2126_v25  ;;  %v1667_v26 = vadd.f32 %v4130_v39, %v1666_v24 }
 0x3b1   : > { %v2059_v29 = vmul.f32 0.1, %v2002_v27 }
 0x3b2   : > { %v2145_v30 = vpop.xlane.xlu0 %2144 }
 0x3b3   : > { %v2091_v31 = vmax.f32 %v2002_v27, %v2059_v29  ;;  %v2215_v32 = vadd.f32 %v4216_v28, %v2145_v30  ;;  %v1705_v27 = vpack.c.bf16 %v1665_v20, %v1665_v20  ;;  %v1706_v30 = vpack.c.bf16 %v1667_v26, %v1667_v26 }
 0x3b5   : > { %v2279_v33 = vperm.slane %v2215_v32, 0  ;;  %v2280_v34 = vperm.slane %v2215_v32, 1  ;;  %v2281_v35 = vperm.slane %v2215_v32, 2  ;;  %v2282_v36 = vperm.slane %v2215_v32, 3 }
 0x3b6   : > { %v2004_v37 = vpop.f32.mrf.mxu0  ;;  %v2283_v38 = vperm.slane %v2215_v32, 4  ;;  %v2127_v41 = vmul.f32 %v4174_v5, %v2091_v31  ;;  %v2284_v42 = vperm.slane %v2215_v32, 5  ;;  %v2285_v43 = vperm.slane %v2215_v32, 6 }
 0x3b7   : > { %2535 = vst [vmem:[#allocation1] ss:$9 sm:$0xff] %v2279_v33  ;;  %v2005_v40 = vadd.f32 %v4166_v55, %v2004_v37  ;;  %v2286_v45 = vperm.slane %v2215_v32, 7  ;;  %v1737_v32 = vunpack.c.l.bf16 %v1705_v27  ;;  %v1738_v33 = vunpack.c.l.bf16 %v1706_v30 }
 0x3b8   : > { %2537 = vst [vmem:[#allocation1 + $0x1] ss:$9 sm:$0xff] %v2280_v34  ;;  %2174 = vadd.xlane.f32.xlu0 %v2127_v41 }
 0x3b9   : > { %2539 = vst [vmem:[#allocation1 + $0x2] ss:$9 sm:$0xff] %v2281_v35  ;;  %v2060_v44 = vmul.f32 0.1, %v2005_v40  ;;  %v1769_v39 = vmul.f32 0.100097656, %v1737_v32  ;;  %v1770_v41 = vmul.f32 0.100097656, %v1738_v33 }
 0x3ba   : > { %2541 = vst [vmem:[#allocation1 + $0x3] ss:$9 sm:$0xff] %v2282_v36  ;;  %v2147_v48 = vpop.xlane.xlu1 %2146 }
 0x3bb   : > { %2543 = vst [vmem:[#allocation1 + $0x4] ss:$9 sm:$0xff] %v2283_v38  ;;  %v2092_v47 = vmax.f32 %v2005_v40, %v2060_v44  ;;  %v2216_v15 = vadd.f32 %v4216_v28, %v2147_v48 }
 0x3bc   : > { %2545 = vst [vmem:[#allocation1 + $0x5] ss:$9 sm:$0xff] %v2284_v42 }
 0x3bd   : > { %2547 = vst [vmem:[#allocation1 + $0x6] ss:$9 sm:$0xff] %v2285_v43  ;;  %v2128_v49 = vmul.f32 %v4174_v5, %v2092_v47  ;;  %v2287_v50 = vperm.slane %v2216_v15, 0  ;;  %v2288_v51 = vperm.slane %v2216_v15, 1  ;;  %v2289_v52 = vperm.slane %v2216_v15, 2 }
 0x3be   : > { %2549 = vst [vmem:[#allocation1 + $0x7] ss:$9 sm:$0xff] %v2286_v45  ;;  %v2290_v54 = vperm.slane %v2216_v15, 3  ;;  %v2291_v56 = vperm.slane %v2216_v15, 4  ;;  %v2292_v57 = vperm.slane %v2216_v15, 5  ;;  %v2293_v58 = vperm.slane %v2216_v15, 6  ;;  %v2006_v11 = vpop.f32.mrf.mxu0 }
 0x3bf   : > { %2176 = vadd.xlane.f32.xlu1 %v2128_v49  ;;  %v2294_v59 = vperm.slane %v2216_v15, 7  ;;  %v2007_v13 = vadd.f32 %v4166_v55, %v2006_v11  ;;  %v1865_v15 = vmax.f32 %v1737_v32, %v1769_v39  ;;  %v1866_v49 = vmax.f32 %v1738_v33, %v1770_v41 }
 0x3c1   : > { %v2061_v21 = vmul.f32 0.1, %v2007_v13 }
 0x3c2   : > { %v2149_v60 = vpop.xlane.xlu1 %2148 }
 0x3c3   : > { %v2217_v61 = vadd.f32 %v4216_v28, %v2149_v60  ;;  %v2093_v29 = vmax.f32 %v2007_v13, %v2061_v21 }
 0x3c5   : > { %v2550_v53 = vld [vmem:[#allocation1] sm:$0xff]  ;;  %v2295_v62 = vperm.slane %v2217_v61, 0  ;;  %v2296_v63 = vperm.slane %v2217_v61, 1  ;;  %v2297_v46 = vperm.slane %v2217_v61, 2  ;;  %v2298_v1 = vperm.slane %v2217_v61, 3 }
 0x3c6   : > { %2551 = vst [vmem:[#allocation1] ss:$9 sm:$0xff] %v2287_v50  ;;  %v2299_v2 = vperm.slane %v2217_v61, 4  ;;  %v2300_v3 = vperm.slane %v2217_v61, 5  ;;  %v2301_v4 = vperm.slane %v2217_v61, 6  ;;  %v2302_v6 = vperm.slane %v2217_v61, 7  ;;  %v2009_v34 = vpop.f32.mrf.mxu0 }
 0x3c7   : > { %2552 = vst [vmem:[#allocation1 + $0x1] ss:$9 sm:$0xff] %v2288_v51  ;;  %2831 = vperm.xlu2 %3498, %v2550_v53   ;;  %v2129_v35 = vmul.f32 %v4174_v5, %v2093_v29  ;;  %v2010_v38 = vadd.f32 %v4166_v55, %v2009_v34  ;;  %v1884_v53 = vpack.c.bf16 %v1866_v49, %v1865_v15 }
 0x3c8   : > { %2553 = vst [vmem:[#allocation1 + $0x2] ss:$9 sm:$0xff] %v2289_v52 }
 0x3c9   : > { %2554 = vst [vmem:[#allocation1 + $0x3] ss:$9 sm:$0xff] %v2290_v54  ;;  %v2062_v47 = vmul.f32 0.1, %v2010_v38  ;;  %2028 = vmatmul.bf16.gmra.mxu0 %v1884_v53 }
 0x3ca   : > { %2555 = vst [vmem:[#allocation1 + $0x4] ss:$9 sm:$0xff] %v2291_v56  ;;  %v2151_v7 = vpop.xlane.xlu2 %2150 }
 0x3cb   : > { %2556 = vst [vmem:[#allocation1 + $0x5] ss:$9 sm:$0xff] %v2292_v57  ;;  %v2218_v9 = vadd.f32 %v4216_v28, %v2151_v7  ;;  %v2094_v52 = vmax.f32 %v2010_v38, %v2062_v47  ;;  %v1669_v57 = vpop.f32.mrf.mxu3 }
 0x3cc   : > { %2557 = vst [vmem:[#allocation1 + $0x6] ss:$9 sm:$0xff] %v2293_v58 }
 0x3cd   : > { %2558 = vst [vmem:[#allocation1 + $0x7] ss:$9 sm:$0xff] %v2294_v59  ;;  %v2303_v12 = vperm.slane %v2218_v9, 0  ;;  %v2304_v8 = vperm.slane %v2218_v9, 1  ;;  %v2305_v14 = vperm.slane %v2218_v9, 2  ;;  %v2306_v17 = vperm.slane %v2218_v9, 3 }
 0x3ce   : > { %v2307_v18 = vperm.slane %v2218_v9, 4  ;;  %v2308_v19 = vperm.slane %v2218_v9, 5  ;;  %v2309_v22 = vperm.slane %v2218_v9, 6  ;;  %v2310_v23 = vperm.slane %v2218_v9, 7  ;;  %v2011_v54 = vpop.f32.mrf.mxu0 }
 0x3cf   : > { %v2130_v58 = vmul.f32 %v4174_v5, %v2094_v52  ;;  %v2012_v61 = vadd.f32 %v4166_v55, %v2011_v54 }
 0x3d1   : > { %v2063_v7 = vmul.f32 0.1, %v2012_v61 }
 0x3d2   : > { %v2153_v25 = vpop.xlane.xlu2 %2152 }
 0x3d3   : > { %v2219_v31 = vadd.f32 %v4216_v28, %v2153_v25  ;;  %v1671_v11 = vpop.f32.mrf.mxu3 }
 0x3d4   : > { %v2559_v0 = vld [vmem:[#allocation1] sm:$0xff] }
 0x3d5   : > { %2560 = vst [vmem:[#allocation1] ss:$9 sm:$0xff] %v2295_v62  ;;  %2834 = vperm.xlu0 %3497, %v2559_v0   ;;  %v2311_v36 = vperm.slane %v2219_v31, 0  ;;  %v2312_v37 = vperm.slane %v2219_v31, 1  ;;  %v2313_v40 = vperm.slane %v2219_v31, 2  ;;  %v2314_v43 = vperm.slane %v2219_v31, 3 }
 0x3d6   : > { %2561 = vst [vmem:[#allocation1 + $0x1] ss:$9 sm:$0xff] %v2296_v63  ;;  %v2315_v44 = vperm.slane %v2219_v31, 4  ;;  %v2316_v45 = vperm.slane %v2219_v31, 5  ;;  %v2317_v48 = vperm.slane %v2219_v31, 6  ;;  %v2318_v50 = vperm.slane %v2219_v31, 7 }
 0x3d7   : > { %2562 = vst [vmem:[#allocation1 + $0x2] ss:$9 sm:$0xff] %v2297_v46 }
 0x3d8   : > { %2563 = vst [vmem:[#allocation1 + $0x3] ss:$9 sm:$0xff] %v2298_v1  ;;  %v2014_v1 = vpop.f32.mrf.mxu0 }
 0x3d9   : > { %2564 = vst [vmem:[#allocation1 + $0x4] ss:$9 sm:$0xff] %v2299_v2 }
 0x3da   : > { %2565 = vst [vmem:[#allocation1 + $0x5] ss:$9 sm:$0xff] %v2300_v3  ;;  %v2155_v51 = vpop.xlane.xlu1 %2154  ;;  %v2015_v3 = vadd.f32 %v4166_v55, %v2014_v1 }
 0x3db   : > { %2566 = vst [vmem:[#allocation1 + $0x6] ss:$9 sm:$0xff] %v2301_v4  ;;  %v2220_v56 = vadd.f32 %v4216_v28, %v2155_v51  ;;  %v4242_v4 = vld [vmem:[%s4508_s8] ss:$0 sm:$0xff] }
 0x3dc   : > { %2567 = vst [vmem:[#allocation1 + $0x7] ss:$9 sm:$0xff] %v2302_v6  ;;  %v1670_v6 = vadd.f32 %v4242_v4, %v1669_v57  ;;  %v2064_v13 = vmul.f32 0.1, %v2015_v3 }
 0x3dd   : > { %v2319_v59 = vperm.slane %v2220_v56, 0  ;;  %v2320_v60 = vperm.slane %v2220_v56, 1  ;;  %v2321_v62 = vperm.slane %v2220_v56, 2  ;;  %v2322_v46 = vperm.slane %v2220_v56, 3 }
 0x3de   : > { %v2323_v0 = vperm.slane %v2220_v56, 4  ;;  %v2324_v2 = vperm.slane %v2220_v56, 5  ;;  %v2325_v9 = vperm.slane %v2220_v56, 6  ;;  %v2326_v10 = vperm.slane %v2220_v56, 7 }
 0x3e0   : > { %v2016_v47 = vpop.f32.mrf.mxu0 }
 0x3e3   : > { %v2568_v16 = vld [vmem:[#allocation1] sm:$0xff] }
 0x3e4   : > { %2569 = vst [vmem:[#allocation1] ss:$9 sm:$0xff] %v2303_v12  ;;  %2837 = vperm.xlu1 %3499, %v2568_v16   ;;  %v2157_v12 = vpop.xlane.xlu2 %2156  ;;  %v2095_v16 = vmax.f32 %v2012_v61, %v2063_v7  ;;  %v2017_v7 = vadd.f32 %v4166_v55, %v2016_v47 }
 0x3e5   : > { %2570 = vst [vmem:[#allocation1 + $0x1] ss:$9 sm:$0xff] %v2304_v8  ;;  %v1672_v8 = vadd.f32 %v4242_v4, %v1671_v11 }
 0x3e6   : > { %2571 = vst [vmem:[#allocation1 + $0x2] ss:$9 sm:$0xff] %v2305_v14  ;;  %v1707_v14 = vpack.c.bf16 %v1670_v6, %v1670_v6 }
 0x3e7   : > { %2572 = vst [vmem:[#allocation1 + $0x3] ss:$9 sm:$0xff] %v2306_v17  ;;  %v1708_v17 = vpack.c.bf16 %v1672_v8, %v1672_v8 }
 0x3e8   : > { %2573 = vst [vmem:[#allocation1 + $0x4] ss:$9 sm:$0xff] %v2307_v18  ;;  %v2221_v18 = vadd.f32 %v4216_v28, %v2157_v12  ;;  %v1739_v20 = vunpack.c.l.bf16 %v1707_v14  ;;  %v2019_v52 = vpop.f32.mrf.mxu0  ;;  %v2065_v12 = vmul.f32 0.1, %v2017_v7 }
 0x3e9   : > { %2574 = vst [vmem:[#allocation1 + $0x5] ss:$9 sm:$0xff] %v2308_v19  ;;  %v2096_v19 = vmax.f32 %v2015_v3, %v2064_v13  ;;  %v1740_v21 = vunpack.c.l.bf16 %v1708_v17  ;;  %v2020_v54 = vadd.f32 %v4166_v55, %v2019_v52 }
 0x3ea   : > { %2575 = vst [vmem:[#allocation1 + $0x6] ss:$9 sm:$0xff] %v2309_v22  ;;  %v2131_v22 = vmul.f32 %v4174_v5, %v2095_v16  ;;  %v2328_v24 = vperm.slane %v2221_v18, 1  ;;  %v2329_v25 = vperm.slane %v2221_v18, 2  ;;  %v1771_v26 = vmul.f32 0.100097656, %v1739_v20  ;;  %v2159_v38 = vpop.xlane.xlu1 %2158 }
 0x3eb   : > { %2576 = vst [vmem:[#allocation1 + $0x7] ss:$9 sm:$0xff] %v2310_v23  ;;  %v2327_v23 = vperm.slane %v2221_v18, 0  ;;  %v1772_v27 = vmul.f32 0.100097656, %v1740_v21  ;;  %v2132_v29 = vmul.f32 %v4174_v5, %v2096_v19  ;;  %v2330_v31 = vperm.slane %v2221_v18, 3 }
 0x3ec   : > { %v2331_v32 = vperm.slane %v2221_v18, 4  ;;  %v2332_v33 = vperm.slane %v2221_v18, 5  ;;  %v2333_v34 = vperm.slane %v2221_v18, 6  ;;  %v2222_v39 = vadd.f32 %v4216_v28, %v2159_v38 }
 0x3ed   : > { %v2066_v57 = vmul.f32 0.1, %v2020_v54 }
 0x3ee   : > { %v2335_v41 = vperm.slane %v2222_v39, 0  ;;  %v2339_v15 = vperm.slane %v2222_v39, 4  ;;  %v2341_v49 = vperm.slane %v2222_v39, 6 }
 0x3f0   : > { %2178 = vadd.xlane.f32.xlu2 %v2129_v35  ;;  %v1867_v35 = vmax.f32 %v1739_v20, %v1771_v26 }
 0x3f2   : > { %v4231_v42 = vld [vmem:[#allocation1] sm:$0xff]  ;;  %v2161_v51 = vpop.xlane.xlu2 %2160 }
 0x3f3   : > { %2578 = vst [vmem:[#allocation1] ss:$9 sm:$0xff] %v2311_v36  ;;  %v1868_v36 = vmax.f32 %v1740_v21, %v1772_v27  ;;  %v2223_v53 = vadd.f32 %v4216_v28, %v2161_v51 }
 0x3f4   : > { %2579 = vst [vmem:[#allocation1 + $0x1] ss:$9 sm:$0xff] %v2312_v37  ;;  %v2334_v37 = vperm.slane %v2221_v18, 7  ;;  %v2097_v18 = vmax.f32 %v2017_v7, %v2065_v12 }
 0x3f5   : > { %2580 = vst [vmem:[#allocation1 + $0x2] ss:$9 sm:$0xff] %v2313_v40  ;;  %v1885_v40 = vpack.c.bf16 %v1868_v36, %v1867_v35  ;;  %v2343_v56 = vperm.slane %v2223_v53, 0  ;;  %v2346_v61 = vperm.slane %v2223_v53, 3  ;;  %v2349_v1 = vperm.slane %v2223_v53, 6 }
 0x3f6   : > { %2581 = vst [vmem:[#allocation1 + $0x3] ss:$9 sm:$0xff] %v2314_v43  ;;  %v2336_v43 = vperm.slane %v2222_v39, 1 }
 0x3f7   : > { %2582 = vst [vmem:[#allocation1 + $0x4] ss:$9 sm:$0xff] %v2315_v44  ;;  %2033 = vmatmul.bf16.gmra.mxu0 %v1885_v40  ;;  %v2337_v44 = vperm.slane %v2222_v39, 2 }
 0x3f8   : > { %2583 = vst [vmem:[#allocation1 + $0x5] ss:$9 sm:$0xff] %v2316_v45  ;;  %2184 = vadd.xlane.f32.xlu2 %v2132_v29 }
 0x3f9   : > { %2584 = vst [vmem:[#allocation1 + $0x6] ss:$9 sm:$0xff] %v2317_v48  ;;  %v2338_v48 = vperm.slane %v2222_v39, 3 }
 0x3fa   : > { %2585 = vst [vmem:[#allocation1 + $0x7] ss:$9 sm:$0xff] %v2318_v50  ;;  %v2342_v50 = vperm.slane %v2222_v39, 7  ;;  %v2163_v3 = vpop.xlane.xlu1 %2162 }
 0x3fb   : > { %v2224_v6 = vadd.f32 %v4216_v28, %v2163_v3 }
 0x3fd   : > { %v2353_v11 = vperm.slane %v2224_v6, 2  ;;  %v2354_v13 = vperm.slane %v2224_v6, 3  ;;  %v2355_v14 = vperm.slane %v2224_v6, 4  ;;  %v2356_v16 = vperm.slane %v2224_v6, 5 }
 0x3fe   : > { %v2357_v17 = vperm.slane %v2224_v6, 6  ;;  %v2358_v19 = vperm.slane %v2224_v6, 7 }
 0x3ff   : > { %2180 = vadd.xlane.f32.xlu0 %v2130_v58  ;;  %v2344_v58 = vperm.slane %v2223_v53, 1 }
 0x401   : > { %v4236_v63 = vld [vmem:[#allocation1] sm:$0xff] }
 0x402   : > { %2587 = vst [vmem:[#allocation1] ss:$9 sm:$0xff] %v2319_v59  ;;  %v2345_v59 = vperm.slane %v2223_v53, 2  ;;  %v2165_v20 = vpop.xlane.xlu2 %2164 }
 0x403   : > { %2588 = vst [vmem:[#allocation1 + $0x1] ss:$9 sm:$0xff] %v2320_v60  ;;  %v2225_v21 = vadd.f32 %v4216_v28, %v2165_v20 }
 0x404   : > { %2589 = vst [vmem:[#allocation1 + $0x2] ss:$9 sm:$0xff] %v2321_v62  ;;  %v2347_v62 = vperm.slane %v2223_v53, 4 }
 0x405   : > { %2590 = vst [vmem:[#allocation1 + $0x3] ss:$9 sm:$0xff] %v2322_v46  ;;  %v2098_v46 = vmax.f32 %v2020_v54, %v2066_v57  ;;  %v2361_v26 = vperm.slane %v2225_v21, 2  ;;  %v2366_v36 = vperm.slane %v2225_v21, 7 }
 0x406   : > { %2591 = vst [vmem:[#allocation1 + $0x4] ss:$9 sm:$0xff] %v2323_v0  ;;  %v2348_v0 = vperm.slane %v2223_v53, 5 }
 0x407   : > { %2592 = vst [vmem:[#allocation1 + $0x5] ss:$9 sm:$0xff] %v2324_v2  ;;  %v2350_v2 = vperm.slane %v2223_v53, 7  ;;  %v1674_v53 = vpop.f32.mrf.mxu3 }
 0x408   : > { %2593 = vst [vmem:[#allocation1 + $0x6] ss:$9 sm:$0xff] %v2325_v9  ;;  %v2351_v9 = vperm.slane %v2224_v6, 0 }
 0x409   : > { %2594 = vst [vmem:[#allocation1 + $0x7] ss:$9 sm:$0xff] %v2326_v10  ;;  %v2352_v10 = vperm.slane %v2224_v6, 1 }
 0x40e   : > { %2182 = vadd.xlane.f32.xlu1 %v2131_v22  ;;  %v2133_v22 = vmul.f32 %v4174_v5, %v2097_v18 }
 0x410   : > { %v4249_v30 = vld [vmem:[#allocation1] sm:$0xff]  ;;  %2843 = vperm.xlu2 %3498, %v4236_v63   ;;  %v2134_v63 = vmul.f32 %v4174_v5, %v2098_v46 }
 0x411   : > { %2596 = vst [vmem:[#allocation1] ss:$9 sm:$0xff] %v2327_v23  ;;  %v2021_v23 = vpop.f32.mrf.mxu0 }
 0x412   : > { %2597 = vst [vmem:[#allocation1 + $0x1] ss:$9 sm:$0xff] %v2328_v24  ;;  %v2359_v24 = vperm.slane %v2225_v21, 0  ;;  %v2022_v27 = vadd.f32 %v4166_v55, %v2021_v23 }
 0x413   : > { %2598 = vst [vmem:[#allocation1 + $0x2] ss:$9 sm:$0xff] %v2329_v25  ;;  %2840 = vperm.xlu0 %3497, %v4231_v42   ;;  %v2340_v42 = vperm.slane %v2222_v39, 5  ;;  %v2360_v25 = vperm.slane %v2225_v21, 1 }
 0x414   : > { %2599 = vst [vmem:[#allocation1 + $0x3] ss:$9 sm:$0xff] %v2330_v31  ;;  %v2362_v31 = vperm.slane %v2225_v21, 3  ;;  %v2067_v35 = vmul.f32 0.1, %v2022_v27 }
 0x415   : > { %2600 = vst [vmem:[#allocation1 + $0x4] ss:$9 sm:$0xff] %v2331_v32  ;;  %v2363_v32 = vperm.slane %v2225_v21, 4 }
 0x416   : > { %2601 = vst [vmem:[#allocation1 + $0x5] ss:$9 sm:$0xff] %v2332_v33  ;;  %2188 = vadd.xlane.f32.xlu1 %v2134_v63  ;;  %v2364_v33 = vperm.slane %v2225_v21, 5  ;;  %v2099_v38 = vmax.f32 %v2022_v27, %v2067_v35 }
 0x417   : > { %2602 = vst [vmem:[#allocation1 + $0x6] ss:$9 sm:$0xff] %v2333_v34  ;;  %v2365_v34 = vperm.slane %v2225_v21, 6 }
 0x418   : > { %2603 = vst [vmem:[#allocation1 + $0x7] ss:$9 sm:$0xff] %v2334_v37  ;;  %v2167_v37 = vpop.xlane.xlu1 %2166  ;;  %v2135_v39 = vmul.f32 %v4174_v5, %v2099_v38 }
 0x419   : > { %v2226_v55 = vadd.f32 %v4216_v28, %v2167_v37  ;;  %v2024_v18 = vpop.f32.mrf.mxu0 }
 0x41b   : > { %v2367_v40 = vperm.slane %v2226_v55, 0  ;;  %v2371_v47 = vperm.slane %v2226_v55, 4 }
 0x41f   : > { %v2604_v45 = vld [vmem:[#allocation1] sm:$0xff] }
 0x420   : > { %2605 = vst [vmem:[#allocation1] ss:$9 sm:$0xff] %v2335_v41  ;;  %2849 = vperm.xlu2 %3498, %v2604_v45   ;;  %v2368_v41 = vperm.slane %v2226_v55, 1  ;;  %v2370_v45 = vperm.slane %v2226_v55, 3 }
 0x421   : > { %2606 = vst [vmem:[#allocation1 + $0x1] ss:$9 sm:$0xff] %v2336_v43  ;;  %v2369_v43 = vperm.slane %v2226_v55, 2  ;;  %v2026_v37 = vpop.f32.mrf.mxu0 }
 0x422   : > { %2607 = vst [vmem:[#allocation1 + $0x2] ss:$9 sm:$0xff] %v2337_v44 }
 0x423   : > { %2608 = vst [vmem:[#allocation1 + $0x3] ss:$9 sm:$0xff] %v2338_v48  ;;  %v2372_v48 = vperm.slane %v2226_v55, 5 }
 0x424   : > { %2609 = vst [vmem:[#allocation1 + $0x4] ss:$9 sm:$0xff] %v2339_v15  ;;  %v2373_v15 = vperm.slane %v2226_v55, 6 }
 0x425   : > { %2610 = vst [vmem:[#allocation1 + $0x5] ss:$9 sm:$0xff] %v2340_v42  ;;  %v2374_v42 = vperm.slane %v2226_v55, 7  ;;  %v2926_v55 = vlaneseq }
 0x426   : > { %2611 = vst [vmem:[#allocation1 + $0x6] ss:$9 sm:$0xff] %v2341_v49  ;;  %v2169_v49 = vpop.xlane.xlu2 %2168 }
 0x427   : > { %2612 = vst [vmem:[#allocation1 + $0x7] ss:$9 sm:$0xff] %v2342_v50  ;;  %v2227_v5 = vadd.f32 %v4216_v28, %v2169_v49  ;;  %v4294_v49 = vld [vmem:[%s4536_s17] ss:$0 sm:$0xff] }
 0x429   : > { %v2375_v50 = vperm.slane %v2227_v5, 0  ;;  %v2376_v51 = vperm.slane %v2227_v5, 1  ;;  %v2377_v52 = vperm.slane %v2227_v5, 2  ;;  %v2378_v54 = vperm.slane %v2227_v5, 3 }
 0x42a   : > { %v2380_v57 = vperm.slane %v2227_v5, 5 }
 0x42e   : > { %v2613_v60 = vld [vmem:[#allocation1] sm:$0xff] }
 0x42f   : > { %2614 = vst [vmem:[#allocation1] ss:$9 sm:$0xff] %v2343_v56  ;;  %2852 = vperm.xlu1 %3499, %v2613_v60   ;;  %v2379_v56 = vperm.slane %v2227_v5, 4  ;;  %v2171_v60 = vpop.xlane.xlu1 %2170 }
 0x430   : > { %2615 = vst [vmem:[#allocation1 + $0x1] ss:$9 sm:$0xff] %v2344_v58  ;;  %v2381_v58 = vperm.slane %v2227_v5, 6 }
 0x431   : > { %2616 = vst [vmem:[#allocation1 + $0x2] ss:$9 sm:$0xff] %v2345_v59  ;;  %v2382_v59 = vperm.slane %v2227_v5, 7 }
 0x432   : > { %2617 = vst [vmem:[#allocation1 + $0x3] ss:$9 sm:$0xff] %v2346_v61  ;;  %v2228_v61 = vadd.f32 %v4216_v28, %v2171_v60 }
 0x433   : > { %2618 = vst [vmem:[#allocation1 + $0x4] ss:$9 sm:$0xff] %v2347_v62  ;;  %v1676_v62 = vpop.f32.mrf.mxu3 }
 0x434   : > { %2619 = vst [vmem:[#allocation1 + $0x5] ss:$9 sm:$0xff] %v2348_v0  ;;  %v2383_v46 = vperm.slane %v2228_v61, 0  ;;  %v1675_v0 = vadd.f32 %v4242_v4, %v1674_v53  ;;  %v2385_v3 = vperm.slane %v2228_v61, 2  ;;  %v2386_v6 = vperm.slane %v2228_v61, 3 }
 0x435   : > { %2620 = vst [vmem:[#allocation1 + $0x6] ss:$9 sm:$0xff] %v2349_v1  ;;  %v1677_v1 = vadd.f32 %v4242_v4, %v1676_v62  ;;  %v2387_v7 = vperm.slane %v2228_v61, 4  ;;  %v2389_v12 = vperm.slane %v2228_v61, 6 }
 0x436   : > { %2621 = vst [vmem:[#allocation1 + $0x7] ss:$9 sm:$0xff] %v2350_v2  ;;  %v2384_v2 = vperm.slane %v2228_v61, 1 }
 0x43d   : > { %v4259_v8 = vld [vmem:[#allocation1] sm:$0xff]  ;;  %2186 = vadd.xlane.f32.xlu0 %v2133_v22 }
 0x43e   : > { %2623 = vst [vmem:[#allocation1] ss:$9 sm:$0xff] %v2351_v9  ;;  %v1709_v9 = vpack.c.bf16 %v1675_v0, %v1675_v0 }
 0x43f   : > { %2624 = vst [vmem:[#allocation1 + $0x1] ss:$9 sm:$0xff] %v2352_v10  ;;  %v1710_v10 = vpack.c.bf16 %v1677_v1, %v1677_v1 }
 0x440   : > { %2625 = vst [vmem:[#allocation1 + $0x2] ss:$9 sm:$0xff] %v2353_v11  ;;  %v2388_v11 = vperm.slane %v2228_v61, 5 }
 0x441   : > { %2626 = vst [vmem:[#allocation1 + $0x3] ss:$9 sm:$0xff] %v2354_v13  ;;  %v2390_v13 = vperm.slane %v2228_v61, 7 }
 0x442   : > { %2627 = vst [vmem:[#allocation1 + $0x4] ss:$9 sm:$0xff] %v2355_v14  ;;  %v1741_v14 = vunpack.c.l.bf16 %v1709_v9 }
 0x443   : > { %2628 = vst [vmem:[#allocation1 + $0x5] ss:$9 sm:$0xff] %v2356_v16  ;;  %v2173_v16 = vpop.xlane.xlu2 %2172 }
 0x444   : > { %2629 = vst [vmem:[#allocation1 + $0x6] ss:$9 sm:$0xff] %v2357_v17  ;;  %v1742_v17 = vunpack.c.l.bf16 %v1710_v10  ;;  %v2229_v4 = vadd.f32 %v4216_v28, %v2173_v16 }
 0x445   : > { %2630 = vst [vmem:[#allocation1 + $0x7] ss:$9 sm:$0xff] %v2358_v19  ;;  %v1773_v19 = vmul.f32 0.100097656, %v1741_v14 }
 0x446   : > { %v1774_v20 = vmul.f32 0.100097656, %v1742_v17  ;;  %v2391_v21 = vperm.slane %v2229_v4, 0  ;;  %v2392_v23 = vperm.slane %v2229_v4, 1  ;;  %v2393_v27 = vperm.slane %v2229_v4, 2 }
 0x447   : > { %v1869_v22 = vmax.f32 %v1741_v14, %v1773_v19  ;;  %v2398_v38 = vperm.slane %v2229_v4, 7 }
 0x449   : > { %2190 = vadd.xlane.f32.xlu2 %v2135_v39 }
 0x44c   : > { %v2631_v29 = vld [vmem:[#allocation1] sm:$0xff] }
 0x44d   : > { %2632 = vst [vmem:[#allocation1] ss:$9 sm:$0xff] %v2359_v24  ;;  %v1870_v24 = vmax.f32 %v1742_v17, %v1774_v20 }
 0x44e   : > { %2633 = vst [vmem:[#allocation1 + $0x1] ss:$9 sm:$0xff] %v2360_v25  ;;  %v4281_v25 = vld [vmem:[%s4510_s10] ss:$0 sm:$0xff] }
 0x44f   : > { %2634 = vst [vmem:[#allocation1 + $0x2] ss:$9 sm:$0xff] %v2361_v26  ;;  %v2025_v26 = vadd.f32 %v4281_v25, %v2024_v18  ;;  %v1886_v35 = vpack.c.bf16 %v1870_v24, %v1869_v22  ;;  %v2027_v39 = vadd.f32 %v4281_v25, %v2026_v37 }
 0x450   : > { %2635 = vst [vmem:[#allocation1 + $0x3] ss:$9 sm:$0xff] %v2362_v31  ;;  %v2394_v31 = vperm.slane %v2229_v4, 3 }
 0x451   : > { %2636 = vst [vmem:[#allocation1 + $0x4] ss:$9 sm:$0xff] %v2363_v32  ;;  %2846 = vperm.xlu0 %3497, %v4249_v30   ;;  %v2395_v32 = vperm.slane %v2229_v4, 4  ;;  %2038 = vmatmul.bf16.gmra.mxu0 %v1886_v35 }
 0x452   : > { %2637 = vst [vmem:[#allocation1 + $0x5] ss:$9 sm:$0xff] %v2364_v33  ;;  %v2396_v33 = vperm.slane %v2229_v4, 5 }
 0x453   : > { %2638 = vst [vmem:[#allocation1 + $0x6] ss:$9 sm:$0xff] %v2365_v34  ;;  %v2068_v34 = vmul.f32 0.1, %v2025_v26 }
 0x454   : > { %2639 = vst [vmem:[#allocation1 + $0x7] ss:$9 sm:$0xff] %v2366_v36  ;;  %v2397_v36 = vperm.slane %v2229_v4, 6 }
 0x45b   : > { %v4266_v44 = vld [vmem:[#allocation1] sm:$0xff] }
 0x45c   : > { %2641 = vst [vmem:[#allocation1] ss:$9 sm:$0xff] %v2367_v40  ;;  %v2175_v40 = vpop.xlane.xlu0 %2174 }
 0x45d   : > { %2642 = vst [vmem:[#allocation1 + $0x1] ss:$9 sm:$0xff] %v2368_v41  ;;  %v2177_v41 = vpop.xlane.xlu1 %2176 }
 0x45e   : > { %2643 = vst [vmem:[#allocation1 + $0x2] ss:$9 sm:$0xff] %v2369_v43  ;;  %v2100_v43 = vmax.f32 %v2025_v26, %v2068_v34  ;;  %v2231_v9 = vadd.f32 %v4216_v28, %v2177_v41 }
 0x45f   : > { %2644 = vst [vmem:[#allocation1 + $0x3] ss:$9 sm:$0xff] %v2370_v45  ;;  %v2069_v45 = vmul.f32 0.1, %v2027_v39 }
 0x460   : > { %2645 = vst [vmem:[#allocation1 + $0x4] ss:$9 sm:$0xff] %v2371_v47  ;;  %v4288_v47 = vand.u32 127, %v2926_v55  ;;  %v2407_v10 = vperm.slane %v2231_v9, 0  ;;  %v2410_v14 = vperm.slane %v2231_v9, 3  ;;  %v2411_v16 = vperm.slane %v2231_v9, 4 }
 0x461   : > { %2646 = vst [vmem:[#allocation1 + $0x5] ss:$9 sm:$0xff] %v2372_v48  ;;  %2858 = vperm.xlu2 %3498, %v2631_v29   ;;  %v2230_v48 = vadd.f32 %v4216_v28, %v2175_v40  ;;  %v2412_v17 = vperm.slane %v2231_v9, 5  ;;  %v2413_v4 = vperm.slane %v2231_v9, 6  ;;  %v2414_v18 = vperm.slane %v2231_v9, 7 }
 0x462   : > { %2647 = vst [vmem:[#allocation1 + $0x6] ss:$9 sm:$0xff] %v2373_v15  ;;  %v2101_v15 = vmax.f32 %v2027_v39, %v2069_v45 }
 0x463   : > { %2648 = vst [vmem:[#allocation1 + $0x7] ss:$9 sm:$0xff] %v2374_v42  ;;  %v2832_v42 = vpop.permute.xlu2 %2831  ;;  %v2399_v53 = vperm.slane %v2230_v48, 0  ;;  %v2401_v60 = vperm.slane %v2230_v48, 2  ;;  %v2402_v62 = vperm.slane %v2230_v48, 3  ;;  %v2403_v1 = vperm.slane %v2230_v48, 4 }
 0x464   : > { %v2137_v5 = vmul.f32 %v4294_v49, %v2101_v15 }
 0x466   : > { %2194 = vadd.xlane.f32.xlu1 %v2137_v5 }
 0x46a   : > { %v4270_v30 = vld [vmem:[#allocation1] sm:$0xff] }
 0x46b   : > { %2650 = vst [vmem:[#allocation1] ss:$9 sm:$0xff] %v2375_v50  ;;  %v2136_v50 = vmul.f32 %v4294_v49, %v2100_v43  ;;  %v2179_v19 = vpop.xlane.xlu2 %2178 }
 0x46c   : > { %2651 = vst [vmem:[#allocation1 + $0x1] ss:$9 sm:$0xff] %v2376_v51  ;;  %v4299_v51 = vadd.s32 4294967288, %v4288_v47  ;;  %v2232_v20 = vadd.f32 %v4216_v28, %v2179_v19 }
 0x46d   : > { %2652 = vst [vmem:[#allocation1 + $0x2] ss:$9 sm:$0xff] %v2377_v52  ;;  %v2928_v52 = vperm.slane %v2832_v42, %v4288_v47 }
 0x46e   : > { %2653 = vst [vmem:[#allocation1 + $0x3] ss:$9 sm:$0xff] %v2378_v54  ;;  %v2835_v54 = vpop.permute.xlu0 %2834  ;;  %v2416_v22 = vperm.slane %v2232_v20, 1  ;;  %v2418_v26 = vperm.slane %v2232_v20, 3 }
 0x46f   : > { %2654 = vst [vmem:[#allocation1 + $0x4] ss:$9 sm:$0xff] %v2379_v56  ;;  %v2400_v56 = vperm.slane %v2230_v48, 1 }
 0x470   : > { %2655 = vst [vmem:[#allocation1 + $0x5] ss:$9 sm:$0xff] %v2380_v57  ;;  %v2930_v57 = vperm.slane %v2835_v54, %v4299_v51 }
 0x471   : > { %2656 = vst [vmem:[#allocation1 + $0x6] ss:$9 sm:$0xff] %v2381_v58  ;;  %v4304_v58 = vadd.s32 4294967280, %v4288_v47 }
 0x472   : > { %2657 = vst [vmem:[#allocation1 + $0x7] ss:$9 sm:$0xff] %v2382_v59  ;;  %v2838_v59 = vpop.permute.xlu1 %2837 }
 0x473   : > { %v2934_v0 = vperm.slane %v2838_v59, %v4304_v58  ;;  %v2185_v54 = vpop.xlane.xlu2 %2184 }
 0x479   : > { %v4275_v63 = vld [vmem:[#allocation1] sm:$0xff] }
 0x47a   : > { %2659 = vst [vmem:[#allocation1] ss:$9 sm:$0xff] %v2383_v46  ;;  %v2932_v46 = vsel %vm2931_vm0, %v2930_v57, %v2928_v52 }
 0x47b   : > { %2660 = vst [vmem:[#allocation1 + $0x1] ss:$9 sm:$0xff] %v2384_v2  ;;  %2192 = vadd.xlane.f32.xlu0 %v2136_v50  ;;  %v2404_v2 = vperm.slane %v2230_v48, 5 }
 0x47c   : > { %2661 = vst [vmem:[#allocation1 + $0x2] ss:$9 sm:$0xff] %v2385_v3  ;;  %v4311_v3 = vsel %vm2935_vm1, %v2934_v0, %v2932_v46 }
 0x47d   : > { %2662 = vst [vmem:[#allocation1 + $0x3] ss:$9 sm:$0xff] %v2386_v6  ;;  %v2405_v6 = vperm.slane %v2230_v48, 6 }
 0x47e   : > { %2663 = vst [vmem:[#allocation1 + $0x4] ss:$9 sm:$0xff] %v2387_v7  ;;  %v2406_v7 = vperm.slane %v2230_v48, 7 }
 0x47f   : > { %2664 = vst [vmem:[#allocation1 + $0x5] ss:$9 sm:$0xff] %v2388_v11  ;;  %v2408_v11 = vperm.slane %v2231_v9, 1  ;;  %2861 = vperm.xlu1 %3499, %v4266_v44   ;;  %v2181_v44 = vpop.xlane.xlu0 %2180 }
 0x480   : > { %2665 = vst [vmem:[#allocation1 + $0x6] ss:$9 sm:$0xff] %v2389_v12  ;;  %v2409_v12 = vperm.slane %v2231_v9, 2  ;;  %v2233_v34 = vadd.f32 %v4216_v28, %v2181_v44 }
 0x481   : > { %2666 = vst [vmem:[#allocation1 + $0x7] ss:$9 sm:$0xff] %v2390_v13  ;;  %v2183_v52 = vpop.xlane.xlu1 %2182 }
 0x482   : > { %v2423_v37 = vperm.slane %v2233_v34, 0  ;;  %v2424_v40 = vperm.slane %v2233_v34, 1  ;;  %v2425_v43 = vperm.slane %v2233_v34, 2  ;;  %v2426_v45 = vperm.slane %v2233_v34, 3 }
 0x483   : > { %v2427_v48 = vperm.slane %v2233_v34, 4  ;;  %v2428_v15 = vperm.slane %v2233_v34, 5  ;;  %v2429_v50 = vperm.slane %v2233_v34, 6  ;;  %v2234_v57 = vadd.f32 %v4216_v28, %v2183_v52 }
 0x484   : > { %v4357_v52 = vadd.s32 4294967248, %v4288_v47 }
 0x485   : > { %v2432_v0 = vperm.slane %v2234_v57, 1 }
 0x488   : > { %v4284_v29 = vld [vmem:[#allocation1] sm:$0xff] }
 0x489   : > { %2668 = vst [vmem:[#allocation1] ss:$9 sm:$0xff] %v2391_v21  ;;  %v2415_v21 = vperm.slane %v2232_v20, 0 }
 0x48a   : > { %2669 = vst [vmem:[#allocation1 + $0x1] ss:$9 sm:$0xff] %v2392_v23  ;;  %v2417_v23 = vperm.slane %v2232_v20, 2 }
 0x48b   : > { %2670 = vst [vmem:[#allocation1 + $0x2] ss:$9 sm:$0xff] %v2393_v27  ;;  %v2420_v27 = vperm.slane %v2232_v20, 5 }
 0x48c   : > { %2671 = vst [vmem:[#allocation1 + $0x3] ss:$9 sm:$0xff] %v2394_v31  ;;  %v2029_v31 = vpop.f32.mrf.mxu0 }
 0x48d   : > { %2672 = vst [vmem:[#allocation1 + $0x4] ss:$9 sm:$0xff] %v2395_v32  ;;  %v2421_v32 = vperm.slane %v2232_v20, 6  ;;  %v2030_v35 = vadd.f32 %v4281_v25, %v2029_v31 }
 0x48e   : > { %2673 = vst [vmem:[#allocation1 + $0x5] ss:$9 sm:$0xff] %v2396_v33  ;;  %v2422_v33 = vperm.slane %v2232_v20, 7 }
 0x48f   : > { %2674 = vst [vmem:[#allocation1 + $0x6] ss:$9 sm:$0xff] %v2397_v36  ;;  %2855 = vperm.xlu0 %3497, %v4259_v8   ;;  %v2419_v8 = vperm.slane %v2232_v20, 4  ;;  %v2070_v41 = vmul.f32 0.1, %v2030_v35  ;;  %v2437_v20 = vperm.slane %v2234_v57, 6 }
 0x490   : > { %2675 = vst [vmem:[#allocation1 + $0x7] ss:$9 sm:$0xff] %v2398_v38 }
 0x491   : > { %v2102_v5 = vmax.f32 %v2030_v35, %v2070_v41 }
 0x493   : > { %v2138_v59 = vmul.f32 %v4294_v49, %v2102_v5  ;;  %v2189_v5 = vpop.xlane.xlu1 %2188 }
 0x494   : > { %v2031_v36 = vpop.f32.mrf.mxu0 }
 0x495   : > { %v2032_v39 = vadd.f32 %v4281_v25, %v2031_v36  ;;  %2196 = vadd.xlane.f32.xlu2 %v2138_v59 }
 0x497   : > { %v4306_v61 = vld [vmem:[#allocation1] sm:$0xff]  ;;  %v2071_v42 = vmul.f32 0.1, %v2032_v39 }
 0x498   : > { %2677 = vst [vmem:[#allocation1] ss:$9 sm:$0xff] %v2399_v53  ;;  %v2430_v53 = vperm.slane %v2233_v34, 7 }
 0x499   : > { %2678 = vst [vmem:[#allocation1 + $0x1] ss:$9 sm:$0xff] %v2400_v56  ;;  %v2103_v56 = vmax.f32 %v2032_v39, %v2071_v42 }
 0x49a   : > { %2679 = vst [vmem:[#allocation1 + $0x2] ss:$9 sm:$0xff] %v2401_v60  ;;  %v2431_v60 = vperm.slane %v2234_v57, 0 }
 0x49b   : > { %2680 = vst [vmem:[#allocation1 + $0x3] ss:$9 sm:$0xff] %v2402_v62  ;;  %v2139_v46 = vmul.f32 %v4294_v49, %v2103_v56 }
 0x49c   : > { %2681 = vst [vmem:[#allocation1 + $0x4] ss:$9 sm:$0xff] %v2403_v1  ;;  %v2034_v62 = vpop.f32.mrf.mxu0 }
 0x49d   : > { %2682 = vst [vmem:[#allocation1 + $0x5] ss:$9 sm:$0xff] %v2404_v2  ;;  %v2035_v1 = vadd.f32 %v4281_v25, %v2034_v62  ;;  %v4331_v2 = vadd.s32 4294967272, %v4288_v47 }
 0x49e   : > { %2683 = vst [vmem:[#allocation1 + $0x6] ss:$9 sm:$0xff] %v2405_v6  ;;  %v2841_v6 = vpop.permute.xlu0 %2840 }
 0x49f   : > { %2684 = vst [vmem:[#allocation1 + $0x7] ss:$9 sm:$0xff] %v2406_v7  ;;  %v2433_v7 = vperm.slane %v2234_v57, 2 }
 0x4a6   : > { %v4314_v13 = vld [vmem:[#allocation1] sm:$0xff] }
 0x4a7   : > { %2686 = vst [vmem:[#allocation1] ss:$9 sm:$0xff] %v2407_v10  ;;  %v4336_v10 = vadd.s32 4294967264, %v4288_v47 }
 0x4a8   : > { %2687 = vst [vmem:[#allocation1 + $0x1] ss:$9 sm:$0xff] %v2408_v11  ;;  %v2434_v11 = vperm.slane %v2234_v57, 3 }
 0x4a9   : > { %2688 = vst [vmem:[#allocation1 + $0x2] ss:$9 sm:$0xff] %v2409_v12  ;;  %v2072_v12 = vmul.f32 0.1, %v2035_v1 }
 0x4aa   : > { %2689 = vst [vmem:[#allocation1 + $0x3] ss:$9 sm:$0xff] %v2410_v14  ;;  %v2938_v14 = vperm.slane %v2841_v6, %v4331_v2 }
 0x4ab   : > { %2690 = vst [vmem:[#allocation1 + $0x4] ss:$9 sm:$0xff] %v2411_v16  ;;  %v2844_v16 = vpop.permute.xlu2 %2843 }
 0x4ac   : > { %2691 = vst [vmem:[#allocation1 + $0x5] ss:$9 sm:$0xff] %v2412_v17  ;;  %v2435_v17 = vperm.slane %v2234_v57, 4  ;;  %v2940_v19 = vsel %vm2939_vm2, %v2938_v14, %v4311_v3 }
 0x4ad   : > { %2692 = vst [vmem:[#allocation1 + $0x6] ss:$9 sm:$0xff] %v2413_v4  ;;  %v2436_v4 = vperm.slane %v2234_v57, 5  ;;  %2867 = vperm.xlu2 %3498, %v4275_v63  }
 0x4ae   : > { %2693 = vst [vmem:[#allocation1 + $0x7] ss:$9 sm:$0xff] %v2414_v18  ;;  %v2104_v18 = vmax.f32 %v2035_v1, %v2072_v12 }
 0x4b0   : > { %v2187_v36 = vpop.xlane.xlu0 %2186 }
 0x4b5   : > { %v4319_v24 = vld [vmem:[#allocation1] sm:$0xff] }
 0x4b6   : > { %2695 = vst [vmem:[#allocation1] ss:$9 sm:$0xff] %v2415_v21  ;;  %v2942_v21 = vperm.slane %v2844_v16, %v4336_v10 }
 0x4b7   : > { %2696 = vst [vmem:[#allocation1 + $0x1] ss:$9 sm:$0xff] %v2416_v22  ;;  %v2438_v22 = vperm.slane %v2234_v57, 7  ;;  %v2036_v57 = vpop.f32.mrf.mxu0 }
 0x4b8   : > { %2697 = vst [vmem:[#allocation1 + $0x2] ss:$9 sm:$0xff] %v2417_v23  ;;  %v2140_v23 = vmul.f32 %v4294_v49, %v2104_v18  ;;  %v2037_v6 = vadd.f32 %v4281_v25, %v2036_v57 }
 0x4b9   : > { %2698 = vst [vmem:[#allocation1 + $0x3] ss:$9 sm:$0xff] %v2418_v26  ;;  %2198 = vadd.xlane.f32.xlu0 %v2139_v46  ;;  %v4344_v26 = vsel %vm2943_vm3, %v2942_v21, %v2940_v19 }
 0x4ba   : > { %2699 = vst [vmem:[#allocation1 + $0x4] ss:$9 sm:$0xff] %v2419_v8  ;;  %2200 = vadd.xlane.f32.xlu1 %v2140_v23  ;;  %v2235_v8 = vadd.f32 %v4216_v28, %v2185_v54  ;;  %v4360_v54 = vadd.s32 4294967256, %v4288_v47 }
 0x4bb   : > { %2700 = vst [vmem:[#allocation1 + $0x5] ss:$9 sm:$0xff] %v2420_v27 }
 0x4bc   : > { %2701 = vst [vmem:[#allocation1 + $0x6] ss:$9 sm:$0xff] %v2421_v32  ;;  %v2439_v3 = vperm.slane %v2235_v8, 0  ;;  %v2440_v27 = vperm.slane %v2235_v8, 1  ;;  %v2441_v32 = vperm.slane %v2235_v8, 2  ;;  %v2443_v44 = vperm.slane %v2235_v8, 4 }
 0x4bd   : > { %2702 = vst [vmem:[#allocation1 + $0x7] ss:$9 sm:$0xff] %v2422_v33  ;;  %v2442_v33 = vperm.slane %v2235_v8, 3  ;;  %v2444_v34 = vperm.slane %v2235_v8, 5  ;;  %v2445_v35 = vperm.slane %v2235_v8, 6 }
 0x4c4   : > { %v4323_v38 = vld [vmem:[#allocation1] sm:$0xff] }
 0x4c5   : > { %2704 = vst [vmem:[#allocation1] ss:$9 sm:$0xff] %v2423_v37  ;;  %v2446_v37 = vperm.slane %v2235_v8, 7 }
 0x4c6   : > { %2705 = vst [vmem:[#allocation1 + $0x1] ss:$9 sm:$0xff] %v2424_v40  ;;  %v2236_v40 = vadd.f32 %v4216_v28, %v2187_v36 }
 0x4c7   : > { %2706 = vst [vmem:[#allocation1 + $0x2] ss:$9 sm:$0xff] %v2425_v43 }
 0x4c8   : > { %2707 = vst [vmem:[#allocation1 + $0x3] ss:$9 sm:$0xff] %v2426_v45  ;;  %v2447_v39 = vperm.slane %v2236_v40, 0  ;;  %v2448_v41 = vperm.slane %v2236_v40, 1  ;;  %v2449_v43 = vperm.slane %v2236_v40, 2  ;;  %v2453_v63 = vperm.slane %v2236_v40, 6 }
 0x4c9   : > { %2708 = vst [vmem:[#allocation1 + $0x4] ss:$9 sm:$0xff] %v2427_v48  ;;  %v2450_v48 = vperm.slane %v2236_v40, 3  ;;  %v2454_v42 = vperm.slane %v2236_v40, 7 }
 0x4ca   : > { %2709 = vst [vmem:[#allocation1 + $0x5] ss:$9 sm:$0xff] %v2428_v15  ;;  %v2451_v15 = vperm.slane %v2236_v40, 4 }
 0x4cb   : > { %2710 = vst [vmem:[#allocation1 + $0x6] ss:$9 sm:$0xff] %v2429_v50  ;;  %v2237_v50 = vadd.f32 %v4216_v28, %v2189_v5 }
 0x4cc   : > { %2711 = vst [vmem:[#allocation1 + $0x7] ss:$9 sm:$0xff] %v2430_v53  ;;  %v2850_v53 = vpop.permute.xlu2 %2849 }
 0x4cd   : > { %2864 = vperm.xlu0 %3497, %v4270_v30   ;;  %v2452_v30 = vperm.slane %v2236_v40, 5  ;;  %v2455_v56 = vperm.slane %v2237_v50, 0  ;;  %v2456_v59 = vperm.slane %v2237_v50, 1  ;;  %v2950_v46 = vperm.slane %v2850_v53, %v4357_v52 }
 0x4ce   : > { %v2458_v1 = vperm.slane %v2237_v50, 3  ;;  %v2460_v14 = vperm.slane %v2237_v50, 5  ;;  %v2461_v16 = vperm.slane %v2237_v50, 6  ;;  %v2039_v19 = vpop.f32.mrf.mxu0 }
 0x4d3   : > { %v4333_v9 = vld [vmem:[#allocation1] sm:$0xff]  ;;  %2870 = vperm.xlu1 %3499, %v4284_v29   ;;  %v2847_v29 = vpop.permute.xlu0 %2846 }
 0x4d4   : > { %2713 = vst [vmem:[#allocation1] ss:$9 sm:$0xff] %v2431_v60  ;;  %v2946_v62 = vperm.slane %v2847_v29, %v4360_v54  ;;  %v2191_v18 = vpop.xlane.xlu2 %2190 }
 0x4d5   : > { %2714 = vst [vmem:[#allocation1 + $0x1] ss:$9 sm:$0xff] %v2432_v0  ;;  %v2457_v0 = vperm.slane %v2237_v50, 2  ;;  %v2238_v21 = vadd.f32 %v4216_v28, %v2191_v18 }
 0x4d6   : > { %2715 = vst [vmem:[#allocation1 + $0x2] ss:$9 sm:$0xff] %v2433_v7  ;;  %v2948_v7 = vsel %vm2947_vm4, %v2946_v62, %v4344_v26 }
 0x4d7   : > { %2716 = vst [vmem:[#allocation1 + $0x3] ss:$9 sm:$0xff] %v2434_v11  ;;  %v2459_v11 = vperm.slane %v2237_v50, 4  ;;  %v2952_v12 = vsel %vm2951_vm5, %v2950_v46, %v2948_v7  ;;  %v2463_v23 = vperm.slane %v2238_v21, 0  ;;  %v2467_v36 = vperm.slane %v2238_v21, 4 }
 0x4d8   : > { %2717 = vst [vmem:[#allocation1 + $0x4] ss:$9 sm:$0xff] %v2435_v17  ;;  %v2462_v17 = vperm.slane %v2237_v50, 7  ;;  %v2468_v40 = vperm.slane %v2238_v21, 5 }
 0x4d9   : > { %2718 = vst [vmem:[#allocation1 + $0x5] ss:$9 sm:$0xff] %v2436_v4  ;;  %v2073_v4 = vmul.f32 0.1, %v2037_v6 }
 0x4da   : > { %2719 = vst [vmem:[#allocation1 + $0x6] ss:$9 sm:$0xff] %v2437_v20 }
 0x4db   : > { %2720 = vst [vmem:[#allocation1 + $0x7] ss:$9 sm:$0xff] %v2438_v22  ;;  %v2105_v20 = vmax.f32 %v2037_v6, %v2073_v4  ;;  %v2040_v22 = vadd.f32 %v4281_v25, %v2039_v19 }
 0x4dd   : > { %v2141_v26 = vmul.f32 %v4294_v49, %v2105_v20 }
 0x4df   : > { %2202 = vadd.xlane.f32.xlu2 %v2141_v26  ;;  %v4400_v26 = vadd.s32 4294967224, %v4288_v47 }
 0x4e2   : > { %v4347_v31 = vld [vmem:[#allocation1] sm:$0xff] }
 0x4e3   : > { %2722 = vst [vmem:[#allocation1] ss:$9 sm:$0xff] %v2439_v3  ;;  %v2464_v3 = vperm.slane %v2238_v21, 1 }
 0x4e4   : > { %2723 = vst [vmem:[#allocation1 + $0x1] ss:$9 sm:$0xff] %v2440_v27  ;;  %v4376_v27 = vadd.s32 4294967240, %v4288_v47 }
 0x4e5   : > { %2724 = vst [vmem:[#allocation1 + $0x2] ss:$9 sm:$0xff] %v2441_v32  ;;  %v2074_v32 = vmul.f32 0.1, %v2040_v22 }
 0x4e6   : > { %2725 = vst [vmem:[#allocation1 + $0x3] ss:$9 sm:$0xff] %v2442_v33  ;;  %v2465_v33 = vperm.slane %v2238_v21, 2 }
 0x4e7   : > { %2726 = vst [vmem:[#allocation1 + $0x4] ss:$9 sm:$0xff] %v2443_v44  ;;  %v2853_v44 = vpop.permute.xlu1 %2852 }
 0x4e8   : > { %2727 = vst [vmem:[#allocation1 + $0x5] ss:$9 sm:$0xff] %v2444_v34  ;;  %v2466_v34 = vperm.slane %v2238_v21, 3 }
 0x4e9   : > { %2728 = vst [vmem:[#allocation1 + $0x6] ss:$9 sm:$0xff] %v2445_v35  ;;  %v2041_v35 = vpop.f32.mrf.mxu0 }
 0x4ea   : > { %2729 = vst [vmem:[#allocation1 + $0x7] ss:$9 sm:$0xff] %v2446_v37  ;;  %v2042_v37 = vadd.f32 %v4281_v25, %v2041_v35 }
 0x4ef   : > { %v2195_v6 = vpop.xlane.xlu1 %2194 }
 0x4f1   : > { %v4352_v45 = vld [vmem:[#allocation1] sm:$0xff] }
 0x4f2   : > { %2731 = vst [vmem:[#allocation1] ss:$9 sm:$0xff] %v2447_v39  ;;  %v2954_v39 = vperm.slane %v2853_v44, %v4376_v27 }
 0x4f3   : > { %2732 = vst [vmem:[#allocation1 + $0x1] ss:$9 sm:$0xff] %v2448_v41  ;;  %v2106_v41 = vmax.f32 %v2040_v22, %v2074_v32 }
 0x4f4   : > { %2733 = vst [vmem:[#allocation1 + $0x2] ss:$9 sm:$0xff] %v2449_v43  ;;  %v2469_v43 = vperm.slane %v2238_v21, 6 }
 0x4f5   : > { %2734 = vst [vmem:[#allocation1 + $0x3] ss:$9 sm:$0xff] %v2450_v48  ;;  %v2075_v48 = vmul.f32 0.1, %v2042_v37  ;;  %v2142_v25 = vmul.f32 %v4294_v49, %v2106_v41 }
 0x4f6   : > { %2735 = vst [vmem:[#allocation1 + $0x4] ss:$9 sm:$0xff] %v2451_v15  ;;  %v2193_v15 = vpop.xlane.xlu0 %2192 }
 0x4f7   : > { %2736 = vst [vmem:[#allocation1 + $0x5] ss:$9 sm:$0xff] %v2452_v30  ;;  %v2470_v30 = vperm.slane %v2238_v21, 7  ;;  %v2239_v5 = vadd.f32 %v4216_v28, %v2193_v15  ;;  %2204 = vadd.xlane.f32.xlu0 %v2142_v25  ;;  %2876 = vperm.xlu2 %3498, %v4314_v13   ;;  %v2862_v44 = vpop.permute.xlu1 %2861 }
 0x4f8   : > { %2737 = vst [vmem:[#allocation1 + $0x6] ss:$9 sm:$0xff] %v2453_v63  ;;  %v2107_v63 = vmax.f32 %v2042_v37, %v2075_v48 }
 0x4f9   : > { %2738 = vst [vmem:[#allocation1 + $0x7] ss:$9 sm:$0xff] %v2454_v42  ;;  %v2956_v42 = vsel %vm2955_vm6, %v2954_v39, %v2952_v12  ;;  %v2471_v53 = vperm.slane %v2239_v5, 0  ;;  %v2472_v29 = vperm.slane %v2239_v5, 1  ;;  %v2475_v62 = vperm.slane %v2239_v5, 4 }
 0x4fa   : > { %v2143_v50 = vmul.f32 %v4294_v49, %v2107_v63  ;;  %v2476_v46 = vperm.slane %v2239_v5, 5  ;;  %v4385_v49 = vadd.s32 4294967232, %v4288_v47 }
 0x4fd   : > { %2206 = vadd.xlane.f32.xlu1 %v2143_v50 }
 0x4ff   : > { %2885 = vperm.xlu2 %3498, %v4333_v9  }
 0x500   : > { %v4362_v60 = vld [vmem:[#allocation1] sm:$0xff] }
 0x501   : > { %2740 = vst [vmem:[#allocation1] ss:$9 sm:$0xff] %v2455_v56  ;;  %v2473_v56 = vperm.slane %v2239_v5, 2  ;;  %v2856_v7 = vpop.permute.xlu0 %2855 }
 0x502   : > { %2741 = vst [vmem:[#allocation1 + $0x1] ss:$9 sm:$0xff] %v2456_v59  ;;  %v2474_v59 = vperm.slane %v2239_v5, 3  ;;  %v2958_v12 = vperm.slane %v2856_v7, %v4385_v49 }
 0x503   : > { %2742 = vst [vmem:[#allocation1 + $0x2] ss:$9 sm:$0xff] %v2457_v0  ;;  %v2477_v0 = vperm.slane %v2239_v5, 6 }
 0x504   : > { %2743 = vst [vmem:[#allocation1 + $0x3] ss:$9 sm:$0xff] %v2458_v1  ;;  %v2478_v1 = vperm.slane %v2239_v5, 7  ;;  %v4415_v5 = vadd.s32 4294967200, %v4288_v47 }
 0x505   : > { %2744 = vst [vmem:[#allocation1 + $0x4] ss:$9 sm:$0xff] %v2459_v11  ;;  %v2240_v11 = vadd.f32 %v4216_v28, %v2195_v6 }
 0x506   : > { %2745 = vst [vmem:[#allocation1 + $0x5] ss:$9 sm:$0xff] %v2460_v14  ;;  %v2960_v14 = vsel %vm2959_vm7, %v2958_v12, %v2956_v42  ;;  %v4412_v42 = vadd.s32 4294967208, %v4288_v47 }
 0x507   : > { %2746 = vst [vmem:[#allocation1 + $0x6] ss:$9 sm:$0xff] %v2461_v16  ;;  %v2479_v16 = vperm.slane %v2240_v11, 0  ;;  %v2481_v18 = vperm.slane %v2240_v11, 2  ;;  %v2482_v19 = vperm.slane %v2240_v11, 3  ;;  %v2483_v20 = vperm.slane %v2240_v11, 4  ;;  %2894 = vperm.xlu2 %3498, %v4362_v60  }
 0x508   : > { %2747 = vst [vmem:[#allocation1 + $0x7] ss:$9 sm:$0xff] %v2462_v17  ;;  %v2480_v17 = vperm.slane %v2240_v11, 1  ;;  %v2484_v21 = vperm.slane %v2240_v11, 5  ;;  %v2485_v13 = vperm.slane %v2240_v11, 6  ;;  %v2486_v22 = vperm.slane %v2240_v11, 7 }
 0x509   : > { %v4404_v60 = vadd.s32 4294967216, %v4288_v47 }
 0x50b   : > { %2873 = vperm.xlu0 %3497, %v4306_v61   ;;  %v2859_v61 = vpop.permute.xlu2 %2858 }
 0x50f   : > { %v4373_v8 = vld [vmem:[#allocation1] sm:$0xff] }
 0x510   : > { %2749 = vst [vmem:[#allocation1] ss:$9 sm:$0xff] %v2463_v23 }
 0x511   : > { %2750 = vst [vmem:[#allocation1 + $0x1] ss:$9 sm:$0xff] %v2464_v3 }
 0x512   : > { %2751 = vst [vmem:[#allocation1 + $0x2] ss:$9 sm:$0xff] %v2465_v33 }
 0x513   : > { %2752 = vst [vmem:[#allocation1 + $0x3] ss:$9 sm:$0xff] %v2466_v34  ;;  %2882 = vperm.xlu0 %3497, %v4323_v38   ;;  %v2197_v9 = vpop.xlane.xlu2 %2196 }
 0x514   : > { %2753 = vst [vmem:[#allocation1 + $0x4] ss:$9 sm:$0xff] %v2467_v36  ;;  %v2241_v23 = vadd.f32 %v4216_v28, %v2197_v9 }
 0x515   : > { %2754 = vst [vmem:[#allocation1 + $0x5] ss:$9 sm:$0xff] %v2468_v40 }
 0x516   : > { %2755 = vst [vmem:[#allocation1 + $0x6] ss:$9 sm:$0xff] %v2469_v43  ;;  %2879 = vperm.xlu1 %3499, %v4319_v24   ;;  %v2487_v32 = vperm.slane %v2241_v23, 0  ;;  %v2488_v33 = vperm.slane %v2241_v23, 1  ;;  %v2489_v24 = vperm.slane %v2241_v23, 2  ;;  %v2490_v38 = vperm.slane %v2241_v23, 3 }
 0x517   : > { %2756 = vst [vmem:[#allocation1 + $0x7] ss:$9 sm:$0xff] %v2470_v30  ;;  %v2492_v34 = vperm.slane %v2241_v23, 5  ;;  %v2493_v35 = vperm.slane %v2241_v23, 6  ;;  %v2494_v36 = vperm.slane %v2241_v23, 7 }
 0x51b   : > { %2891 = vperm.xlu0 %3497, %v4352_v45   ;;  %v2962_v45 = vperm.slane %v2859_v61, %v4400_v26  ;;  %v2868_v50 = vpop.permute.xlu2 %2867 }
 0x51d   : > { %v2964_v37 = vsel %vm2963_vm8, %v2962_v45, %v2960_v14 }
 0x51e   : > { %v2757_v57 = vld [vmem:[#allocation1] sm:$0xff]  ;;  %2888 = vperm.xlu1 %3499, %v4347_v31   ;;  %v2491_v31 = vperm.slane %v2241_v23, 4 }
 0x51f   : > { %2758 = vst [vmem:[#allocation1] ss:$9 sm:$0xff] %v2471_v53 }
 0x520   : > { %2759 = vst [vmem:[#allocation1 + $0x1] ss:$9 sm:$0xff] %v2472_v29 }
 0x521   : > { %2760 = vst [vmem:[#allocation1 + $0x2] ss:$9 sm:$0xff] %v2473_v56 }
 0x522   : > { %2761 = vst [vmem:[#allocation1 + $0x3] ss:$9 sm:$0xff] %v2474_v59 }
 0x523   : > { %2762 = vst [vmem:[#allocation1 + $0x4] ss:$9 sm:$0xff] %v2475_v62  ;;  %2900 = vperm.xlu0 %3497, %v2757_v57   ;;  %v2974_v62 = vperm.slane %v2868_v50, %v4415_v5 }
 0x524   : > { %2763 = vst [vmem:[#allocation1 + $0x5] ss:$9 sm:$0xff] %v2476_v46 }
 0x525   : > { %2764 = vst [vmem:[#allocation1 + $0x6] ss:$9 sm:$0xff] %v2477_v0 }
 0x526   : > { %2765 = vst [vmem:[#allocation1 + $0x7] ss:$9 sm:$0xff] %v2478_v1  ;;  %2897 = vperm.xlu1 %3499, %v4373_v8   ;;  %v2966_v8 = vperm.slane %v2862_v44, %v4404_v60 }
 0x528   : > { %v2968_v39 = vsel %vm2967_vm9, %v2966_v8, %v2964_v37 }
 0x52c   : > { %v2199_v40 = vpop.xlane.xlu0 %2198 }
 0x52d   : > { %v2766_v4 = vld [vmem:[#allocation1] sm:$0xff]  ;;  %v2242_v41 = vadd.f32 %v4216_v28, %v2199_v40  ;;  %v2201_v0 = vpop.xlane.xlu1 %2200 }
 0x52e   : > { %2767 = vst [vmem:[#allocation1] ss:$9 sm:$0xff] %v2479_v16  ;;  %2903 = vperm.xlu2 %3498, %v2766_v4   ;;  %v2243_v6 = vadd.f32 %v4216_v28, %v2201_v0 }
 0x52f   : > { %2768 = vst [vmem:[#allocation1 + $0x1] ss:$9 sm:$0xff] %v2480_v17  ;;  %v2495_v43 = vperm.slane %v2242_v41, 0  ;;  %v2496_v48 = vperm.slane %v2242_v41, 1  ;;  %v2497_v15 = vperm.slane %v2242_v41, 2  ;;  %v2498_v63 = vperm.slane %v2242_v41, 3 }
 0x530   : > { %2769 = vst [vmem:[#allocation1 + $0x2] ss:$9 sm:$0xff] %v2481_v18  ;;  %v2499_v25 = vperm.slane %v2242_v41, 4  ;;  %v2500_v53 = vperm.slane %v2242_v41, 5  ;;  %v2501_v29 = vperm.slane %v2242_v41, 6  ;;  %v2502_v57 = vperm.slane %v2242_v41, 7 }
 0x531   : > { %2770 = vst [vmem:[#allocation1 + $0x3] ss:$9 sm:$0xff] %v2482_v19  ;;  %v2503_v7 = vperm.slane %v2243_v6, 0  ;;  %v2504_v11 = vperm.slane %v2243_v6, 1  ;;  %v2505_v14 = vperm.slane %v2243_v6, 2  ;;  %v2506_v16 = vperm.slane %v2243_v6, 3 }
 0x532   : > { %2771 = vst [vmem:[#allocation1 + $0x4] ss:$9 sm:$0xff] %v2483_v20  ;;  %v2507_v17 = vperm.slane %v2243_v6, 4  ;;  %v2508_v4 = vperm.slane %v2243_v6, 5  ;;  %v2509_v18 = vperm.slane %v2243_v6, 6  ;;  %v2510_v19 = vperm.slane %v2243_v6, 7 }
 0x533   : > { %2772 = vst [vmem:[#allocation1 + $0x5] ss:$9 sm:$0xff] %v2484_v21 }
 0x534   : > { %2773 = vst [vmem:[#allocation1 + $0x6] ss:$9 sm:$0xff] %v2485_v13 }
 0x535   : > { %2774 = vst [vmem:[#allocation1 + $0x7] ss:$9 sm:$0xff] %v2486_v22 }
 0x53c   : > { %v2775_v3 = vld [vmem:[#allocation1] sm:$0xff] }
 0x53d   : > { %2776 = vst [vmem:[#allocation1] ss:$9 sm:$0xff] %v2487_v32  ;;  %2906 = vperm.xlu1 %3499, %v2775_v3  }
 0x53e   : > { %2777 = vst [vmem:[#allocation1 + $0x1] ss:$9 sm:$0xff] %v2488_v33 }
 0x53f   : > { %2778 = vst [vmem:[#allocation1 + $0x2] ss:$9 sm:$0xff] %v2489_v24  ;;  %v2865_v56 = vpop.permute.xlu0 %2864 }
 0x540   : > { %2779 = vst [vmem:[#allocation1 + $0x3] ss:$9 sm:$0xff] %v2490_v38  ;;  %v2970_v59 = vperm.slane %v2865_v56, %v4412_v42 }
 0x541   : > { %2780 = vst [vmem:[#allocation1 + $0x4] ss:$9 sm:$0xff] %v2491_v31  ;;  %v4424_v31 = vadd.s32 4294967192, %v4288_v47 }
 0x542   : > { %2781 = vst [vmem:[#allocation1 + $0x5] ss:$9 sm:$0xff] %v2492_v34  ;;  %v2972_v46 = vsel %vm2971_vm10, %v2970_v59, %v2968_v39 }
 0x543   : > { %2782 = vst [vmem:[#allocation1 + $0x6] ss:$9 sm:$0xff] %v2493_v35  ;;  %v2976_v1 = vsel %vm2975_vm11, %v2974_v62, %v2972_v46 }
 0x544   : > { %2783 = vst [vmem:[#allocation1 + $0x7] ss:$9 sm:$0xff] %v2494_v36 }
 0x545   : > { %v2871_v44 = vpop.permute.xlu1 %2870 }
 0x546   : > { %v2978_v34 = vperm.slane %v2871_v44, %v4424_v31 }
 0x548   : > { %v4429_v8 = vsel %vm2979_vm12, %v2978_v34, %v2976_v1 }
 0x54b   : > { %v2784_v30 = vld [vmem:[#allocation1] sm:$0xff] }
 0x54c   : > { %2909 = vperm.xlu0 %3497, %v2784_v30   ;;  %2785 = vst [vmem:[#allocation1] ss:$9 sm:$0xff] %v2495_v43 }
 0x54d   : > { %2786 = vst [vmem:[#allocation1 + $0x1] ss:$9 sm:$0xff] %v2496_v48 }
 0x54e   : > { %2787 = vst [vmem:[#allocation1 + $0x2] ss:$9 sm:$0xff] %v2497_v15 }
 0x54f   : > { %2788 = vst [vmem:[#allocation1 + $0x3] ss:$9 sm:$0xff] %v2498_v63 }
 0x550   : > { %2789 = vst [vmem:[#allocation1 + $0x4] ss:$9 sm:$0xff] %v2499_v25 }
 0x551   : > { %2790 = vst [vmem:[#allocation1 + $0x5] ss:$9 sm:$0xff] %v2500_v53 }
 0x552   : > { %2791 = vst [vmem:[#allocation1 + $0x6] ss:$9 sm:$0xff] %v2501_v29  ;;  %v2203_v21 = vpop.xlane.xlu2 %2202 }
 0x553   : > { %2792 = vst [vmem:[#allocation1 + $0x7] ss:$9 sm:$0xff] %v2502_v57  ;;  %v2244_v13 = vadd.f32 %v4216_v28, %v2203_v21 }
 0x555   : > { %v2511_v22 = vperm.slane %v2244_v13, 0  ;;  %v2512_v61 = vperm.slane %v2244_v13, 1  ;;  %v2513_v9 = vperm.slane %v2244_v13, 2  ;;  %v2514_v23 = vperm.slane %v2244_v13, 3 }
 0x556   : > { %v2515_v3 = vperm.slane %v2244_v13, 4  ;;  %v2516_v32 = vperm.slane %v2244_v13, 5  ;;  %v2517_v33 = vperm.slane %v2244_v13, 6  ;;  %v2518_v24 = vperm.slane %v2244_v13, 7 }
 0x55a   : > { %v2793_v12 = vld [vmem:[#allocation1] sm:$0xff]  ;;  %v4432_v1 = vpop.permute.xlu2 %2876 }
 0x55b   : > { %2912 = vperm.xlu2 %3498, %v2793_v12   ;;  %2794 = vst [vmem:[#allocation1] ss:$9 sm:$0xff] %v2503_v7 }
 0x55c   : > { %2795 = vst [vmem:[#allocation1 + $0x1] ss:$9 sm:$0xff] %v2504_v11 }
 0x55d   : > { %2796 = vst [vmem:[#allocation1 + $0x2] ss:$9 sm:$0xff] %v2505_v14 }
 0x55e   : > { %2797 = vst [vmem:[#allocation1 + $0x3] ss:$9 sm:$0xff] %v2506_v16 }
 0x55f   : > { %2798 = vst [vmem:[#allocation1 + $0x4] ss:$9 sm:$0xff] %v2507_v17 }
 0x560   : > { %2799 = vst [vmem:[#allocation1 + $0x5] ss:$9 sm:$0xff] %v2508_v4 }
 0x561   : > { %2800 = vst [vmem:[#allocation1 + $0x6] ss:$9 sm:$0xff] %v2509_v18 }
 0x562   : > { %2801 = vst [vmem:[#allocation1 + $0x7] ss:$9 sm:$0xff] %v2510_v19  ;;  %v2886_v11 = vpop.permute.xlu2 %2885 }
 0x569   : > { %v2802_v20 = vld [vmem:[#allocation1] sm:$0xff] }
 0x56a   : > { %2915 = vperm.xlu1 %3499, %v2802_v20   ;;  %2803 = vst [vmem:[#allocation1] ss:$9 sm:$0xff] %v2511_v22  ;;  %v2205_v38 = vpop.xlane.xlu0 %2204  ;;  %v2895_v16 = vpop.permute.xlu2 %2894  ;;  %v2992_v20 = vperm.slane %v2886_v11, %v4304_v58 }
 0x56b   : > { %2804 = vst [vmem:[#allocation1 + $0x1] ss:$9 sm:$0xff] %v2512_v61  ;;  %v2245_v45 = vadd.f32 %v4216_v28, %v2205_v38 }
 0x56c   : > { %2805 = vst [vmem:[#allocation1 + $0x2] ss:$9 sm:$0xff] %v2513_v9 }
 0x56d   : > { %2806 = vst [vmem:[#allocation1 + $0x3] ss:$9 sm:$0xff] %v2514_v23  ;;  %v2519_v35 = vperm.slane %v2245_v45, 0  ;;  %v2520_v36 = vperm.slane %v2245_v45, 1  ;;  %v2521_v37 = vperm.slane %v2245_v45, 2  ;;  %v2522_v39 = vperm.slane %v2245_v45, 3 }
 0x56e   : > { %2807 = vst [vmem:[#allocation1 + $0x4] ss:$9 sm:$0xff] %v2515_v3  ;;  %v2523_v41 = vperm.slane %v2245_v45, 4  ;;  %v2524_v43 = vperm.slane %v2245_v45, 5  ;;  %v2525_v48 = vperm.slane %v2245_v45, 6  ;;  %v2526_v15 = vperm.slane %v2245_v45, 7 }
 0x56f   : > { %2808 = vst [vmem:[#allocation1 + $0x5] ss:$9 sm:$0xff] %v2516_v32 }
 0x570   : > { %2809 = vst [vmem:[#allocation1 + $0x6] ss:$9 sm:$0xff] %v2517_v33  ;;  %v2207_v30 = vpop.xlane.xlu1 %2206 }
 0x571   : > { %2810 = vst [vmem:[#allocation1 + $0x7] ss:$9 sm:$0xff] %v2518_v24  ;;  %v2246_v63 = vadd.f32 %v4216_v28, %v2207_v30 }
 0x573   : > { %v2527_v25 = vperm.slane %v2246_v63, 0  ;;  %v2528_v50 = vperm.slane %v2246_v63, 1  ;;  %v2529_v29 = vperm.slane %v2246_v63, 2  ;;  %v2530_v56 = vperm.slane %v2246_v63, 3 }
 0x574   : > { %v2531_v57 = vperm.slane %v2246_v63, 4  ;;  %v2532_v59 = vperm.slane %v2246_v63, 5  ;;  %v2533_v62 = vperm.slane %v2246_v63, 6  ;;  %v2534_v46 = vperm.slane %v2246_v63, 7 }
 0x578   : > { %v2811_v40 = vld [vmem:[#allocation1] sm:$0xff] }
 0x579   : > { %2918 = vperm.xlu0 %3497, %v2811_v40   ;;  %2812 = vst [vmem:[#allocation1] ss:$9 sm:$0xff] %v2519_v35 }
 0x57a   : > { %2813 = vst [vmem:[#allocation1 + $0x1] ss:$9 sm:$0xff] %v2520_v36 }
 0x57b   : > { %2814 = vst [vmem:[#allocation1 + $0x2] ss:$9 sm:$0xff] %v2521_v37 }
 0x57c   : > { %2815 = vst [vmem:[#allocation1 + $0x3] ss:$9 sm:$0xff] %v2522_v39 }
 0x57d   : > { %2816 = vst [vmem:[#allocation1 + $0x4] ss:$9 sm:$0xff] %v2523_v41  ;;  %v2874_v28 = vpop.permute.xlu0 %2873 }
 0x57e   : > { %2817 = vst [vmem:[#allocation1 + $0x5] ss:$9 sm:$0xff] %v2524_v43 }
 0x57f   : > { %2818 = vst [vmem:[#allocation1 + $0x6] ss:$9 sm:$0xff] %v2525_v48 }
 0x580   : > { %2819 = vst [vmem:[#allocation1 + $0x7] ss:$9 sm:$0xff] %v2526_v15 }
 0x585   : > { %v2883_v7 = vpop.permute.xlu0 %2882 }
 0x586   : > { %v2990_v17 = vperm.slane %v2883_v7, %v4299_v51  ;;  %v2998_v51 = vperm.slane %v2895_v16, %v4360_v54 }
 0x587   : > { %v2820_v53 = vld [vmem:[#allocation1] sm:$0xff] }
 0x588   : > { %2921 = vperm.xlu2 %3498, %v2820_v53   ;;  %2821 = vst [vmem:[#allocation1] ss:$9 sm:$0xff] %v2527_v25  ;;  %v2880_v6 = vpop.permute.xlu1 %2879  ;;  %v2904_v61 = vpop.permute.xlu2 %2903 }
 0x589   : > { %2822 = vst [vmem:[#allocation1 + $0x1] ss:$9 sm:$0xff] %v2528_v50  ;;  %v2989_v4 = vperm.slane %v2880_v6, %v4288_v47  ;;  %v3004_v44 = vperm.slane %v2904_v61, %v4385_v49 }
 0x58a   : > { %2823 = vst [vmem:[#allocation1 + $0x2] ss:$9 sm:$0xff] %v2529_v29 }
 0x58b   : > { %2824 = vst [vmem:[#allocation1 + $0x3] ss:$9 sm:$0xff] %v2530_v56  ;;  %v2991_v19 = vsel %vm2931_vm0, %v2990_v17, %v2989_v4  ;;  %vm3026_vm0 = vcmp.lt.s32.totalorder %v2926_v55, 256 }
 0x58c   : > { %2825 = vst [vmem:[#allocation1 + $0x4] ss:$9 sm:$0xff] %v2531_v57  ;;  %v2993_v13 = vsel %vm2935_vm1, %v2992_v20, %v2991_v19 }
 0x58d   : > { %2826 = vst [vmem:[#allocation1 + $0x5] ss:$9 sm:$0xff] %v2532_v59  ;;  %v2892_v14 = vpop.permute.xlu0 %2891 }
 0x58e   : > { %2827 = vst [vmem:[#allocation1 + $0x6] ss:$9 sm:$0xff] %v2533_v62  ;;  %v2996_v22 = vperm.slane %v2892_v14, %v4336_v10 }
 0x58f   : > { %2828 = vst [vmem:[#allocation1 + $0x7] ss:$9 sm:$0xff] %v2534_v46 }
 0x590   : > { %v2889_v12 = vpop.permute.xlu1 %2888 }
 0x591   : > { %v2994_v9 = vperm.slane %v2889_v12, %v4331_v2 }
 0x593   : > { %v2995_v23 = vsel %vm2939_vm2, %v2994_v9, %v2993_v13 }
 0x594   : > { %v2997_v3 = vsel %vm2943_vm3, %v2996_v22, %v2995_v23 }
 0x595   : > { %v2901_v21 = vpop.permute.xlu0 %2900  ;;  %v2999_v33 = vsel %vm2947_vm4, %v2998_v51, %v2997_v3 }
 0x596   : > { %v2829_v0 = vld [vmem:[#allocation1] sm:$0xff]  ;;  %v3002_v24 = vperm.slane %v2901_v21, %v4376_v27  ;;  %v2981_v27 = vadd.s32 4294967184, %v4288_v47 }
 0x597   : > { %2924 = vperm.xlu1 %3499, %v2829_v0  }
 0x598   : > { %v2898_v18 = vpop.permute.xlu1 %2897 }
 0x599   : > { %v3000_v58 = vperm.slane %v2898_v18, %v4357_v52 }
 0x59b   : > { %v3001_v45 = vsel %vm2951_vm5, %v3000_v58, %v2999_v33 }
 0x59c   : > { %v3003_v2 = vsel %vm2955_vm6, %v3002_v24, %v3001_v45 }
 0x59d   : > { %v3005_v34 = vsel %vm2959_vm7, %v3004_v44, %v3003_v2 }
 0x5af   : > { %v2907_v32 = vpop.permute.xlu1 %2906 }
 0x5b0   : > { %v3006_v36 = vperm.slane %v2907_v32, %v4400_v26  ;;  %v2985_v26 = vadd.s32 4294967176, %v4288_v47 }
 0x5b2   : > { %v3007_v37 = vsel %vm2963_vm8, %v3006_v36, %v3005_v34  ;;  %v2986_v47 = vperm.slane %v4432_v1, %v2985_v26 }
 0x5b5   : > { %v2913_v10 = vpop.permute.xlu2 %2912 }
 0x5b6   : > { %v3010_v49 = vperm.slane %v2913_v10, %v4412_v42 }
 0x5be   : > { %v2910_v38 = vpop.permute.xlu0 %2909 }
 0x5bf   : > { %v3008_v54 = vperm.slane %v2910_v38, %v4404_v60  ;;  %v2982_v60 = vperm.slane %v2874_v28, %v2981_v27 }
 0x5c1   : > { %v3009_v39 = vsel %vm2967_vm9, %v3008_v54, %v3007_v37  ;;  %v2984_v42 = vsel %vm2983_vm13, %v2982_v60, %v4429_v8 }
 0x5c2   : > { %v3011_v15 = vsel %vm2971_vm10, %v3010_v49, %v3009_v39  ;;  %v2988_v29 = vsel %vm2987_vm14, %v2986_v47, %v2984_v42 }
 0x5dc   : > { %v2916_v35 = vpop.permute.xlu1 %2915 }
 0x5dd   : > { %v3012_v41 = vperm.slane %v2916_v35, %v4415_v5 }
 0x5df   : > { %v3013_v30 = vsel %vm2975_vm11, %v3012_v41, %v3011_v15 }
 0x5e2   : > { %v2922_v40 = vpop.permute.xlu2 %2921 }
 0x5e3   : > { %v3016_v48 = vperm.slane %v2922_v40, %v2981_v27 }
 0x5eb   : > { %v2919_v52 = vpop.permute.xlu0 %2918 }
 0x5ec   : > { %v3014_v43 = vperm.slane %v2919_v52, %v4424_v31 }
 0x5ee   : > { %v3015_v63 = vsel %vm2979_vm12, %v3014_v43, %v3013_v30 }
 0x5ef   : > { %v3017_v31 = vsel %vm2983_vm13, %v3016_v48, %v3015_v63 }
 0x609   : > { %v2925_v5 = vpop.permute.xlu1 %2924 }
 0x60a   : > { %v3018_v25 = vperm.slane %v2925_v5, %v2985_v26 }
 0x60c   : > { %v3019_v50 = vsel %vm2987_vm14, %v3018_v25, %v3017_v31 }
 0x60d   : > { %v3020_v53 = vrot.slane %v3019_v50, 7 }
 0x60f   : > { %v3022_v56 = vsel %vm3021_vm15, %v2988_v29, %v3020_v53 }
 0x610   : > { %3028 = vst.msk [vmem:[%s545_s16] sm:$0x3] %vm3026_vm0, %v3022_v56 }
 0x611   : > { %3718 = shalt.err (!%p3715_p9)
}
 0x612   : > { %3417 = dma.vmem_to_hbm [thread:$0]  (%p3943_p13), %s3043_s25, 32, %s3045_s20, %s3030_s19  }
 0x613 PF: > { %s3056_s14 = sand.u32 1, %s3757_s27   ;;  %p4538_p10 = scmp.ge.s32.totalorder %s3769_s30, 2 }
 0x614   : > { %s3057_s7 = scalar_lea.sflag [#allocation5], %s3056_s14 }
 0x615   : > { %p3440_p11 = pnand %p4538_p10, %p3948_p4 }
 0x617   : > { %p3441_p0 = pneg %p3440_p11 }
 0x619   : > { %3752 = dma.done.wait (%p3441_p0), %s3057_s7, 32  }
 0x61a   : > { %3754 = vsyncadd (%p3441_p0), %s3057_s7, 4294967264  ;;  %p31_p2 = scmp.ge.s32.totalorder %s3923_s15, 4   ;;  %s4539_s27 = smov %s3761_s28 }
 0x61b   : > { %s4540_s28 = smov %s3765_s29  ;;  %s4541_s29 = smov %s3935_s11 }
 0x61c   : > { %s4542_s30 = smov %s3923_s15  ;;  %33 = sbr.rel (!%p31_p2) target bundleno = 15 (0xf), region = 144 }
 0x621   :  { %3063 = vsyncpa [#allocation4], 1 }
 0x622   :  { %3065 = vsyncpa [#allocation4 + $0x1], 1 }
 0x623   :  { %3066 = vsyncpa [#allocation7], 1 }
 0x624   :  { %3067 = vsyncpa [#allocation10], 1 }
 0x625   :  { %3068 = vsyncpa [#allocation13], 1 }
 0x626   :  { %3069 = vsyncpa [#allocation5], 1 }
 0x627   :  { %3071 = vsyncpa [#allocation5 + $0x1], 1 }

</bundles_post_ra>
